<compile_context>
chip_gen: v7x
topology: tpu7x:2x2x1
jax: 0.10.0
libtpu: 0.0.40
codegen_flags: <defaults>
</compile_context>

<pallas_src>
import jax
import jax.numpy as jnp
from jax.experimental import pallas as pl
from jax.experimental.pallas import tpu as pltpu

# ----------------------------- model dims ---------------------------------
B = 2            # batch
S = 8            # sequence length
D_IN = 32        # dim_inp
D_OUT = 32       # dim_out per head (== D_IN here, which the bias slab relies on)
H = 4            # attention heads
NQKV = 3 * H     # 12 projection matrices (q heads, k heads, v heads)
LN_EPS = 1e-5
HP = jax.lax.Precision.HIGHEST   # full-f32 matmul accuracy on MXU (kernel & ref)

# -------------------- vector-slab (biases / LN) row layout ------------------
ROW_BQ = 0                 # rows [0, 4)   : bq per head
ROW_BK = H                 # rows [4, 8)   : bk per head
ROW_BV = 2 * H             # rows [8, 12)  : bv per head
ROW_BO = 3 * H             # row 12        : output-linear bias
ROW_GAMMA = 3 * H + 1      # row 13        : LayerNorm gamma
ROW_BETA = 3 * H + 2       # row 14        : LayerNorm beta
V_ROWS = 16                # padded to a sublane multiple


def pack_params(wq, bq, wk, bk, wv, bv, wo, bo, gamma, beta):
    """Pack params into a dense (16,32,32) weight slab and a (16,32) vector slab."""
    # weight slab: [Wq_0..3, Wk_0..3, Wv_0..3, Wo_0..3]; Wo_h is the (D_OUT, D_IN)
    # block of the output Linear that multiplies head h's context.
    w_slab = jnp.concatenate(
        [wq, wk, wv, wo.reshape(H, D_OUT, D_IN)], axis=0).astype(jnp.float32)
    v_slab = jnp.zeros((V_ROWS, D_IN), jnp.float32)
    v_slab = v_slab.at[ROW_BQ:ROW_BQ + H].set(bq)
    v_slab = v_slab.at[ROW_BK:ROW_BK + H].set(bk)
    v_slab = v_slab.at[ROW_BV:ROW_BV + H].set(bv)
    v_slab = v_slab.at[ROW_BO].set(bo)
    v_slab = v_slab.at[ROW_GAMMA].set(gamma)
    v_slab = v_slab.at[ROW_BETA].set(beta)
    return w_slab, v_slab


# --------------------------------- kernel ----------------------------------
def mha_kernel(x_ref, mask_ref, w_ref, v_ref, out_ref):
    # x_ref: (B, S, D_IN), mask_ref: (B, S, S) f32 (1.0 == masked),
    # w_ref: (16, 32, 32) weight slab, v_ref: (16, 32) bias/LN slab,
    # out_ref: (B*S, D_IN).
    x = x_ref[...]                                         # (2, 8, 32)
    mask = mask_ref[...]                                   # (2, 8, 8)

    w_qkv = w_ref[0:NQKV]                                  # (12, 32, 32)
    w_o = w_ref[NQKV:NQKV + H]                             # (4, 32, 32)
    b_qkv = v_ref[ROW_BQ:ROW_BQ + NQKV]                    # (12, 32)
    b_o = v_ref[ROW_BO:ROW_BO + 1]                         # (1, 32)
    gamma = v_ref[ROW_GAMMA:ROW_GAMMA + 1]                 # (1, 32)
    beta = v_ref[ROW_BETA:ROW_BETA + 1]                    # (1, 32)

    # ---- batched Q/K/V projection: ONE dot_general over N = B*3*H = 24 ----
    # (leading-dim broadcasts only; keeps head on the batch axis so no
    #  lane-split reshape is ever needed downstream)
    N = B * NQKV
    xb = jnp.broadcast_to(x[:, None], (B, NQKV, S, D_IN)).reshape(N, S, D_IN)
    wb = jnp.broadcast_to(w_qkv[None], (B, NQKV, D_IN, D_OUT)).reshape(N, D_IN, D_OUT)
    bb = jnp.broadcast_to(b_qkv[None, :, None, :], (B, NQKV, 1, D_OUT)).reshape(N, 1, D_OUT)
    qkv = jnp.einsum('nsd,ndo->nso', xb, wb,
                     preferred_element_type=jnp.float32, precision=HP) + bb  # (24, 8, 32)
    qkv = qkv.reshape(B, 3, H, S, D_OUT)                   # leading split only
    q = qkv[:, 0].reshape(B * H, S, D_OUT)                 # (8, 8, 32), n = b*H + h
    k = qkv[:, 1].reshape(B * H, S, D_OUT)
    v = qkv[:, 2].reshape(B * H, S, D_OUT)

    # ---- ONE vectorized score / masked-fill / softmax / attn@V chain ------
    inv_scale = jnp.float32(1.0 / (float(S) ** 0.5))       # PyTorch: query.size(1)**0.5
    m = jnp.broadcast_to(mask[:, None], (B, H, S, S)).reshape(B * H, S, S)
    s = jnp.einsum('nqd,nkd->nqk', q, k,
                   preferred_element_type=jnp.float32, precision=HP) * inv_scale
    s = jnp.where(m >= 0.5, jnp.float32(-1e9), s)          # exact masked_fill_(mask, -1e9)
    s = s - jnp.max(s, axis=-1, keepdims=True)             # stable softmax
    e = jnp.exp(s)
    denom = jnp.sum(e, axis=-1, keepdims=True)
    attn = e * pl.reciprocal(denom, approx=False)          # EXACT reciprocal (was approx)
    ctx = jnp.einsum('nqk,nkd->nqd', attn, v,
                     preferred_element_type=jnp.float32, precision=HP)       # (8, 8, 32)

    # ---- head-partitioned output projection: sum_h ctx_h @ Wo_h -----------
    # (replaces the concat-to-(16,128) + ctx VMEM scratch round trip)
    wob = jnp.broadcast_to(w_o[None], (B, H, D_OUT, D_IN)).reshape(B * H, D_OUT, D_IN)
    part = jnp.einsum('nsd,ndo->nso', ctx, wob,
                      preferred_element_type=jnp.float32, precision=HP)      # (8, 8, 32)
    part = part.reshape(B, H, S, D_IN)
    proj = part[:, 0]
    for h in range(1, H):                                   # H = 4, static unroll
        proj = proj + part[:, h]                            # (B, S, D_IN)
    proj = proj.reshape(B * S, D_IN) + b_o                  # (16, 32)

    # ---- LayerNorm over the feature dim ------------------------------------
    mean = jnp.mean(proj, axis=-1, keepdims=True)
    var = jnp.mean((proj - mean) ** 2, axis=-1, keepdims=True)
    out_ref[...] = (proj - mean) * jax.lax.rsqrt(var + LN_EPS) * gamma + beta


# -------------------------------- wrapper -----------------------------------
@jax.jit
def mha_pallas(x, mask_f32, w_slab, v_slab):
    out2d = pl.pallas_call(
        mha_kernel,
        out_shape=jax.ShapeDtypeStruct((B * S, D_IN), jnp.float32),
        in_specs=[
            pl.BlockSpec(memory_space=pltpu.MemorySpace.VMEM),   # x
            pl.BlockSpec(memory_space=pltpu.MemorySpace.VMEM),   # mask (f32)
            pl.BlockSpec(memory_space=pltpu.MemorySpace.VMEM),   # weight slab
            pl.BlockSpec(memory_space=pltpu.MemorySpace.VMEM),   # bias/LN slab
        ],
        out_specs=pl.BlockSpec(memory_space=pltpu.MemorySpace.VMEM),
        # no grid, no scratch: single latency-bound invocation; VMEM footprint ~0.3 MiB
    )(x, mask_f32, w_slab, v_slab)
    return out2d.reshape(B, S, D_IN)


# ------------------------ pure-JAX reference (checking) ----------------------
def mha_ref(x, mask_bool, wq, bq, wk, bk, wv, bv, wo, bo, gamma, beta):
    scale = float(S) ** 0.5
    ctxs = []
    for h in range(H):
        q = jnp.einsum('bsd,do->bso', x, wq[h], precision=HP) + bq[h]
        k = jnp.einsum('bsd,do->bso', x, wk[h], precision=HP) + bk[h]
        v = jnp.einsum('bsd,do->bso', x, wv[h], precision=HP) + bv[h]
        s = jnp.einsum('bqd,bkd->bqk', q, k, precision=HP) / scale
        s = jnp.where(mask_bool, -1e9, s)
        a = jax.nn.softmax(s, axis=-1)
        ctxs.append(jnp.einsum('bqk,bkd->bqd', a, v, precision=HP))
    cat = jnp.concatenate(ctxs, axis=-1)                     # (B, S, H*D_OUT)
    proj = jnp.einsum('bsk,ko->bso', cat, wo, precision=HP) + bo
    mean = proj.mean(-1, keepdims=True)
    var = ((proj - mean) ** 2).mean(-1, keepdims=True)
    return (proj - mean) * jax.lax.rsqrt(var + LN_EPS) * gamma + beta


# ----------------------------------- main ------------------------------------
if __name__ == "__main__":
    key = jax.random.PRNGKey(0)
    ks = jax.random.split(key, 12)

    # deterministic synthetic parameters (math orientation: x @ W + b)
    wq = 0.05 * jax.random.normal(ks[0], (H, D_IN, D_OUT), jnp.float32)
    bq = 0.05 * jax.random.normal(ks[1], (H, D_OUT), jnp.float32)
    wk = 0.05 * jax.random.normal(ks[2], (H, D_IN, D_OUT), jnp.float32)
    bk = 0.05 * jax.random.normal(ks[3], (H, D_OUT), jnp.float32)
    wv = 0.05 * jax.random.normal(ks[4], (H, D_IN, D_OUT), jnp.float32)
    bv = 0.05 * jax.random.normal(ks[5], (H, D_OUT), jnp.float32)
    wo = 0.05 * jax.random.normal(ks[6], (H * D_OUT, D_IN), jnp.float32)
    bo = 0.05 * jax.random.normal(ks[7], (D_IN,), jnp.float32)
    gamma = 1.0 + 0.05 * jax.random.normal(ks[8], (D_IN,), jnp.float32)
    beta = 0.05 * jax.random.normal(ks[9], (D_IN,), jnp.float32)

    # deterministic inputs
    x = jax.random.normal(ks[10], (B, S, D_IN), jnp.float32)
    mask_bool = jax.random.uniform(ks[11], (B, S, S)) < 0.2   # True == masked
    mask_f32 = mask_bool.astype(jnp.float32)

    w_slab, v_slab = pack_params(wq, bq, wk, bk, wv, bv, wo, bo, gamma, beta)

    out = mha_pallas(x, mask_f32, w_slab, v_slab)
    out = jax.block_until_ready(out)

    ref = mha_ref(x, mask_bool, wq, bq, wk, bk, wv, bv, wo, bo, gamma, beta)
    assert out.shape == (B, S, D_IN)
    assert jnp.allclose(out, ref, atol=1e-3, rtol=1e-3), "mismatch vs JAX reference"

    print("KERNEL_OK")
</pallas_src>

<mosaic_0001>
module attributes {stable_mosaic.version = 11 : i64} {
  func.func @mha_kernel(%arg0: memref<2x8x32xf32, #tpu.memory_space<vmem>>, %arg1: memref<2x8x8xf32, #tpu.memory_space<vmem>>, %arg2: memref<16x32x32xf32, #tpu.memory_space<vmem>>, %arg3: memref<16x32xf32, #tpu.memory_space<vmem>>, %arg4: memref<16x32xf32, #tpu.memory_space<vmem>>) attributes {dimension_semantics = [], scalar_prefetch = 0 : i64, scratch_operands = 0 : i64, tpu.core_type = #tpu.core_type<tc>} {
    %c0 = arith.constant 0 : index
    %c0_0 = arith.constant 0 : index
    %c0_1 = arith.constant 0 : index
    %0 = vector.load %arg0[%c0, %c0_0, %c0_1] : memref<2x8x32xf32, #tpu.memory_space<vmem>>, vector<2x8x32xf32>
    %c0_2 = arith.constant 0 : index
    %c0_3 = arith.constant 0 : index
    %c0_4 = arith.constant 0 : index
    %1 = vector.load %arg1[%c0_2, %c0_3, %c0_4] : memref<2x8x8xf32, #tpu.memory_space<vmem>>, vector<2x8x8xf32>
    %c0_5 = arith.constant 0 : index
    %c0_6 = arith.constant 0 : index
    %c0_7 = arith.constant 0 : index
    %2 = vector.load %arg2[%c0_5, %c0_6, %c0_7] : memref<16x32x32xf32, #tpu.memory_space<vmem>>, vector<12x32x32xf32>
    %c12 = arith.constant 12 : index
    %c0_8 = arith.constant 0 : index
    %c0_9 = arith.constant 0 : index
    %3 = vector.load %arg2[%c12, %c0_8, %c0_9] : memref<16x32x32xf32, #tpu.memory_space<vmem>>, vector<4x32x32xf32>
    %c0_10 = arith.constant 0 : index
    %c0_11 = arith.constant 0 : index
    %4 = vector.load %arg3[%c0_10, %c0_11] : memref<16x32xf32, #tpu.memory_space<vmem>>, vector<12x32xf32>
    %c12_12 = arith.constant 12 : index
    %c0_13 = arith.constant 0 : index
    %5 = vector.load %arg3[%c12_12, %c0_13] : memref<16x32xf32, #tpu.memory_space<vmem>>, vector<1x32xf32>
    %c13 = arith.constant 13 : index
    %c0_14 = arith.constant 0 : index
    %6 = vector.load %arg3[%c13, %c0_14] : memref<16x32xf32, #tpu.memory_space<vmem>>, vector<1x32xf32>
    %c14 = arith.constant 14 : index
    %c0_15 = arith.constant 0 : index
    %7 = vector.load %arg3[%c14, %c0_15] : memref<16x32xf32, #tpu.memory_space<vmem>>, vector<1x32xf32>
    %8 = vector.shape_cast %0 : vector<2x8x32xf32> to vector<2x1x8x32xf32>
    %9 = vector.shape_cast %8 : vector<2x1x8x32xf32> to vector<2x1x8x32xf32>
    %10 = vector.broadcast %9 : vector<2x1x8x32xf32> to vector<2x12x8x32xf32>
    %11 = vector.shape_cast %10 : vector<2x12x8x32xf32> to vector<24x8x32xf32>
    %12 = vector.shape_cast %2 : vector<12x32x32xf32> to vector<1x12x32x32xf32>
    %13 = vector.shape_cast %12 : vector<1x12x32x32xf32> to vector<1x12x32x32xf32>
    %14 = vector.broadcast %13 : vector<1x12x32x32xf32> to vector<2x12x32x32xf32>
    %15 = vector.shape_cast %14 : vector<2x12x32x32xf32> to vector<24x32x32xf32>
    %16 = vector.shape_cast %4 : vector<12x32xf32> to vector<1x12x1x32xf32>
    %17 = vector.shape_cast %16 : vector<1x12x1x32xf32> to vector<1x12x1x32xf32>
    %18 = vector.broadcast %17 : vector<1x12x1x32xf32> to vector<2x12x1x32xf32>
    %19 = vector.shape_cast %18 : vector<2x12x1x32xf32> to vector<24x1x32xf32>
    "tpu.trace_start"() <{level = 10 : i32, message = "nsd,ndo->nso"}> : () -> ()
    %cst = arith.constant dense<0.000000e+00> : vector<24x8x32xf32>
    %20 = tpu.matmul %11, %15, %cst {dimension_numbers = #tpu.dot_dimension_numbers<[2], [1], [1], [2], [0, 0, 0, 1, 1, 2], [0], [0]>, precision = #tpu.contract_precision<fp32>} : vector<24x8x32xf32>, vector<24x32x32xf32>, vector<24x8x32xf32> -> vector<24x8x32xf32>
    "tpu.trace_stop"() : () -> ()
    %21 = vector.broadcast %19 : vector<24x1x32xf32> to vector<24x8x32xf32>
    %22 = arith.addf %20, %21 : vector<24x8x32xf32>
    %23 = vector.shape_cast %22 : vector<24x8x32xf32> to vector<2x3x4x8x32xf32>
    %24 = vector.extract_strided_slice %23 {offsets = [0, 0, 0, 0, 0], sizes = [2, 1, 4, 8, 32], strides = [1, 1, 1, 1, 1]} : vector<2x3x4x8x32xf32> to vector<2x1x4x8x32xf32>
    %25 = vector.shape_cast %24 : vector<2x1x4x8x32xf32> to vector<2x4x8x32xf32>
    %26 = vector.shape_cast %25 : vector<2x4x8x32xf32> to vector<8x8x32xf32>
    %27 = vector.extract_strided_slice %23 {offsets = [0, 1, 0, 0, 0], sizes = [2, 1, 4, 8, 32], strides = [1, 1, 1, 1, 1]} : vector<2x3x4x8x32xf32> to vector<2x1x4x8x32xf32>
    %28 = vector.shape_cast %27 : vector<2x1x4x8x32xf32> to vector<2x4x8x32xf32>
    %29 = vector.shape_cast %28 : vector<2x4x8x32xf32> to vector<8x8x32xf32>
    %30 = vector.extract_strided_slice %23 {offsets = [0, 2, 0, 0, 0], sizes = [2, 1, 4, 8, 32], strides = [1, 1, 1, 1, 1]} : vector<2x3x4x8x32xf32> to vector<2x1x4x8x32xf32>
    %31 = vector.shape_cast %30 : vector<2x1x4x8x32xf32> to vector<2x4x8x32xf32>
    %32 = vector.shape_cast %31 : vector<2x4x8x32xf32> to vector<8x8x32xf32>
    %33 = vector.shape_cast %1 : vector<2x8x8xf32> to vector<2x1x8x8xf32>
    %34 = vector.shape_cast %33 : vector<2x1x8x8xf32> to vector<2x1x8x8xf32>
    %35 = vector.broadcast %34 : vector<2x1x8x8xf32> to vector<2x4x8x8xf32>
    %36 = vector.shape_cast %35 : vector<2x4x8x8xf32> to vector<8x8x8xf32>
    "tpu.trace_start"() <{level = 10 : i32, message = "nqd,nkd->nqk"}> : () -> ()
    %cst_16 = arith.constant dense<0.000000e+00> : vector<8x8x8xf32>
    %37 = tpu.matmul %26, %29, %cst_16 {dimension_numbers = #tpu.dot_dimension_numbers<[2], [2], [1], [1], [0, 0, 0, 1, 1, 1], [0], [0]>, precision = #tpu.contract_precision<fp32>} : vector<8x8x32xf32>, vector<8x8x32xf32>, vector<8x8x8xf32> -> vector<8x8x8xf32>
    "tpu.trace_stop"() : () -> ()
    %cst_17 = arith.constant 0.353553385 : f32
    %38 = vector.broadcast %cst_17 : f32 to vector<8x8x8xf32>
    %39 = arith.mulf %37, %38 : vector<8x8x8xf32>
    %cst_18 = arith.constant 5.000000e-01 : f32
    %40 = vector.broadcast %cst_18 : f32 to vector<8x8x8xf32>
    %41 = arith.cmpf oge, %36, %40 : vector<8x8x8xf32>
    %cst_19 = arith.constant -1.000000e+09 : f32
    %42 = vector.broadcast %cst_19 : f32 to vector<8x8x8xf32>
    %43 = arith.select %41, %42, %39 : vector<8x8x8xi1>, vector<8x8x8xf32>
    %cst_20 = arith.constant dense<0xFF800000> : vector<8x8xf32>
    %44 = vector.multi_reduction <maximumf>, %43, %cst_20 [2] : vector<8x8x8xf32> to vector<8x8xf32>
    %45 = vector.shape_cast %44 : vector<8x8xf32> to vector<8x8x1xf32>
    %46 = vector.broadcast %45 : vector<8x8x1xf32> to vector<8x8x8xf32>
    %47 = arith.subf %43, %46 : vector<8x8x8xf32>
    %48 = math.exp %47 : vector<8x8x8xf32>
    %cst_21 = arith.constant dense<0.000000e+00> : vector<8x8xf32>
    %49 = vector.multi_reduction <add>, %48, %cst_21 [2] : vector<8x8x8xf32> to vector<8x8xf32>
    %50 = vector.shape_cast %49 : vector<8x8xf32> to vector<8x8x1xf32>
    %51 = tpu.reciprocal %50 : vector<8x8x1xf32> -> vector<8x8x1xf32>
    %52 = vector.broadcast %51 : vector<8x8x1xf32> to vector<8x8x8xf32>
    %53 = arith.mulf %48, %52 : vector<8x8x8xf32>
    "tpu.trace_start"() <{level = 10 : i32, message = "nqk,nkd->nqd"}> : () -> ()
    %cst_22 = arith.constant dense<0.000000e+00> : vector<8x8x32xf32>
    %54 = tpu.matmul %53, %32, %cst_22 {dimension_numbers = #tpu.dot_dimension_numbers<[2], [1], [1], [2], [0, 0, 0, 1, 1, 2], [0], [0]>, precision = #tpu.contract_precision<fp32>} : vector<8x8x8xf32>, vector<8x8x32xf32>, vector<8x8x32xf32> -> vector<8x8x32xf32>
    "tpu.trace_stop"() : () -> ()
    %55 = vector.shape_cast %3 : vector<4x32x32xf32> to vector<1x4x32x32xf32>
    %56 = vector.shape_cast %55 : vector<1x4x32x32xf32> to vector<1x4x32x32xf32>
    %57 = vector.broadcast %56 : vector<1x4x32x32xf32> to vector<2x4x32x32xf32>
    %58 = vector.shape_cast %57 : vector<2x4x32x32xf32> to vector<8x32x32xf32>
    "tpu.trace_start"() <{level = 10 : i32, message = "nsd,ndo->nso"}> : () -> ()
    %cst_23 = arith.constant dense<0.000000e+00> : vector<8x8x32xf32>
    %59 = tpu.matmul %54, %58, %cst_23 {dimension_numbers = #tpu.dot_dimension_numbers<[2], [1], [1], [2], [0, 0, 0, 1, 1, 2], [0], [0]>, precision = #tpu.contract_precision<fp32>} : vector<8x8x32xf32>, vector<8x32x32xf32>, vector<8x8x32xf32> -> vector<8x8x32xf32>
    "tpu.trace_stop"() : () -> ()
    %60 = vector.shape_cast %59 : vector<8x8x32xf32> to vector<2x4x8x32xf32>
    %61 = vector.extract_strided_slice %60 {offsets = [0, 0, 0, 0], sizes = [2, 1, 8, 32], strides = [1, 1, 1, 1]} : vector<2x4x8x32xf32> to vector<2x1x8x32xf32>
    %62 = vector.shape_cast %61 : vector<2x1x8x32xf32> to vector<2x8x32xf32>
    %63 = vector.extract_strided_slice %60 {offsets = [0, 1, 0, 0], sizes = [2, 1, 8, 32], strides = [1, 1, 1, 1]} : vector<2x4x8x32xf32> to vector<2x1x8x32xf32>
    %64 = vector.shape_cast %63 : vector<2x1x8x32xf32> to vector<2x8x32xf32>
    %65 = arith.addf %62, %64 : vector<2x8x32xf32>
    %66 = vector.extract_strided_slice %60 {offsets = [0, 2, 0, 0], sizes = [2, 1, 8, 32], strides = [1, 1, 1, 1]} : vector<2x4x8x32xf32> to vector<2x1x8x32xf32>
    %67 = vector.shape_cast %66 : vector<2x1x8x32xf32> to vector<2x8x32xf32>
    %68 = arith.addf %65, %67 : vector<2x8x32xf32>
    %69 = vector.extract_strided_slice %60 {offsets = [0, 3, 0, 0], sizes = [2, 1, 8, 32], strides = [1, 1, 1, 1]} : vector<2x4x8x32xf32> to vector<2x1x8x32xf32>
    %70 = vector.shape_cast %69 : vector<2x1x8x32xf32> to vector<2x8x32xf32>
    %71 = arith.addf %68, %70 : vector<2x8x32xf32>
    %72 = vector.shape_cast %71 : vector<2x8x32xf32> to vector<16x32xf32>
    %73 = vector.broadcast %5 : vector<1x32xf32> to vector<16x32xf32>
    %74 = arith.addf %72, %73 : vector<16x32xf32>
    %cst_24 = arith.constant dense<0.000000e+00> : vector<16xf32>
    %75 = vector.multi_reduction <add>, %74, %cst_24 [1] : vector<16x32xf32> to vector<16xf32>
    %76 = vector.shape_cast %75 : vector<16xf32> to vector<16x1xf32>
    %cst_25 = arith.constant 3.200000e+01 : f32
    %77 = vector.broadcast %cst_25 : f32 to vector<16x1xf32>
    %78 = arith.divf %76, %77 : vector<16x1xf32>
    %79 = vector.broadcast %78 : vector<16x1xf32> to vector<16x32xf32>
    %80 = arith.subf %74, %79 : vector<16x32xf32>
    %81 = arith.mulf %80, %80 : vector<16x32xf32>
    %cst_26 = arith.constant dense<0.000000e+00> : vector<16xf32>
    %82 = vector.multi_reduction <add>, %81, %cst_26 [1] : vector<16x32xf32> to vector<16xf32>
    %83 = vector.shape_cast %82 : vector<16xf32> to vector<16x1xf32>
    %cst_27 = arith.constant 3.200000e+01 : f32
    %84 = vector.broadcast %cst_27 : f32 to vector<16x1xf32>
    %85 = arith.divf %83, %84 : vector<16x1xf32>
    %86 = vector.broadcast %78 : vector<16x1xf32> to vector<16x32xf32>
    %87 = arith.subf %74, %86 : vector<16x32xf32>
    %cst_28 = arith.constant 9.99999974E-6 : f32
    %88 = vector.broadcast %cst_28 : f32 to vector<16x1xf32>
    %89 = arith.addf %85, %88 : vector<16x1xf32>
    %90 = math.rsqrt %89 : vector<16x1xf32>
    %91 = vector.broadcast %90 : vector<16x1xf32> to vector<16x32xf32>
    %92 = arith.mulf %87, %91 : vector<16x32xf32>
    %93 = vector.broadcast %6 : vector<1x32xf32> to vector<16x32xf32>
    %94 = arith.mulf %92, %93 : vector<16x32xf32>
    %95 = vector.broadcast %7 : vector<1x32xf32> to vector<16x32xf32>
    %96 = arith.addf %94, %95 : vector<16x32xf32>
    %c0_29 = arith.constant 0 : index
    %c0_30 = arith.constant 0 : index
    %97 = vector.load %arg4[%c0_29, %c0_30] : memref<16x32xf32, #tpu.memory_space<vmem>>, vector<16x32xf32>
    tpu.vector_store %arg4[%c0_29, %c0_30], %96 {strides = array<i32>} : memref<16x32xf32, #tpu.memory_space<vmem>>, vector<16x32xf32>,
    return
  }
}

</mosaic_0001>

<bundles_post_ra>
// kernel: mha_pallas.1
= control target key start
LH: loop header
LB: loop body
LE: loop exit
PB: predicated region body
PF: predicated region fallthrough
CT: control target
= control target key end

     0   :  { %9 = vsyncpa [#allocation3], 0  ;;  %s31981_s0 = inlined_call_operand.hbm [shape: f32[2,8,32], index: 0, kind: input, shape index: {}]   ;;  %s31982_s1 = inlined_call_operand.hbm [shape: f32[2,8,8], index: 1, kind: input, shape index: {}]   ;;  %s31983_s2 = inlined_call_operand.hbm [shape: f32[16,32,32], index: 2, kind: input, shape index: {}]   ;;  %s31984_s3 = inlined_call_operand.hbm [shape: f32[16,32], index: 3, kind: input, shape index: {}]   ;;  %s31985_s4 = inlined_call_operand.hbm [shape: f32[16,32], index: 4, kind: output, shape index: {}]  }
   0x1   :  { %10 = vsyncpa [#allocation6], 0 }
   0x2   :  { %11 = vsyncpa [#allocation9], 0 }
   0x3   :  { %12 = vsyncpa [#allocation4], 0  ;;  %s28710_s15 = smov [#allocation5]   ;;  %s28711_s17 = smov [#allocation2]  }
   0x4   :  { %s30_s16 = sshll.u32 %s28710_s15, 4  ;;  %s18_s18 = sshll.u32 %s28711_s17, 4  ;;  %s31_s16 = int_to_ptr.vmem [resolvable:$true] %s30_s16  ;;  %s28746_s18 = int_to_ptr.vmem [resolvable:$true] %s18_s18 }
   0x5   :  { %s28592_s21 = scalar_lea.hbm %s31982_s1, 256 }
   0x6   :  { %p28593_p0 = scmp.ne.s32.totalorder %s31982_s1, %s28592_s21  ;;  %p28596_p1 = scmp.lt.u32.totalorder %s28592_s21, %s31982_s1 }
   0x8   :  { %p28598_p2 = pnand %p28596_p1, %p28593_p0 }
   0xa   :  { %28601 = shalt.err (!%p28598_p2)
}
   0xb   :  { %s28602_s26 = scalar_lea.vmem %s31_s16, 256  ;;  %p28607_p4 = scmp.lt.s32.totalorder %s31_s16, %s31_s16 }
   0xc   :  { %p28603_p3 = scmp.ne.s32.totalorder %s31_s16, %s28602_s26  ;;  %p28608_p5 = scmp.lt.s32.totalorder %s28602_s26, %s28602_s26 }
   0xe   :  { %p28609_p6 = por %p28608_p5, %p28607_p4 }
  0x10   :  { %p28610_p7 = pnand %p28609_p6, %p28603_p3 }
  0x12   :  { %28613 = shalt.err (!%p28610_p7)
}
  0x13   :  { %s28712_s27 = smov 128   ;;  %s28713_s28 = smov 8  }
  0x14   :  { %36 = dma.hbm_to_vmem [thread:$0]  %s31982_s1, 256, %s31_s16, [#allocation6], %s28712_s27, %s28712_s27, %s28713_s28  }
  0x15   :  { %s28614_s7 = scalar_lea.hbm %s31981_s0, 256 }
  0x16   :  { %p28615_p8 = scmp.ne.s32.totalorder %s31981_s0, %s28614_s7  ;;  %p28618_p9 = scmp.lt.u32.totalorder %s28614_s7, %s31981_s0 }
  0x18   :  { %p28620_p10 = pnand %p28618_p9, %p28615_p8 }
  0x1a   :  { %28623 = shalt.err (!%p28620_p10)
}
  0x1b   :  { %s28624_s12 = scalar_lea.vmem %s28746_s18, 256  ;;  %p28629_p12 = scmp.lt.s32.totalorder %s28746_s18, %s28746_s18 }
  0x1c   :  { %p28625_p11 = scmp.ne.s32.totalorder %s28746_s18, %s28624_s12  ;;  %p28630_p13 = scmp.lt.s32.totalorder %s28624_s12, %s28624_s12 }
  0x1e   :  { %p28631_p0 = por %p28630_p13, %p28629_p12 }
  0x20   :  { %p28632_p1 = pnand %p28631_p0, %p28625_p11 }
  0x22   :  { %28635 = shalt.err (!%p28632_p1)
}
  0x23   :  { %24 = dma.hbm_to_vmem [thread:$0]  %s31981_s0, 256, %s28746_s18, [#allocation3], %s28712_s27, %s28712_s27, %s28713_s28  }
  0x24   :  { %s28714_s14 = smov [#allocation7]   ;;  %s28715_s16 = smov [#allocation8]  }
  0x25   :  { %s42_s15 = sshll.u32 %s28714_s14, 4  ;;  %s54_s17 = sshll.u32 %s28715_s16, 4  ;;  %s43_s15 = int_to_ptr.vmem [resolvable:$true] %s42_s15  ;;  %s28783_s17 = int_to_ptr.vmem [resolvable:$true] %s54_s17 }
  0x26   :  { %s28636_s21 = scalar_lea.hbm %s31983_s2, 8192 }
  0x27   :  { %p28637_p2 = scmp.ne.s32.totalorder %s31983_s2, %s28636_s21  ;;  %p28640_p3 = scmp.lt.u32.totalorder %s28636_s21, %s31983_s2 }
  0x29   :  { %p28642_p4 = pnand %p28640_p3, %p28637_p2 }
  0x2b   :  { %28645 = shalt.err (!%p28642_p4)
}
  0x2c   :  { %s28646_s0 = scalar_lea.vmem %s43_s15, 8192  ;;  %p28651_p6 = scmp.lt.s32.totalorder %s43_s15, %s43_s15 }
  0x2d   :  { %p28647_p5 = scmp.ne.s32.totalorder %s43_s15, %s28646_s0  ;;  %p28652_p7 = scmp.lt.s32.totalorder %s28646_s0, %s28646_s0 }
  0x2f   :  { %p28653_p8 = por %p28652_p7, %p28651_p6 }
  0x31   :  { %p28654_p9 = pnand %p28653_p8, %p28647_p5 }
  0x33   :  { %28657 = shalt.err (!%p28654_p9)
}
  0x34   :  { %48 = dma.hbm_to_vmem [thread:$0]  %s31983_s2, 8192, %s43_s15, [#allocation6], %s28712_s27, %s28712_s27, %s28713_s28  }
  0x35   :  { %s28658_s5 = scalar_lea.hbm %s31984_s3, 256 }
  0x36   :  { %p28659_p10 = scmp.ne.s32.totalorder %s31984_s3, %s28658_s5  ;;  %p28662_p11 = scmp.lt.u32.totalorder %s28658_s5, %s31984_s3 }
  0x38   :  { %p28664_p12 = pnand %p28662_p11, %p28659_p10 }
  0x3a   :  { %28667 = shalt.err (!%p28664_p12)
}
  0x3b   :  { %s28668_s10 = scalar_lea.vmem %s28783_s17, 256  ;;  %p28673_p0 = scmp.lt.s32.totalorder %s28783_s17, %s28783_s17 }
  0x3c   :  { %p28669_p13 = scmp.ne.s32.totalorder %s28783_s17, %s28668_s10  ;;  %p28674_p1 = scmp.lt.s32.totalorder %s28668_s10, %s28668_s10 }
  0x3e   :  { %p28675_p2 = por %p28674_p1, %p28673_p0 }
  0x40   :  { %p28676_p3 = pnand %p28675_p2, %p28669_p13 }
  0x42   :  { %28679 = shalt.err (!%p28676_p3)
}
  0x43   :  { %60 = dma.hbm_to_vmem [thread:$0]  %s31984_s3, 256, %s28783_s17, [#allocation9], %s28712_s27, %s28712_s27, %s28713_s28  }
  0x44   :  { %28702 = dma.done.wait [#allocation3], 256  }
  0x45   :  { %28703 = vsyncadd [#allocation3], 4294967040 }
  0x46   :  { %28704 = dma.done.wait [#allocation6], 8448  }
  0x47   :  { %28705 = vsyncadd [#allocation6], 4294958848 }
  0x48   :  { %28706 = dma.done.wait [#allocation9], 256  }
  0x49   :  { %28707 = vsyncadd [#allocation9], 4294967040  ;;  %v32012_v0 = vmov 0.0|0.0   ;;  %vm28717_vm0 = vmmov 0   ;;  %v31988_v1 = vmov 0.0   ;;  %v77_v2 = vld [vmem:[#allocation7] sm:$0xff] }
  0x4a   :  { %26968 = vmatprep.subr.bf16.mxu0 %v32012_v0  ;;  %27004 = vmatprep.subr.bf16.mxu1 %v32012_v0  ;;  %v78_v3 = vld [vmem:[#allocation7 + $0x8] sm:$0xff]  ;;  %v81_v4 = vld [vmem:[#allocation7 + $0x20] sm:$0xff]  ;;  %vm282_vm1 = vcmask 261120   ;;  %v287_v5 = vand.u32 4294901760, %v77_v2  ;;  %v79_v9 = vld [vmem:[#allocation7 + $0x10] sm:$0xff]  ;;  %vm15563_vm3 = vcmask 64512  }
  0x4b   :  { %24384 = vmatprep.mubr.msk.f32.mxu0 %vm28717_vm0, %v31988_v1  ;;  %24450 = vmatprep.mubr.msk.f32.mxu1 %vm28717_vm0, %v31988_v1  ;;  %v290_v6 = vand.u32 4294901760, %v78_v3  ;;  %v82_v7 = vld [vmem:[#allocation7 + $0x28] sm:$0xff]  ;;  %v772_v8 = vand.u32 4294901760, %v81_v4  ;;  %v80_v10 = vld [vmem:[#allocation7 + $0x18] sm:$0xff]  ;;  %v293_v12 = vand.u32 4294901760, %v79_v9  ;;  %v83_v14 = vld [vmem:[#allocation7 + $0x30] sm:$0xff] }
  0x4c   :  { %v775_v11 = vand.u32 4294901760, %v82_v7  ;;  %v296_v13 = vand.u32 4294901760, %v80_v10  ;;  %v84_v15 = vld [vmem:[#allocation7 + $0x38] sm:$0xff]  ;;  %v73_v16 = vld [vmem:[#allocation2] sm:$0xff]  ;;  %v778_v18 = vand.u32 4294901760, %v83_v14  ;;  %v28835_v24 = vsub.f32 %v77_v2, %v287_v5  ;;  %s28720_s3 = smov [#allocation10]  }
  0x4d   :  { %v28826_v17 = vpack.c.bf16 %v290_v6, %v287_v5  ;;  %v781_v19 = vand.u32 4294901760, %v84_v15  ;;  %v284_v20 = vsel %vm282_vm1, %v73_v16, 0  ;;  %v28840_v26 = vsub.f32 %v78_v3, %v290_v6  ;;  %v87_v16 = vld [vmem:[#allocation7 + $0x50] sm:$0xff]  ;;  %s23206_s12 = sshll.u32 %s28720_s3, 4  ;;  %s23207_s12 = int_to_ptr.vmem [resolvable:$true] %s23206_s12 }
  0x4e   :  { %v28829_v21 = vpack.c.bf16 %v775_v11, %v772_v8  ;;  %v28831_v22 = vpack.c.bf16 %v296_v13, %v293_v12  ;;  %v28833_v23 = vand.u32 4294901760, %v284_v20  ;;  %v28842_v27 = vsub.f32 %v81_v4, %v772_v8  ;;  %v85_v8 = vld [vmem:[#allocation7 + $0x40] sm:$0xff]  ;;  %s28680_s1 = scalar_lea.vmem %s23207_s12, 256  ;;  %p28685_p5 = scmp.lt.s32.totalorder %s23207_s12, %s23207_s12 }
  0x4f   :  { %26970 = vmatpush3.bf16.msra.mxu0 %v28826_v17  ;;  %v28838_v25 = vpack.c.bf16 %v781_v19, %v778_v18  ;;  %v28844_v28 = vsub.f32 %v82_v7, %v775_v11  ;;  %v368_v30 = vand.u32 4294901760, %v28835_v24  ;;  %v28852_v31 = vsub.f32 %v79_v9, %v293_v12  ;;  %v86_v9 = vld [vmem:[#allocation7 + $0x48] sm:$0xff]  ;;  %p28681_p4 = scmp.ne.s32.totalorder %s23207_s12, %s28680_s1  ;;  %p28686_p6 = scmp.lt.s32.totalorder %s28680_s1, %s28680_s1 }
  0x50   :  { %27006 = vmatpush3.bf16.msra.mxu1 %v28829_v21  ;;  %26971 = vmatprep.subr.bf16.mxu0 %v32012_v0  ;;  %v28849_v29 = vsub.f32 %v284_v20, %v28833_v23  ;;  %v28854_v32 = vsub.f32 %v80_v10, %v296_v13  ;;  %v375_v33 = vand.u32 4294901760, %v28840_v26  ;;  %v853_v34 = vand.u32 4294901760, %v28842_v27 }
  0x51   :  { %27007 = vmatprep.subr.bf16.mxu1 %v32012_v0  ;;  %v860_v35 = vand.u32 4294901760, %v28844_v28  ;;  %v28860_v36 = vsub.f32 %v83_v14, %v778_v18  ;;  %v369_v38 = vsub.f32 %v28835_v24, %v368_v30  ;;  %v382_v39 = vand.u32 4294901760, %v28852_v31  ;;  %v89_v14 = vld [vmem:[#allocation7 + $0x60] sm:$0xff]  ;;  %v88_v18 = vld [vmem:[#allocation7 + $0x58] sm:$0xff]  ;;  %p28687_p7 = por %p28686_p6, %p28685_p5 }
  0x52   :  { %v28863_v37 = vand.u32 4294901760, %v28849_v29  ;;  %v389_v40 = vand.u32 4294901760, %v28854_v32  ;;  %v376_v41 = vsub.f32 %v28840_v26, %v375_v33  ;;  %v854_v42 = vsub.f32 %v28842_v27, %v853_v34 }
  0x53   :  { %26973 = vmatpush3.bf16.msra.mxu0 %v28831_v22  ;;  %v861_v43 = vsub.f32 %v28844_v28, %v860_v35  ;;  %v867_v44 = vand.u32 4294901760, %v28860_v36  ;;  %v370_v46 = vand.u32 4294901760, %v369_v38  ;;  %v383_v47 = vsub.f32 %v28852_v31, %v382_v39  ;;  %p28688_p8 = pnand %p28687_p7, %p28681_p4 }
  0x54   :  { %27009 = vmatpush3.bf16.msra.mxu1 %v28838_v25  ;;  %v358_v45 = vsub.f32 %v28849_v29, %v28863_v37  ;;  %26974 = vmatprep.subr.bf16.mxu0 %v32012_v0  ;;  %v390_v48 = vsub.f32 %v28854_v32, %v389_v40  ;;  %v377_v49 = vand.u32 4294901760, %v376_v41  ;;  %v855_v50 = vand.u32 4294901760, %v854_v42 }
  0x55   :  { %27010 = vmatprep.subr.bf16.mxu1 %v32012_v0  ;;  %v862_v51 = vand.u32 4294901760, %v861_v43  ;;  %v868_v52 = vsub.f32 %v28860_v36, %v867_v44  ;;  %v384_v54 = vand.u32 4294901760, %v383_v47  ;;  %v28897_v56 = vsub.f32 %v84_v15, %v781_v19  ;;  %v90_v15 = vld [vmem:[#allocation7 + $0x68] sm:$0xff] }
  0x56   :  { %v28895_v53 = vand.u32 4294901760, %v358_v45  ;;  %v391_v55 = vand.u32 4294901760, %v390_v48  ;;  %v28899_v57 = vpack.c.bf16 %v377_v49, %v370_v46  ;;  %v28920_v2 = vpack.c.bf16 %v28840_v26, %v28835_v24 }
  0x57   :  { %v28901_v58 = vpack.c.bf16 %v862_v51, %v855_v50  ;;  %v874_v59 = vand.u32 4294901760, %v28897_v56  ;;  %v869_v61 = vand.u32 4294901760, %v868_v52  ;;  %v28929_v4 = vpack.c.bf16 %v28844_v28, %v28842_v27  ;;  %v91_v28 = vld [vmem:[#allocation7 + $0x70] sm:$0xff] }
  0x58   :  { %24385 = vmatmul.mubr.f32.vlgmr.msra.gmra.mrb[0].mxu0 %v28895_v53  ;;  %24451 = vmatmul.mubr.f32.vlgmr.msra.gmra.mrb[0].mxu1 %v28895_v53  ;;  %v28908_v60 = vpack.c.bf16 %v391_v55, %v384_v54  ;;  %v28935_v5 = vpack.c.bf16 %v28854_v32, %v28852_v31  ;;  %v28944_v6 = vpack.c.bf16 %v28897_v56, %v28860_v36  ;;  %v1257_v12 = vand.u32 4294901760, %v85_v8 }
  0x59   :  { %26976 = vmatpush3.bf16.msra.mxu0 %v28899_v57  ;;  %27012 = vmatpush3.bf16.msra.mxu1 %v28901_v58  ;;  %v875_v62 = vsub.f32 %v28897_v56, %v874_v59  ;;  %v28968_v7 = vpack.c.bf16 %v375_v33, %v368_v30  ;;  %v28977_v10 = vpack.c.bf16 %v860_v35, %v853_v34  ;;  %v1260_v13 = vand.u32 4294901760, %v86_v9  ;;  %v92_v30 = vld [vmem:[#allocation7 + $0x78] sm:$0xff] }
  0x5a   :  { %26977 = vmatprep.subr.bf16.mxu0 %v32012_v0  ;;  %27013 = vmatprep.subr.bf16.mxu1 %v32012_v0  ;;  %v28985_v11 = vpack.c.bf16 %v389_v40, %v382_v39  ;;  %v28994_v19 = vpack.c.bf16 %v874_v59, %v867_v44  ;;  %v1742_v20 = vand.u32 4294901760, %v89_v14  ;;  %v1745_v24 = vand.u32 4294901760, %v90_v15 }
  0x5b   :  { %24395 = vmatprep.mubr.msk.f32.mxu0 %vm28717_vm0, %v31988_v1  ;;  %24461 = vmatprep.mubr.msk.f32.mxu1 %vm28717_vm0, %v31988_v1  ;;  %v876_v63 = vand.u32 4294901760, %v875_v62  ;;  %v1263_v26 = vand.u32 4294901760, %v87_v16  ;;  %v1266_v27 = vand.u32 4294901760, %v88_v18  ;;  %v29000_v31 = vsub.f32 %v85_v8, %v1257_v12 }
  0x5c   :  { %v29002_v32 = vsub.f32 %v86_v9, %v1260_v13  ;;  %v1748_v33 = vand.u32 4294901760, %v91_v28  ;;  %v1751_v34 = vand.u32 4294901760, %v92_v30  ;;  %v29007_v35 = vsub.f32 %v89_v14, %v1742_v20 }
  0x5d   :  { %26979 = vmatpush3.bf16.msra.mxu0 %v28908_v60  ;;  %v28922_v3 = vpack.c.bf16 %v876_v63, %v869_v61  ;;  %v29009_v36 = vsub.f32 %v90_v15, %v1745_v24  ;;  %v1338_v38 = vand.u32 4294901760, %v29000_v31  ;;  %v29015_v40 = vsub.f32 %v87_v16, %v1263_v26 }
  0x5e   :  { %26980 = vmatprep.subr.bf16.mxu0 %v32012_v0  ;;  %v1345_v39 = vand.u32 4294901760, %v29002_v32  ;;  %v29017_v41 = vsub.f32 %v88_v18, %v1266_v27  ;;  %v29023_v42 = vpack.c.bf16 %v1260_v13, %v1257_v12  ;;  %v1823_v43 = vand.u32 4294901760, %v29007_v35 }
  0x5f   :  { %27015 = vmatpush3.bf16.msra.mxu1 %v28922_v3  ;;  %v1830_v44 = vand.u32 4294901760, %v29009_v36  ;;  %v29030_v45 = vsub.f32 %v91_v28, %v1748_v33  ;;  %v29032_v46 = vsub.f32 %v92_v30, %v1751_v34  ;;  %v1339_v47 = vsub.f32 %v29000_v31, %v1338_v38 }
  0x60   :  { %24396 = vmatmul.mubr.f32.vlgmr.msra.gmra.mrb[0].mxu0 %v28833_v23  ;;  %27016 = vmatprep.subr.bf16.mxu1 %v32012_v0  ;;  %v1346_v48 = vsub.f32 %v29002_v32, %v1345_v39  ;;  %v1352_v49 = vand.u32 4294901760, %v29015_v40  ;;  %v1359_v50 = vand.u32 4294901760, %v29017_v41  ;;  %v29045_v51 = vpack.c.bf16 %v1745_v24, %v1742_v20 }
  0x61   :  { %26982 = vmatpush3.bf16.msra.mxu0 %v28920_v2  ;;  %24406 = vmatprep.mubr.msk.f32.mxu0 %vm28717_vm0, %v31988_v1  ;;  %v29047_v52 = vpack.c.bf16 %v1266_v27, %v1263_v26  ;;  %v1824_v54 = vsub.f32 %v29007_v35, %v1823_v43  ;;  %v1831_v55 = vsub.f32 %v29009_v36, %v1830_v44  ;;  %v1837_v56 = vand.u32 4294901760, %v29030_v45 }
  0x62   :  { %26983 = vmatprep.subr.bf16.mxu0 %v32012_v0  ;;  %24462 = vmatmul.mubr.f32.vlgmr.msra.gmra.mrb[0].mxu1 %v28833_v23  ;;  %v1844_v59 = vand.u32 4294901760, %v29032_v46  ;;  %v1340_v61 = vand.u32 4294901760, %v1339_v47  ;;  %v1347_v62 = vand.u32 4294901760, %v1346_v48  ;;  %v1353_v63 = vsub.f32 %v29015_v40, %v1352_v49 }
  0x63   :  { %27018 = vmatpush3.bf16.msra.mxu1 %v28929_v4  ;;  %24472 = vmatprep.mubr.msk.f32.mxu1 %vm28717_vm0, %v31988_v1  ;;  %v1360_v8 = vsub.f32 %v29017_v41, %v1359_v50  ;;  %v29071_v9 = vpack.c.bf16 %v1751_v34, %v1748_v33  ;;  %v1825_v12 = vand.u32 4294901760, %v1824_v54  ;;  %v1832_v13 = vand.u32 4294901760, %v1831_v55  ;;  %v93_v55 = vld [vmem:[#allocation7 + $0x80] sm:$0xff] }
  0x64   :  { %27019 = vmatprep.subr.bf16.mxu1 %v32012_v0  ;;  %v1838_v14 = vsub.f32 %v29030_v45, %v1837_v56  ;;  %v1845_v15 = vsub.f32 %v29032_v46, %v1844_v59  ;;  %v29084_v16 = vpack.c.bf16 %v1347_v62, %v1340_v61  ;;  %v1354_v18 = vand.u32 4294901760, %v1353_v63  ;;  %v94_v61 = vld [vmem:[#allocation7 + $0x88] sm:$0xff] }
  0x65   :  { %26985 = vmatpush3.bf16.msra.mxu0 %v28935_v5  ;;  %v1361_v20 = vand.u32 4294901760, %v1360_v8  ;;  %v29089_v24 = vpack.c.bf16 %v1832_v13, %v1825_v12  ;;  %v29108_v33 = vpack.c.bf16 %v29002_v32, %v29000_v31  ;;  %v29115_v34 = vpack.c.bf16 %v29009_v36, %v29007_v35  ;;  %v98_v63 = vld [vmem:[#allocation7 + $0xa8] sm:$0xff]  ;;  %v95_v35 = vld [vmem:[#allocation7 + $0x90] sm:$0xff]  ;;  %v96_v36 = vld [vmem:[#allocation7 + $0x98] sm:$0xff] }
  0x66   :  { %26986 = vmatprep.subr.bf16.mxu0 %v32012_v0  ;;  %v1839_v26 = vand.u32 4294901760, %v1838_v14  ;;  %v1846_v27 = vand.u32 4294901760, %v1845_v15  ;;  %v29121_v47 = vpack.c.bf16 %v29017_v41, %v29015_v40  ;;  %v29130_v48 = vpack.c.bf16 %v29032_v46, %v29030_v45  ;;  %v100_v8 = vld [vmem:[#allocation7 + $0xb8] sm:$0xff] }
  0x67   :  { %27021 = vmatpush3.bf16.msra.mxu1 %v28944_v6  ;;  %v29093_v28 = vpack.c.bf16 %v1361_v20, %v1354_v18  ;;  %v29154_v54 = vpack.c.bf16 %v1345_v39, %v1338_v38  ;;  %v29163_v62 = vpack.c.bf16 %v1830_v44, %v1823_v43  ;;  %v29171_v31 = vpack.c.bf16 %v1359_v50, %v1352_v49  ;;  %v97_v39 = vld [vmem:[#allocation7 + $0xa0] sm:$0xff]  ;;  %v99_v50 = vld [vmem:[#allocation7 + $0xb0] sm:$0xff] }
  0x68   :  { %24407 = vmatmul.mubr.f32.vlgmr.msra.gmra.mrb[0].mxu0 %v28849_v29  ;;  %27022 = vmatprep.subr.bf16.mxu1 %v32012_v0  ;;  %v29100_v30 = vpack.c.bf16 %v1846_v27, %v1839_v26  ;;  %v2227_v32 = vand.u32 4294901760, %v93_v55  ;;  %v2230_v38 = vand.u32 4294901760, %v94_v61  ;;  %v29182_v40 = vpack.c.bf16 %v1844_v59, %v1837_v56 }
  0x69   :  { %26988 = vmatpush3.bf16.msra.mxu0 %v28826_v17  ;;  %24417 = vmatprep.mubr.msk.f32.mxu0 %vm28717_vm0, %v31988_v1  ;;  %v2712_v41 = vand.u32 4294901760, %v97_v39  ;;  %v2715_v43 = vand.u32 4294901760, %v98_v63  ;;  %v2233_v44 = vand.u32 4294901760, %v95_v35  ;;  %v2236_v49 = vand.u32 4294901760, %v96_v36 }
  0x6a   :  { %26989 = vmatprep.subr.bf16.mxu0 %v32012_v0  ;;  %24473 = vmatmul.mubr.f32.vlgmr.msra.gmra.mrb[0].mxu1 %v28849_v29  ;;  %32068 = vst [vmem:[#allocation15_spill] sm:$0xff] %v29182_v40  ;;  %v29188_v12 = vsub.f32 %v93_v55, %v2227_v32  ;;  %v29190_v45 = vsub.f32 %v94_v61, %v2230_v38  ;;  %v2718_v46 = vand.u32 4294901760, %v99_v50  ;;  %v2721_v56 = vand.u32 4294901760, %v100_v8 }
  0x6b   :  { %27024 = vmatpush3.bf16.msra.mxu1 %v28829_v21  ;;  %24483 = vmatprep.mubr.msk.f32.mxu1 %vm28717_vm0, %v31988_v1  ;;  %v29195_v59 = vsub.f32 %v97_v39, %v2712_v41  ;;  %v29197_v13 = vsub.f32 %v98_v63, %v2715_v43  ;;  %v29203_v18 = vsub.f32 %v95_v35, %v2233_v44 }
  0x6c   :  { %27025 = vmatprep.subr.bf16.mxu1 %v32012_v0  ;;  %v31987_v14 = vand.u32 4294901760, %v29188_v12  ;;  %v31986_v15 = vand.u32 4294901760, %v29190_v45  ;;  %v29205_v20 = vsub.f32 %v96_v36, %v2236_v49  ;;  %v29211_v26 = vpack.c.bf16 %v2230_v38, %v2227_v32 }
  0x6d   :  { %26991 = vmatpush3.bf16.msra.mxu0 %v28831_v22  ;;  %v31991_v27 = vand.u32 4294901760, %v29195_v59  ;;  %v31990_v55 = vand.u32 4294901760, %v29197_v13  ;;  %v29218_v61 = vsub.f32 %v99_v50, %v2718_v46  ;;  %v29220_v39 = vsub.f32 %v100_v8, %v2721_v56 }
  0x6e   :  { %26992 = vmatprep.subr.bf16.mxu0 %v32012_v0  ;;  %32069 = vst [vmem:[#allocation16_spill] sm:$0xff] %v29211_v26  ;;  %v2309_v32 = vsub.f32 %v29188_v12, %v31987_v14  ;;  %v2316_v38 = vsub.f32 %v29190_v45, %v31986_v15  ;;  %v31993_v63 = vand.u32 4294901760, %v29203_v18  ;;  %v31992_v35 = vand.u32 4294901760, %v29205_v20 }
  0x6f   :  { %27027 = vmatpush3.bf16.msra.mxu1 %v28838_v25  ;;  %v29233_v36 = vpack.c.bf16 %v2715_v43, %v2712_v41  ;;  %v29235_v50 = vpack.c.bf16 %v2236_v49, %v2233_v44  ;;  %v2794_v8 = vsub.f32 %v29195_v59, %v31991_v27  ;;  %v2801_v15 = vsub.f32 %v29197_v13, %v31990_v55 }
  0x70   :  { %24418 = vmatmul.mubr.f32.vlgmr.msra.gmra.mrb[0].mxu0 %v28863_v37  ;;  %27028 = vmatprep.subr.bf16.mxu1 %v32012_v0  ;;  %v31995_v14 = vand.u32 4294901760, %v29218_v61  ;;  %v2310_v41 = vand.u32 4294901760, %v2309_v32  ;;  %v2317_v43 = vand.u32 4294901760, %v2316_v38  ;;  %v2323_v44 = vsub.f32 %v29203_v18, %v31993_v63 }
  0x71   :  { %26994 = vmatpush3.bf16.msra.mxu0 %v28968_v7  ;;  %24428 = vmatprep.mubr.msk.f32.mxu0 %vm28717_vm0, %v31988_v1  ;;  %32070 = vst [vmem:[#allocation17_spill] sm:$0xff] %v29233_v36  ;;  %32071 = vst [vmem:[#allocation18_spill] sm:$0xff] %v29235_v50  ;;  %v2330_v49 = vsub.f32 %v29205_v20, %v31992_v35  ;;  %v32072_v55 = vmov 0.0   ;;  %v29259_v27 = vpack.c.bf16 %v2721_v56, %v2718_v46  ;;  %v2795_v32 = vand.u32 4294901760, %v2794_v8 }
  0x72   :  { %26995 = vmatprep.subr.bf16.mxu0 %v32012_v0  ;;  %24484 = vmatmul.mubr.f32.vlgmr.msra.gmra.mrb[0].mxu1 %v28863_v37  ;;  %v2802_v38 = vand.u32 4294901760, %v2801_v15  ;;  %v2808_v35 = vsub.f32 %v29218_v61, %v31995_v14  ;;  %v29272_v46 = vpack.c.bf16 %v2317_v43, %v2310_v41  ;;  %v2324_v56 = vand.u32 4294901760, %v2323_v44 }
  0x73   :  { %27030 = vmatpush3.bf16.msra.mxu1 %v28977_v10  ;;  %24494 = vmatprep.mubr.msk.f32.mxu1 %vm28717_vm0, %v31988_v1  ;;  %32073 = vst [vmem:[#allocation19_spill] sm:$0xff] %v29259_v27  ;;  %v32082_v43 = vand.u32 4294901760, %v29188_v12  ;;  %v32083_v44 = vand.u32 4294901760, %v29190_v45 }
  0x74   :  { %27031 = vmatprep.subr.bf16.mxu1 %v32012_v0  ;;  %32074 = vst [vmem:[#allocation20_spill] sm:$0xff] %v29272_v46  ;;  %v29277_v15 = vpack.c.bf16 %v2802_v38, %v2795_v32  ;;  %v2809_v8 = vand.u32 4294901760, %v2808_v35  ;;  %v29318_v35 = vpack.c.bf16 %v29220_v39, %v29218_v61  ;;  %v101_v32 = vld [vmem:[#allocation7 + $0xc0] sm:$0xff]  ;;  %v102_v38 = vld [vmem:[#allocation7 + $0xc8] sm:$0xff] }
  0x75   :  { %26997 = vmatpush3.bf16.msra.mxu0 %v28985_v11 }
  0x76   :  { %26998 = vmatprep.subr.bf16.mxu0 %v32012_v0  ;;  %32075 = vst [vmem:[#allocation21_spill] sm:$0xff] %v29277_v15  ;;  %32081 = vst [vmem:[#allocation27_spill] sm:$0xff] %v29318_v35 }
  0x77   :  { %27033 = vmatpush3.bf16.msra.mxu1 %v28994_v19 }
  0x78   :  { %24429 = vmatmul.mubr.f32.vlgmr.msra.gmra.mrb[0].mxu0 %v28833_v23  ;;  %27034 = vmatprep.subr.bf16.mxu1 %v32012_v0 }
  0x79   :  { %27000 = vmatpush3.bf16.msra.mxu0 %v28826_v17  ;;  %24439 = vmatprep.mubr.msk.f32.mxu0 %vm28717_vm0, %v31988_v1 }
  0x7a   :  { %27001 = vmatprep.subr.bf16.mxu0 %v32012_v0  ;;  %24495 = vmatmul.mubr.f32.vlgmr.msra.gmra.mrb[0].mxu1 %v28833_v23 }
  0x7b   :  { %27036 = vmatpush3.bf16.msra.mxu1 %v28829_v21  ;;  %24505 = vmatprep.mubr.msk.f32.mxu1 %vm28717_vm0, %v31988_v1 }
  0x7c   :  { %27037 = vmatprep.subr.bf16.mxu1 %v32012_v0 }
  0x7d   :  { %27003 = vmatpush3.bf16.msra.mxu0 %v28831_v22 }
  0x7e   :  { %27040 = vmatprep.subr.bf16.mxu0 %v32012_v0 }
  0x7f   :  { %27039 = vmatpush3.bf16.msra.mxu1 %v28838_v25 }
  0x80   :  { %24440 = vmatmul.mubr.f32.vlgmr.msra.gmra.mrb[0].mxu0 %v28833_v23  ;;  %27076 = vmatprep.subr.bf16.mxu1 %v32012_v0 }
  0x81   :  { %27042 = vmatpush3.bf16.msra.mxu0 %v29023_v42  ;;  %24516 = vmatprep.mubr.msk.f32.mxu0 %vm28717_vm0, %v31988_v1 }
  0x82   :  { %27043 = vmatprep.subr.bf16.mxu0 %v32012_v0  ;;  %24506 = vmatmul.mubr.f32.vlgmr.msra.gmra.mrb[0].mxu1 %v28833_v23 }
  0x83   :  { %27078 = vmatpush3.bf16.msra.mxu1 %v29045_v51  ;;  %24582 = vmatprep.mubr.msk.f32.mxu1 %vm28717_vm0, %v31988_v1 }
  0x84   :  { %27079 = vmatprep.subr.bf16.mxu1 %v32012_v0 }
  0x85   :  { %27045 = vmatpush3.bf16.msra.mxu0 %v29047_v52 }
  0x86   :  { %27046 = vmatprep.subr.bf16.mxu0 %v32012_v0 }
  0x87   :  { %27081 = vmatpush3.bf16.msra.mxu1 %v29071_v9 }
  0x88   :  { %24517 = vmatmul.mubr.f32.vlgmr.msra.gmra.mrb[2].mxu0 %v28895_v53  ;;  %27082 = vmatprep.subr.bf16.mxu1 %v32012_v0 }
  0x89   :  { %27048 = vmatpush3.bf16.msra.mxu0 %v29084_v16  ;;  %24527 = vmatprep.mubr.msk.f32.mxu0 %vm28717_vm0, %v31988_v1 }
  0x8a   :  { %27049 = vmatprep.subr.bf16.mxu0 %v32012_v0  ;;  %24583 = vmatmul.mubr.f32.vlgmr.msra.gmra.mrb[2].mxu1 %v28895_v53 }
  0x8b   :  { %27084 = vmatpush3.bf16.msra.mxu1 %v29089_v24  ;;  %24593 = vmatprep.mubr.msk.f32.mxu1 %vm28717_vm0, %v31988_v1 }
  0x8c   :  { %27085 = vmatprep.subr.bf16.mxu1 %v32012_v0 }
  0x8d   :  { %27051 = vmatpush3.bf16.msra.mxu0 %v29093_v28 }
  0x8e   :  { %27052 = vmatprep.subr.bf16.mxu0 %v32012_v0 }
  0x8f   :  { %27087 = vmatpush3.bf16.msra.mxu1 %v29100_v30 }
  0x90   :  { %24528 = vmatmul.mubr.f32.vlgmr.msra.gmra.mrb[2].mxu0 %v28833_v23  ;;  %27088 = vmatprep.subr.bf16.mxu1 %v32012_v0 }
  0x91   :  { %27054 = vmatpush3.bf16.msra.mxu0 %v29108_v33  ;;  %24538 = vmatprep.mubr.msk.f32.mxu0 %vm28717_vm0, %v31988_v1 }
  0x92   :  { %27055 = vmatprep.subr.bf16.mxu0 %v32012_v0  ;;  %24594 = vmatmul.mubr.f32.vlgmr.msra.gmra.mrb[2].mxu1 %v28833_v23 }
  0x93   :  { %27090 = vmatpush3.bf16.msra.mxu1 %v29115_v34  ;;  %24604 = vmatprep.mubr.msk.f32.mxu1 %vm28717_vm0, %v31988_v1 }
  0x94   :  { %27091 = vmatprep.subr.bf16.mxu1 %v32012_v0 }
  0x95   :  { %27057 = vmatpush3.bf16.msra.mxu0 %v29121_v47 }
  0x96   :  { %27058 = vmatprep.subr.bf16.mxu0 %v32012_v0 }
  0x97   :  { %27093 = vmatpush3.bf16.msra.mxu1 %v29130_v48 }
  0x98   :  { %24539 = vmatmul.mubr.f32.vlgmr.msra.gmra.mrb[2].mxu0 %v28849_v29  ;;  %27094 = vmatprep.subr.bf16.mxu1 %v32012_v0 }
  0x99   :  { %27060 = vmatpush3.bf16.msra.mxu0 %v29023_v42  ;;  %24549 = vmatprep.mubr.msk.f32.mxu0 %vm28717_vm0, %v31988_v1 }
  0x9a   :  { %27061 = vmatprep.subr.bf16.mxu0 %v32012_v0  ;;  %24605 = vmatmul.mubr.f32.vlgmr.msra.gmra.mrb[2].mxu1 %v28849_v29 }
  0x9b   :  { %27096 = vmatpush3.bf16.msra.mxu1 %v29045_v51  ;;  %24615 = vmatprep.mubr.msk.f32.mxu1 %vm28717_vm0, %v31988_v1 }
  0x9c   :  { %27097 = vmatprep.subr.bf16.mxu1 %v32012_v0 }
  0x9d   :  { %27063 = vmatpush3.bf16.msra.mxu0 %v29047_v52 }
  0x9e   :  { %27064 = vmatprep.subr.bf16.mxu0 %v32012_v0 }
  0x9f   :  { %27099 = vmatpush3.bf16.msra.mxu1 %v29071_v9 }
  0xa0   :  { %24550 = vmatmul.mubr.f32.vlgmr.msra.gmra.mrb[2].mxu0 %v28863_v37  ;;  %27100 = vmatprep.subr.bf16.mxu1 %v32012_v0 }
  0xa1   :  { %27066 = vmatpush3.bf16.msra.mxu0 %v29154_v54  ;;  %24560 = vmatprep.mubr.msk.f32.mxu0 %vm28717_vm0, %v31988_v1 }
  0xa2   :  { %27067 = vmatprep.subr.bf16.mxu0 %v32012_v0  ;;  %24616 = vmatmul.mubr.f32.vlgmr.msra.gmra.mrb[2].mxu1 %v28863_v37 }
  0xa3   :  { %27102 = vmatpush3.bf16.msra.mxu1 %v29163_v62  ;;  %24626 = vmatprep.mubr.msk.f32.mxu1 %vm28717_vm0, %v31988_v1 }
  0xa4   :  { %27103 = vmatprep.subr.bf16.mxu1 %v32012_v0 }
  0xa5   :  { %27069 = vmatpush3.bf16.msra.mxu0 %v29171_v31 }
  0xa6   :  { %27070 = vmatprep.subr.bf16.mxu0 %v32012_v0 }
  0xa7   :  { %27105 = vmatpush3.bf16.msra.mxu1 %v29182_v40  ;;  %v2331_v40 = vand.u32 4294901760, %v2330_v49  ;;  %v29342_v49 = vpack.c.bf16 %v32083_v44, %v32082_v43  ;;  %v3197_v44 = vand.u32 4294901760, %v101_v32 }
  0xa8   :  { %24561 = vmatmul.mubr.f32.vlgmr.msra.gmra.mrb[2].mxu0 %v28833_v23  ;;  %27106 = vmatprep.subr.bf16.mxu1 %v32012_v0 }
  0xa9   :  { %27072 = vmatpush3.bf16.msra.mxu0 %v29023_v42  ;;  %24571 = vmatprep.mubr.msk.f32.mxu0 %vm28717_vm0, %v31988_v1  ;;  %32084 = vst [vmem:[#allocation28_spill] sm:$0xff] %v29342_v49 }
  0xaa   :  { %27073 = vmatprep.subr.bf16.mxu0 %v32012_v0  ;;  %24627 = vmatmul.mubr.f32.vlgmr.msra.gmra.mrb[2].mxu1 %v28833_v23 }
  0xab   :  { %27108 = vmatpush3.bf16.msra.mxu1 %v29045_v51  ;;  %24637 = vmatprep.mubr.msk.f32.mxu1 %vm28717_vm0, %v31988_v1  ;;  %v31996_v1 = vand.u32 4294901760, %v29220_v39 }
  0xac   :  { %27109 = vmatprep.subr.bf16.mxu1 %v32012_v0 }
  0xad   :  { %27075 = vmatpush3.bf16.msra.mxu0 %v29047_v52  ;;  %v2815_v63 = vsub.f32 %v29220_v39, %v31996_v1  ;;  %v29281_v1 = vpack.c.bf16 %v2331_v40, %v2324_v56  ;;  %v29296_v40 = vpack.c.bf16 %v29190_v45, %v29188_v12  ;;  %v32085_v56 = vand.u32 4294901760, %v29195_v59 }
  0xae   :  { %27112 = vmatprep.subr.bf16.mxu0 %v32012_v0  ;;  %v32088_v12 = vand.u32 4294901760, %v29203_v18  ;;  %v32089_v45 = vand.u32 4294901760, %v29205_v20 }
  0xaf   :  { %27111 = vmatpush3.bf16.msra.mxu1 %v29071_v9  ;;  %v2816_v14 = vand.u32 4294901760, %v2815_v63  ;;  %32076 = vst [vmem:[#allocation22_spill] sm:$0xff] %v29281_v1  ;;  %32078 = vst [vmem:[#allocation24_spill] sm:$0xff] %v29296_v40  ;;  %v29309_v63 = vpack.c.bf16 %v29205_v20, %v29203_v18  ;;  %v32091_v18 = vand.u32 4294901760, %v29218_v61  ;;  %v32092_v20 = vand.u32 4294901760, %v29220_v39 }
  0xb0   :  { %24572 = vmatmul.mubr.f32.vlgmr.msra.gmra.mrb[2].mxu0 %v28833_v23  ;;  %27148 = vmatprep.subr.bf16.mxu1 %v32012_v0  ;;  %v29359_v43 = vpack.c.bf16 %v32089_v45, %v32088_v12 }
  0xb1   :  { %27114 = vmatpush3.bf16.msra.mxu0 %v29211_v26  ;;  %24648 = vmatprep.mubr.msk.f32.mxu0 %vm28717_vm0, %v32072_v55  ;;  %v29288_v41 = vpack.c.bf16 %v2816_v14, %v2809_v8  ;;  %v29303_v14 = vpack.c.bf16 %v29197_v13, %v29195_v59  ;;  %32080 = vst [vmem:[#allocation26_spill] sm:$0xff] %v29309_v63  ;;  %v32086_v8 = vand.u32 4294901760, %v29197_v13  ;;  %v103_v59 = vld [vmem:[#allocation7 + $0xd0] sm:$0xff]  ;;  %v104_v13 = vld [vmem:[#allocation7 + $0xd8] sm:$0xff] }
  0xb2   :  { %27115 = vmatprep.subr.bf16.mxu0 %v32012_v0  ;;  %24638 = vmatmul.mubr.f32.vlgmr.msra.gmra.mrb[2].mxu1 %v28833_v23  ;;  %32090 = vst [vmem:[#allocation30_spill] sm:$0xff] %v29359_v43  ;;  %v3203_v45 = vand.u32 4294901760, %v103_v59 }
  0xb3   :  { %27150 = vmatpush3.bf16.msra.mxu1 %v29233_v36  ;;  %24714 = vmatprep.mubr.msk.f32.mxu1 %vm28717_vm0, %v32072_v55  ;;  %32077 = vst [vmem:[#allocation23_spill] sm:$0xff] %v29288_v41  ;;  %32079 = vst [vmem:[#allocation25_spill] sm:$0xff] %v29303_v14 }
  0xb4   :  { %27151 = vmatprep.subr.bf16.mxu1 %v32012_v0 }
  0xb5   :  { %27117 = vmatpush3.bf16.msra.mxu0 %v29235_v50 }
  0xb6   :  { %27118 = vmatprep.subr.bf16.mxu0 %v32012_v0 }
  0xb7   :  { %27153 = vmatpush3.bf16.msra.mxu1 %v29259_v27 }
  0xb8   :  { %24649 = vmatmul.mubr.f32.vlgmr.msra.gmra.mrb[4].mxu0 %v28895_v53  ;;  %27154 = vmatprep.subr.bf16.mxu1 %v32012_v0 }
  0xb9   :  { %27120 = vmatpush3.bf16.msra.mxu0 %v29272_v46  ;;  %24659 = vmatprep.mubr.msk.f32.mxu0 %vm28717_vm0, %v32072_v55 }
  0xba   :  { %27121 = vmatprep.subr.bf16.mxu0 %v32012_v0  ;;  %24715 = vmatmul.mubr.f32.vlgmr.msra.gmra.mrb[4].mxu1 %v28895_v53 }
  0xbb   :  { %27156 = vmatpush3.bf16.msra.mxu1 %v29277_v15  ;;  %24725 = vmatprep.mubr.msk.f32.mxu1 %vm28717_vm0, %v32072_v55 }
  0xbc   :  { %27157 = vmatprep.subr.bf16.mxu1 %v32012_v0 }
  0xbd   :  { %27123 = vmatpush3.bf16.msra.mxu0 %v29281_v1  ;;  %v108_v1 = vld [vmem:[#allocation7 + $0xf8] sm:$0xff] }
  0xbe   :  { %27124 = vmatprep.subr.bf16.mxu0 %v32012_v0 }
  0xbf   :  { %27159 = vmatpush3.bf16.msra.mxu1 %v29288_v41  ;;  %v107_v41 = vld [vmem:[#allocation7 + $0xf0] sm:$0xff] }
  0xc0   :  { %24660 = vmatmul.mubr.f32.vlgmr.msra.gmra.mrb[4].mxu0 %v28833_v23  ;;  %27160 = vmatprep.subr.bf16.mxu1 %v32012_v0  ;;  %v3688_v39 = vand.u32 4294901760, %v107_v41 }
  0xc1   :  { %27126 = vmatpush3.bf16.msra.mxu0 %v29296_v40  ;;  %24670 = vmatprep.mubr.msk.f32.mxu0 %vm28717_vm0, %v32072_v55  ;;  %v106_v40 = vld [vmem:[#allocation7 + $0xe8] sm:$0xff] }
  0xc2   :  { %27127 = vmatprep.subr.bf16.mxu0 %v32012_v0  ;;  %24726 = vmatmul.mubr.f32.vlgmr.msra.gmra.mrb[4].mxu1 %v28833_v23  ;;  %v3685_v12 = vand.u32 4294901760, %v106_v40 }
  0xc3   :  { %27162 = vmatpush3.bf16.msra.mxu1 %v29303_v14  ;;  %24736 = vmatprep.mubr.msk.f32.mxu1 %vm28717_vm0, %v32072_v55  ;;  %v105_v14 = vld [vmem:[#allocation7 + $0xe0] sm:$0xff] }
  0xc4   :  { %27163 = vmatprep.subr.bf16.mxu1 %v32012_v0  ;;  %v29385_v15 = vsub.f32 %v106_v40, %v3685_v12 }
  0xc5   :  { %27129 = vmatpush3.bf16.msra.mxu0 %v29309_v63  ;;  %v3200_v63 = vand.u32 4294901760, %v102_v38 }
  0xc6   :  { %27130 = vmatprep.subr.bf16.mxu0 %v32012_v0 }
  0xc7   :  { %27165 = vmatpush3.bf16.msra.mxu1 %v29318_v35  ;;  %v29351_v35 = vpack.c.bf16 %v32086_v8, %v32085_v56  ;;  %v29370_v56 = vpack.c.bf16 %v32092_v20, %v32091_v18  ;;  %v3682_v8 = vand.u32 4294901760, %v105_v14  ;;  %v29378_v61 = vsub.f32 %v102_v38, %v3200_v63 }
  0xc8   :  { %24671 = vmatmul.mubr.f32.vlgmr.msra.gmra.mrb[4].mxu0 %v28849_v29  ;;  %27166 = vmatprep.subr.bf16.mxu1 %v32012_v0  ;;  %v3691_v18 = vand.u32 4294901760, %v108_v1  ;;  %v29399_v40 = vpack.c.bf16 %v3200_v63, %v3197_v44 }
  0xc9   :  { %27132 = vmatpush3.bf16.msra.mxu0 %v29211_v26  ;;  %24681 = vmatprep.mubr.msk.f32.mxu0 %vm28717_vm0, %v32072_v55  ;;  %32087 = vst [vmem:[#allocation29_spill] sm:$0xff] %v29351_v35  ;;  %32093 = vst [vmem:[#allocation31_spill] sm:$0xff] %v29370_v56  ;;  %v29383_v20 = vsub.f32 %v105_v14, %v3682_v8 }
  0xca   :  { %27133 = vmatprep.subr.bf16.mxu0 %v32012_v0  ;;  %24737 = vmatmul.mubr.f32.vlgmr.msra.gmra.mrb[4].mxu1 %v28849_v29  ;;  %32094 = vst [vmem:[#allocation32_spill] sm:$0xff] %v29399_v40  ;;  %v29408_v38 = vsub.f32 %v108_v1, %v3691_v18  ;;  %v29421_v1 = vpack.c.bf16 %v3685_v12, %v3682_v8  ;;  %v32100_v8 = vmov 0.0|0.0  }
  0xcb   :  { %27168 = vmatpush3.bf16.msra.mxu1 %v29233_v36  ;;  %24747 = vmatprep.mubr.msk.f32.mxu1 %vm28717_vm0, %v32072_v55 }
  0xcc   :  { %27169 = vmatprep.subr.bf16.mxu1 %v32012_v0  ;;  %32096 = vst [vmem:[#allocation33_spill] sm:$0xff] %v29421_v1 }
  0xcd   :  { %27135 = vmatpush3.bf16.msra.mxu0 %v29235_v50 }
  0xce   :  { %27136 = vmatprep.subr.bf16.mxu0 %v32012_v0 }
  0xcf   :  { %27171 = vmatpush3.bf16.msra.mxu1 %v29259_v27 }
  0xd0   :  { %24682 = vmatmul.mubr.f32.vlgmr.msra.gmra.mrb[4].mxu0 %v28863_v37  ;;  %27172 = vmatprep.subr.bf16.mxu1 %v32012_v0 }
  0xd1   :  { %27138 = vmatpush3.bf16.msra.mxu0 %v29342_v49  ;;  %24692 = vmatprep.mubr.msk.f32.mxu0 %vm28717_vm0, %v32072_v55  ;;  %v3206_v49 = vand.u32 4294901760, %v104_v13 }
  0xd2   :  { %27139 = vmatprep.subr.bf16.mxu0 %v32012_v0  ;;  %24748 = vmatmul.mubr.f32.vlgmr.msra.gmra.mrb[4].mxu1 %v28863_v37 }
  0xd3   :  { %27174 = vmatpush3.bf16.msra.mxu1 %v29351_v35  ;;  %24758 = vmatprep.mubr.msk.f32.mxu1 %vm28717_vm0, %v32072_v55  ;;  %v29376_v35 = vsub.f32 %v101_v32, %v3197_v44  ;;  %v29393_v46 = vsub.f32 %v104_v13, %v3206_v49  ;;  %v29406_v13 = vsub.f32 %v107_v41, %v3688_v39  ;;  %v32095_v44 = vand.u32 4294901760, %v29378_v61 }
  0xd4   :  { %27175 = vmatprep.subr.bf16.mxu1 %v32012_v0  ;;  %v29423_v41 = vpack.c.bf16 %v3206_v49, %v3203_v45 }
  0xd5   :  { %27141 = vmatpush3.bf16.msra.mxu0 %v29359_v43  ;;  %v32009_v32 = vand.u32 4294901760, %v29376_v35  ;;  %v29391_v43 = vsub.f32 %v103_v59, %v3203_v45  ;;  %v32020_v59 = vand.u32 4294901760, %v29406_v13 }
  0xd6   :  { %27142 = vmatprep.subr.bf16.mxu0 %v32012_v0  ;;  %32097 = vst [vmem:[#allocation34_spill] sm:$0xff] %v29423_v41 }
  0xd7   :  { %27177 = vmatpush3.bf16.msra.mxu1 %v29370_v56  ;;  %v3279_v63 = vsub.f32 %v29376_v35, %v32009_v32  ;;  %v3286_v56 = vsub.f32 %v29378_v61, %v32095_v44  ;;  %v32098_v32 = vand.u32 4294901760, %v29383_v20  ;;  %v32099_v44 = vand.u32 4294901760, %v29385_v15 }
  0xd8   :  { %24693 = vmatmul.mubr.f32.vlgmr.msra.gmra.mrb[4].mxu0 %v28833_v23  ;;  %27178 = vmatprep.subr.bf16.mxu1 %v32012_v0  ;;  %v32101_v45 = vand.u32 4294901760, %v29391_v43 }
  0xd9   :  { %27144 = vmatpush3.bf16.msra.mxu0 %v29211_v26  ;;  %24703 = vmatprep.mubr.msk.f32.mxu0 %vm28717_vm0, %v32072_v55  ;;  %v3771_v14 = vsub.f32 %v29385_v15, %v32099_v44  ;;  %v3280_v49 = vand.u32 4294901760, %v3279_v63  ;;  %v3287_v12 = vand.u32 4294901760, %v3286_v56  ;;  %v29447_v44 = vpack.c.bf16 %v3691_v18, %v3688_v39 }
  0xda   :  { %27145 = vmatprep.subr.bf16.mxu0 %v32012_v0  ;;  %24759 = vmatmul.mubr.f32.vlgmr.msra.gmra.mrb[4].mxu1 %v28833_v23 }
  0xdb   :  { %27180 = vmatpush3.bf16.msra.mxu1 %v29233_v36  ;;  %24769 = vmatprep.mubr.msk.f32.mxu1 %vm28717_vm0, %v32072_v55  ;;  %32103 = vst [vmem:[#allocation35_spill] sm:$0xff] %v29447_v44  ;;  %v3772_v63 = vand.u32 4294901760, %v3771_v14  ;;  %v29460_v39 = vpack.c.bf16 %v3287_v12, %v3280_v49  ;;  %v29506_v49 = vpack.c.bf16 %v29408_v38, %v29406_v13  ;;  %v32112_v12 = vand.u32 4294901760, %v29376_v35 }
  0xdc   :  { %27181 = vmatprep.subr.bf16.mxu1 %v32012_v0 }
  0xdd   :  { %27147 = vmatpush3.bf16.msra.mxu0 %v29235_v50  ;;  %v3764_v50 = vsub.f32 %v29383_v20, %v32098_v32  ;;  %v32102_v32 = vand.u32 4294901760, %v29393_v46  ;;  %32104 = vst [vmem:[#allocation36_spill] sm:$0xff] %v29460_v39  ;;  %32111 = vst [vmem:[#allocation43_spill] sm:$0xff] %v29506_v49 }
  0xde   :  { %27184 = vmatprep.subr.bf16.mxu0 %v32012_v0  ;;  %v32021_v0 = vand.u32 4294901760, %v29408_v38 }
  0xdf   :  { %27183 = vmatpush3.bf16.msra.mxu1 %v29259_v27  ;;  %v3293_v27 = vsub.f32 %v29391_v43, %v32101_v45  ;;  %v3300_v36 = vsub.f32 %v29393_v46, %v32102_v32  ;;  %v3765_v56 = vand.u32 4294901760, %v3764_v50  ;;  %v3778_v45 = vsub.f32 %v29406_v13, %v32020_v59 }
  0xe0   :  { %24704 = vmatmul.mubr.f32.vlgmr.msra.gmra.mrb[4].mxu0 %v28833_v23  ;;  %27220 = vmatprep.subr.bf16.mxu1 %v32100_v8  ;;  %v3785_v32 = vsub.f32 %v29408_v38, %v32021_v0 }
  0xe1   :  { %27186 = vmatpush3.bf16.msra.mxu0 %v29399_v40  ;;  %24780 = vmatprep.mubr.msk.f32.mxu0 %vm28717_vm0, %v32072_v55  ;;  %v3294_v18 = vand.u32 4294901760, %v3293_v27  ;;  %v3301_v26 = vand.u32 4294901760, %v3300_v36  ;;  %v29465_v50 = vpack.c.bf16 %v3772_v63, %v3765_v56  ;;  %v3779_v14 = vand.u32 4294901760, %v3778_v45  ;;  %v109_v45 = vld [vmem:[#allocation7 + $0x100] sm:$0xff] }
  0xe2   :  { %27187 = vmatprep.subr.bf16.mxu0 %v32100_v8  ;;  %24770 = vmatmul.mubr.f32.vlgmr.msra.gmra.mrb[4].mxu1 %v28833_v23  ;;  %v3786_v59 = vand.u32 4294901760, %v3785_v32  ;;  %v29491_v36 = vpack.c.bf16 %v29385_v15, %v29383_v20  ;;  %v32113_v56 = vand.u32 4294901760, %v29378_v61  ;;  %v110_v32 = vld [vmem:[#allocation7 + $0x108] sm:$0xff] }
  0xe3   :  { %27222 = vmatpush3.bf16.msra.mxu1 %v29421_v1  ;;  %24846 = vmatprep.mubr.msk.f32.mxu1 %vm28717_vm0, %v32072_v55  ;;  %32105 = vst [vmem:[#allocation37_spill] sm:$0xff] %v29465_v50  ;;  %v29469_v0 = vpack.c.bf16 %v3301_v26, %v3294_v18  ;;  %v29484_v26 = vpack.c.bf16 %v29378_v61, %v29376_v35  ;;  %v32115_v18 = vand.u32 4294901760, %v29383_v20  ;;  %v32118_v35 = vand.u32 4294901760, %v29391_v43  ;;  %v112_v20 = vld [vmem:[#allocation7 + $0x118] sm:$0xff] }
  0xe4   :  { %27223 = vmatprep.subr.bf16.mxu1 %v32100_v8  ;;  %v29476_v27 = vpack.c.bf16 %v3786_v59, %v3779_v14  ;;  %32109 = vst [vmem:[#allocation41_spill] sm:$0xff] %v29491_v36  ;;  %v29497_v59 = vpack.c.bf16 %v29393_v46, %v29391_v43  ;;  %v29530_v63 = vpack.c.bf16 %v32113_v56, %v32112_v12  ;;  %v32116_v14 = vand.u32 4294901760, %v29385_v15  ;;  %v111_v15 = vld [vmem:[#allocation7 + $0x110] sm:$0xff] }
  0xe5   :  { %27189 = vmatpush3.bf16.msra.mxu0 %v29423_v41  ;;  %32106 = vst [vmem:[#allocation38_spill] sm:$0xff] %v29469_v0  ;;  %32108 = vst [vmem:[#allocation40_spill] sm:$0xff] %v29484_v26  ;;  %v32119_v61 = vand.u32 4294901760, %v29393_v46  ;;  %v4167_v56 = vand.u32 4294901760, %v109_v45  ;;  %v32121_v43 = vand.u32 4294901760, %v29406_v13  ;;  %v32122_v46 = vand.u32 4294901760, %v29408_v38 }
  0xe6   :  { %27190 = vmatprep.subr.bf16.mxu0 %v32100_v8  ;;  %32107 = vst [vmem:[#allocation39_spill] sm:$0xff] %v29476_v27  ;;  %32110 = vst [vmem:[#allocation42_spill] sm:$0xff] %v29497_v59 }
  0xe7   :  { %27225 = vmatpush3.bf16.msra.mxu1 %v29447_v44  ;;  %32114 = vst [vmem:[#allocation44_spill] sm:$0xff] %v29530_v63  ;;  %v29547_v12 = vpack.c.bf16 %v32119_v61, %v32118_v35  ;;  %v4173_v61 = vand.u32 4294901760, %v111_v15 }
  0xe8   :  { %24781 = vmatmul.mubr.f32.vlgmr.msra.gmra.mrb[6].mxu0 %v28895_v53  ;;  %27226 = vmatprep.subr.bf16.mxu1 %v32100_v8 }
  0xe9   :  { %27192 = vmatpush3.bf16.msra.mxu0 %v29460_v39  ;;  %24791 = vmatprep.mubr.msk.f32.mxu0 %vm28717_vm0, %v32072_v55  ;;  %32120 = vst [vmem:[#allocation46_spill] sm:$0xff] %v29547_v12 }
  0xea   :  { %27193 = vmatprep.subr.bf16.mxu0 %v32100_v8  ;;  %24847 = vmatmul.mubr.f32.vlgmr.msra.gmra.mrb[6].mxu1 %v28895_v53 }
  0xeb   :  { %27228 = vmatpush3.bf16.msra.mxu1 %v29465_v50  ;;  %24857 = vmatprep.mubr.msk.f32.mxu1 %vm28717_vm0, %v32072_v55 }
  0xec   :  { %27229 = vmatprep.subr.bf16.mxu1 %v32100_v8 }
  0xed   :  { %27195 = vmatpush3.bf16.msra.mxu0 %v29469_v0  ;;  %v116_v0 = vld [vmem:[#allocation7 + $0x138] sm:$0xff] }
  0xee   :  { %27196 = vmatprep.subr.bf16.mxu0 %v32100_v8 }
  0xef   :  { %27231 = vmatpush3.bf16.msra.mxu1 %v29476_v27  ;;  %v115_v27 = vld [vmem:[#allocation7 + $0x130] sm:$0xff] }
  0xf0   :  { %24792 = vmatmul.mubr.f32.vlgmr.msra.gmra.mrb[6].mxu0 %v28833_v23  ;;  %27232 = vmatprep.subr.bf16.mxu1 %v32100_v8  ;;  %v4658_v38 = vand.u32 4294901760, %v115_v27 }
  0xf1   :  { %27198 = vmatpush3.bf16.msra.mxu0 %v29484_v26  ;;  %24802 = vmatprep.mubr.msk.f32.mxu0 %vm28717_vm0, %v32072_v55  ;;  %v114_v26 = vld [vmem:[#allocation7 + $0x128] sm:$0xff] }
  0xf2   :  { %27199 = vmatprep.subr.bf16.mxu0 %v32100_v8  ;;  %24858 = vmatmul.mubr.f32.vlgmr.msra.gmra.mrb[6].mxu1 %v28833_v23  ;;  %v4655_v35 = vand.u32 4294901760, %v114_v26 }
  0xf3   :  { %27234 = vmatpush3.bf16.msra.mxu1 %v29491_v36  ;;  %24868 = vmatprep.mubr.msk.f32.mxu1 %vm28717_vm0, %v32072_v55  ;;  %v113_v36 = vld [vmem:[#allocation7 + $0x120] sm:$0xff] }
  0xf4   :  { %27235 = vmatprep.subr.bf16.mxu1 %v32100_v8  ;;  %v29573_v50 = vsub.f32 %v114_v26, %v4655_v35 }
  0xf5   :  { %27201 = vmatpush3.bf16.msra.mxu0 %v29497_v59  ;;  %v4170_v59 = vand.u32 4294901760, %v110_v32 }
  0xf6   :  { %27202 = vmatprep.subr.bf16.mxu0 %v32100_v8 }
  0xf7   :  { %27237 = vmatpush3.bf16.msra.mxu1 %v29506_v49  ;;  %v29539_v49 = vpack.c.bf16 %v32116_v14, %v32115_v18  ;;  %v29558_v18 = vpack.c.bf16 %v32122_v46, %v32121_v43  ;;  %v4652_v14 = vand.u32 4294901760, %v113_v36  ;;  %v29566_v13 = vsub.f32 %v110_v32, %v4170_v59 }
  0xf8   :  { %24803 = vmatmul.mubr.f32.vlgmr.msra.gmra.mrb[6].mxu0 %v28849_v29  ;;  %27238 = vmatprep.subr.bf16.mxu1 %v32100_v8  ;;  %v4661_v43 = vand.u32 4294901760, %v116_v0  ;;  %v29587_v26 = vpack.c.bf16 %v4170_v59, %v4167_v56 }
  0xf9   :  { %27204 = vmatpush3.bf16.msra.mxu0 %v29399_v40  ;;  %24813 = vmatprep.mubr.msk.f32.mxu0 %vm28717_vm0, %v32072_v55  ;;  %32117 = vst [vmem:[#allocation45_spill] sm:$0xff] %v29539_v49  ;;  %32123 = vst [vmem:[#allocation47_spill] sm:$0xff] %v29558_v18  ;;  %v29571_v46 = vsub.f32 %v113_v36, %v4652_v14 }
  0xfa   :  { %27205 = vmatprep.subr.bf16.mxu0 %v32100_v8  ;;  %24869 = vmatmul.mubr.f32.vlgmr.msra.gmra.mrb[6].mxu1 %v28849_v29  ;;  %32124 = vst [vmem:[#allocation48_spill] sm:$0xff] %v29587_v26  ;;  %v29596_v32 = vsub.f32 %v116_v0, %v4661_v43  ;;  %v29609_v0 = vpack.c.bf16 %v4655_v35, %v4652_v14 }
  0xfb   :  { %27240 = vmatpush3.bf16.msra.mxu1 %v29421_v1  ;;  %24879 = vmatprep.mubr.msk.f32.mxu1 %vm28717_vm0, %v32072_v55 }
  0xfc   :  { %27241 = vmatprep.subr.bf16.mxu1 %v32100_v8  ;;  %32126 = vst [vmem:[#allocation49_spill] sm:$0xff] %v29609_v0 }
  0xfd   :  { %27207 = vmatpush3.bf16.msra.mxu0 %v29423_v41 }
  0xfe   :  { %27208 = vmatprep.subr.bf16.mxu0 %v32100_v8 }
  0xff   :  { %27243 = vmatpush3.bf16.msra.mxu1 %v29447_v44 }
 0x100   :  { %24814 = vmatmul.mubr.f32.vlgmr.msra.gmra.mrb[6].mxu0 %v28863_v37  ;;  %27244 = vmatprep.subr.bf16.mxu1 %v32100_v8 }
 0x101   :  { %27210 = vmatpush3.bf16.msra.mxu0 %v29530_v63  ;;  %24824 = vmatprep.mubr.msk.f32.mxu0 %vm28717_vm0, %v32072_v55  ;;  %v4176_v63 = vand.u32 4294901760, %v112_v20 }
 0x102   :  { %27211 = vmatprep.subr.bf16.mxu0 %v32100_v8  ;;  %24880 = vmatmul.mubr.f32.vlgmr.msra.gmra.mrb[6].mxu1 %v28863_v37 }
 0x103   :  { %27246 = vmatpush3.bf16.msra.mxu1 %v29539_v49  ;;  %24890 = vmatprep.mubr.msk.f32.mxu1 %vm28717_vm0, %v32072_v55  ;;  %v29564_v49 = vsub.f32 %v109_v45, %v4167_v56  ;;  %v29581_v39 = vsub.f32 %v112_v20, %v4176_v63  ;;  %v29594_v20 = vsub.f32 %v115_v27, %v4658_v38  ;;  %v32125_v56 = vand.u32 4294901760, %v29566_v13 }
 0x104   :  { %27247 = vmatprep.subr.bf16.mxu1 %v32100_v8  ;;  %v29611_v27 = vpack.c.bf16 %v4176_v63, %v4173_v61 }
 0x105   :  { %27213 = vmatpush3.bf16.msra.mxu0 %v29547_v12  ;;  %v32034_v45 = vand.u32 4294901760, %v29564_v49  ;;  %v29579_v12 = vsub.f32 %v111_v15, %v4173_v61  ;;  %v32043_v15 = vand.u32 4294901760, %v29594_v20 }
 0x106   :  { %27214 = vmatprep.subr.bf16.mxu0 %v32100_v8  ;;  %32127 = vst [vmem:[#allocation50_spill] sm:$0xff] %v29611_v27 }
 0x107   :  { %27249 = vmatpush3.bf16.msra.mxu1 %v29558_v18  ;;  %v4249_v59 = vsub.f32 %v29564_v49, %v32034_v45  ;;  %v4256_v18 = vsub.f32 %v29566_v13, %v32125_v56  ;;  %v32128_v45 = vand.u32 4294901760, %v29571_v46  ;;  %v32129_v56 = vand.u32 4294901760, %v29573_v50 }
 0x108   :  { %24825 = vmatmul.mubr.f32.vlgmr.msra.gmra.mrb[6].mxu0 %v28833_v23  ;;  %27250 = vmatprep.subr.bf16.mxu1 %v32100_v8  ;;  %v32130_v35 = vand.u32 4294901760, %v29579_v12 }
 0x109   :  { %27216 = vmatpush3.bf16.msra.mxu0 %v29399_v40  ;;  %24835 = vmatprep.mubr.msk.f32.mxu0 %vm28717_vm0, %v32072_v55  ;;  %v4741_v36 = vsub.f32 %v29573_v50, %v32129_v56  ;;  %v4250_v63 = vand.u32 4294901760, %v4249_v59  ;;  %v4257_v14 = vand.u32 4294901760, %v4256_v18  ;;  %v29635_v56 = vpack.c.bf16 %v4661_v43, %v4658_v38 }
 0x10a   :  { %27217 = vmatprep.subr.bf16.mxu0 %v32100_v8  ;;  %24891 = vmatmul.mubr.f32.vlgmr.msra.gmra.mrb[6].mxu1 %v28833_v23  ;;  %v4263_v61 = vsub.f32 %v29579_v12, %v32130_v35  ;;  %v4748_v35 = vsub.f32 %v29594_v20, %v32043_v15 }
 0x10b   :  { %27252 = vmatpush3.bf16.msra.mxu1 %v29421_v1  ;;  %24901 = vmatprep.mubr.msk.f32.mxu1 %vm28717_vm0, %v32072_v55  ;;  %v32044_v1 = vand.u32 4294901760, %v29596_v32  ;;  %32132 = vst [vmem:[#allocation51_spill] sm:$0xff] %v29635_v56  ;;  %v4742_v59 = vand.u32 4294901760, %v4741_v36  ;;  %v29648_v38 = vpack.c.bf16 %v4257_v14, %v4250_v63  ;;  %v29685_v63 = vpack.c.bf16 %v29581_v39, %v29579_v12 }
 0x10c   :  { %27253 = vmatprep.subr.bf16.mxu1 %v32100_v8  ;;  %v4264_v43 = vand.u32 4294901760, %v4263_v61  ;;  %v4749_v36 = vand.u32 4294901760, %v4748_v35  ;;  %v29694_v14 = vpack.c.bf16 %v29596_v32, %v29594_v20  ;;  %v32141_v61 = vand.u32 4294901760, %v29564_v49  ;;  %v117_v35 = vld [vmem:[#allocation7 + $0x140] sm:$0xff] }
 0x10d   :  { %27219 = vmatpush3.bf16.msra.mxu0 %v29423_v41  ;;  %v4734_v41 = vsub.f32 %v29571_v46, %v32128_v45  ;;  %v32131_v45 = vand.u32 4294901760, %v29581_v39  ;;  %32133 = vst [vmem:[#allocation52_spill] sm:$0xff] %v29648_v38  ;;  %32139 = vst [vmem:[#allocation58_spill] sm:$0xff] %v29685_v63 }
 0x10e   :  { %27256 = vmatprep.subr.bf16.mxu0 %v32100_v8  ;;  %32140 = vst [vmem:[#allocation59_spill] sm:$0xff] %v29694_v14 }
 0x10f   :  { %27255 = vmatpush3.bf16.msra.mxu1 %v29447_v44  ;;  %v4270_v44 = vsub.f32 %v29581_v39, %v32131_v45  ;;  %v4735_v18 = vand.u32 4294901760, %v4734_v41  ;;  %v4755_v45 = vsub.f32 %v29596_v32, %v32044_v1 }
 0x110   :  { %24836 = vmatmul.mubr.f32.vlgmr.msra.gmra.mrb[6].mxu0 %v28833_v23  ;;  %27292 = vmatprep.subr.bf16.mxu1 %v32100_v8 }
 0x111   :  { %27258 = vmatpush3.bf16.msra.mxu0 %v29587_v26  ;;  %24912 = vmatprep.mubr.msk.f32.mxu0 %vm28717_vm0, %v32072_v55  ;;  %v4271_v40 = vand.u32 4294901760, %v4270_v44  ;;  %v29653_v41 = vpack.c.bf16 %v4742_v59, %v4735_v18  ;;  %v4756_v15 = vand.u32 4294901760, %v4755_v45  ;;  %v32142_v18 = vand.u32 4294901760, %v29566_v13  ;;  %v118_v45 = vld [vmem:[#allocation7 + $0x148] sm:$0xff] }
 0x112   :  { %27259 = vmatprep.subr.bf16.mxu0 %v32100_v8  ;;  %24902 = vmatmul.mubr.f32.vlgmr.msra.gmra.mrb[6].mxu1 %v28833_v23 }
 0x113   :  { %27294 = vmatpush3.bf16.msra.mxu1 %v29609_v0  ;;  %24978 = vmatprep.mubr.msk.f32.mxu1 %vm28717_vm0, %v32072_v55  ;;  %32134 = vst [vmem:[#allocation53_spill] sm:$0xff] %v29653_v41  ;;  %v29657_v1 = vpack.c.bf16 %v4271_v40, %v4264_v43  ;;  %v29664_v44 = vpack.c.bf16 %v4756_v15, %v4749_v36  ;;  %v32144_v43 = vand.u32 4294901760, %v29571_v46  ;;  %v32145_v36 = vand.u32 4294901760, %v29573_v50 }
 0x114   :  { %27295 = vmatprep.subr.bf16.mxu1 %v32100_v8  ;;  %v29672_v40 = vpack.c.bf16 %v29566_v13, %v29564_v49  ;;  %v29679_v15 = vpack.c.bf16 %v29573_v50, %v29571_v46  ;;  %v29718_v59 = vpack.c.bf16 %v32142_v18, %v32141_v61  ;;  %v32147_v49 = vand.u32 4294901760, %v29579_v12  ;;  %v119_v50 = vld [vmem:[#allocation7 + $0x150] sm:$0xff]  ;;  %v120_v46 = vld [vmem:[#allocation7 + $0x158] sm:$0xff] }
 0x115   :  { %27261 = vmatpush3.bf16.msra.mxu0 %v29611_v27  ;;  %32135 = vst [vmem:[#allocation54_spill] sm:$0xff] %v29657_v1  ;;  %32136 = vst [vmem:[#allocation55_spill] sm:$0xff] %v29664_v44  ;;  %v32148_v13 = vand.u32 4294901760, %v29581_v39  ;;  %v5137_v18 = vand.u32 4294901760, %v117_v35  ;;  %v32150_v12 = vand.u32 4294901760, %v29594_v20  ;;  %v32151_v39 = vand.u32 4294901760, %v29596_v32 }
 0x116   :  { %27262 = vmatprep.subr.bf16.mxu0 %v32100_v8  ;;  %32137 = vst [vmem:[#allocation56_spill] sm:$0xff] %v29672_v40  ;;  %32138 = vst [vmem:[#allocation57_spill] sm:$0xff] %v29679_v15 }
 0x117   :  { %27297 = vmatpush3.bf16.msra.mxu1 %v29635_v56  ;;  %32143 = vst [vmem:[#allocation60_spill] sm:$0xff] %v29718_v59  ;;  %v29735_v61 = vpack.c.bf16 %v32148_v13, %v32147_v49  ;;  %v5143_v13 = vand.u32 4294901760, %v119_v50 }
 0x118   :  { %24913 = vmatmul.mubr.f32.vlgmr.msra.gmra.mrb[8].mxu0 %v28895_v53  ;;  %27298 = vmatprep.subr.bf16.mxu1 %v32100_v8 }
 0x119   :  { %27264 = vmatpush3.bf16.msra.mxu0 %v29648_v38  ;;  %24923 = vmatprep.mubr.msk.f32.mxu0 %vm28717_vm0, %v32072_v55  ;;  %32149 = vst [vmem:[#allocation62_spill] sm:$0xff] %v29735_v61 }
 0x11a   :  { %27265 = vmatprep.subr.bf16.mxu0 %v32100_v8  ;;  %24979 = vmatmul.mubr.f32.vlgmr.msra.gmra.mrb[8].mxu1 %v28895_v53 }
 0x11b   :  { %27300 = vmatpush3.bf16.msra.mxu1 %v29653_v41  ;;  %24989 = vmatprep.mubr.msk.f32.mxu1 %vm28717_vm0, %v32072_v55 }
 0x11c   :  { %27301 = vmatprep.subr.bf16.mxu1 %v32100_v8 }
 0x11d   :  { %27267 = vmatpush3.bf16.msra.mxu0 %v29657_v1  ;;  %v124_v1 = vld [vmem:[#allocation7 + $0x178] sm:$0xff] }
 0x11e   :  { %27268 = vmatprep.subr.bf16.mxu0 %v32100_v8 }
 0x11f   :  { %27303 = vmatpush3.bf16.msra.mxu1 %v29664_v44  ;;  %v123_v44 = vld [vmem:[#allocation7 + $0x170] sm:$0xff] }
 0x120   :  { %24924 = vmatmul.mubr.f32.vlgmr.msra.gmra.mrb[8].mxu0 %v28833_v23  ;;  %27304 = vmatprep.subr.bf16.mxu1 %v32100_v8  ;;  %v5628_v32 = vand.u32 4294901760, %v123_v44 }
 0x121   :  { %27270 = vmatpush3.bf16.msra.mxu0 %v29672_v40  ;;  %24934 = vmatprep.mubr.msk.f32.mxu0 %vm28717_vm0, %v32072_v55  ;;  %v122_v40 = vld [vmem:[#allocation7 + $0x168] sm:$0xff] }
 0x122   :  { %27271 = vmatprep.subr.bf16.mxu0 %v32100_v8  ;;  %24990 = vmatmul.mubr.f32.vlgmr.msra.gmra.mrb[8].mxu1 %v28833_v23  ;;  %v5625_v49 = vand.u32 4294901760, %v122_v40 }
 0x123   :  { %27306 = vmatpush3.bf16.msra.mxu1 %v29679_v15  ;;  %25000 = vmatprep.mubr.msk.f32.mxu1 %vm28717_vm0, %v32072_v55  ;;  %v121_v15 = vld [vmem:[#allocation7 + $0x160] sm:$0xff] }
 0x124   :  { %27307 = vmatprep.subr.bf16.mxu1 %v32100_v8  ;;  %v29761_v41 = vsub.f32 %v122_v40, %v5625_v49 }
 0x125   :  { %27273 = vmatpush3.bf16.msra.mxu0 %v29685_v63  ;;  %v5140_v63 = vand.u32 4294901760, %v118_v45 }
 0x126   :  { %27274 = vmatprep.subr.bf16.mxu0 %v32100_v8 }
 0x127   :  { %27309 = vmatpush3.bf16.msra.mxu1 %v29694_v14  ;;  %v29727_v14 = vpack.c.bf16 %v32145_v36, %v32144_v43  ;;  %v29746_v43 = vpack.c.bf16 %v32151_v39, %v32150_v12  ;;  %v5622_v36 = vand.u32 4294901760, %v121_v15  ;;  %v29754_v20 = vsub.f32 %v118_v45, %v5140_v63 }
 0x128   :  { %24935 = vmatmul.mubr.f32.vlgmr.msra.gmra.mrb[8].mxu0 %v28849_v29  ;;  %27310 = vmatprep.subr.bf16.mxu1 %v32100_v8  ;;  %v5631_v12 = vand.u32 4294901760, %v124_v1  ;;  %v29775_v40 = vpack.c.bf16 %v5140_v63, %v5137_v18 }
 0x129   :  { %27276 = vmatpush3.bf16.msra.mxu0 %v29587_v26  ;;  %24945 = vmatprep.mubr.msk.f32.mxu0 %vm28717_vm0, %v32072_v55  ;;  %32146 = vst [vmem:[#allocation61_spill] sm:$0xff] %v29727_v14  ;;  %32152 = vst [vmem:[#allocation63_spill] sm:$0xff] %v29746_v43  ;;  %v29759_v39 = vsub.f32 %v121_v15, %v5622_v36 }
 0x12a   :  { %27277 = vmatprep.subr.bf16.mxu0 %v32100_v8  ;;  %25001 = vmatmul.mubr.f32.vlgmr.msra.gmra.mrb[8].mxu1 %v28849_v29  ;;  %v29784_v45 = vsub.f32 %v124_v1, %v5631_v12  ;;  %v29797_v1 = vpack.c.bf16 %v5625_v49, %v5622_v36 }
 0x12b   :  { %27312 = vmatpush3.bf16.msra.mxu1 %v29609_v0  ;;  %25011 = vmatprep.mubr.msk.f32.mxu1 %vm28717_vm0, %v32072_v55 }
 0x12c   :  { %27313 = vmatprep.subr.bf16.mxu1 %v32100_v8 }
 0x12d   :  { %27279 = vmatpush3.bf16.msra.mxu0 %v29611_v27 }
 0x12e   :  { %27280 = vmatprep.subr.bf16.mxu0 %v32100_v8 }
 0x12f   :  { %27315 = vmatpush3.bf16.msra.mxu1 %v29635_v56 }
 0x130   :  { %24946 = vmatmul.mubr.f32.vlgmr.msra.gmra.mrb[8].mxu0 %v28863_v37  ;;  %27316 = vmatprep.subr.bf16.mxu1 %v32100_v8 }
 0x131   :  { %27282 = vmatpush3.bf16.msra.mxu0 %v29718_v59  ;;  %24956 = vmatprep.mubr.msk.f32.mxu0 %vm28717_vm0, %v32072_v55  ;;  %v5146_v59 = vand.u32 4294901760, %v120_v46 }
 0x132   :  { %27283 = vmatprep.subr.bf16.mxu0 %v32100_v8  ;;  %25012 = vmatmul.mubr.f32.vlgmr.msra.gmra.mrb[8].mxu1 %v28863_v37 }
 0x133   :  { %27318 = vmatpush3.bf16.msra.mxu1 %v29727_v14  ;;  %25022 = vmatprep.mubr.msk.f32.mxu1 %vm28717_vm0, %v32072_v55  ;;  %v29752_v14 = vsub.f32 %v117_v35, %v5137_v18  ;;  %v29769_v38 = vsub.f32 %v120_v46, %v5146_v59  ;;  %v29782_v46 = vsub.f32 %v123_v44, %v5628_v32  ;;  %v32153_v18 = vand.u32 4294901760, %v29754_v20 }
 0x134   :  { %27319 = vmatprep.subr.bf16.mxu1 %v32100_v8  ;;  %v29799_v44 = vpack.c.bf16 %v5146_v59, %v5143_v13 }
 0x135   :  { %27285 = vmatpush3.bf16.msra.mxu0 %v29735_v61  ;;  %v32057_v35 = vand.u32 4294901760, %v29752_v14  ;;  %v29767_v61 = vsub.f32 %v119_v50, %v5143_v13  ;;  %v32066_v50 = vand.u32 4294901760, %v29782_v46 }
 0x136   :  { %27286 = vmatprep.subr.bf16.mxu0 %v32100_v8 }
 0x137   :  { %27321 = vmatpush3.bf16.msra.mxu1 %v29746_v43  ;;  %v5219_v63 = vsub.f32 %v29752_v14, %v32057_v35  ;;  %v5226_v43 = vsub.f32 %v29754_v20, %v32153_v18  ;;  %v32154_v35 = vand.u32 4294901760, %v29759_v39  ;;  %v32155_v18 = vand.u32 4294901760, %v29761_v41 }
 0x138   :  { %24957 = vmatmul.mubr.f32.vlgmr.msra.gmra.mrb[8].mxu0 %v28833_v23  ;;  %27322 = vmatprep.subr.bf16.mxu1 %v32100_v8  ;;  %v32156_v49 = vand.u32 4294901760, %v29767_v61 }
 0x139   :  { %27288 = vmatpush3.bf16.msra.mxu0 %v29587_v26  ;;  %24967 = vmatprep.mubr.msk.f32.mxu0 %vm28717_vm0, %v32072_v55  ;;  %v5711_v15 = vsub.f32 %v29761_v41, %v32155_v18  ;;  %v5220_v59 = vand.u32 4294901760, %v5219_v63  ;;  %v5227_v36 = vand.u32 4294901760, %v5226_v43  ;;  %v29823_v18 = vpack.c.bf16 %v5631_v12, %v5628_v32 }
 0x13a   :  { %27289 = vmatprep.subr.bf16.mxu0 %v32100_v8  ;;  %25023 = vmatmul.mubr.f32.vlgmr.msra.gmra.mrb[8].mxu1 %v28833_v23  ;;  %v5233_v13 = vsub.f32 %v29767_v61, %v32156_v49  ;;  %v5718_v49 = vsub.f32 %v29782_v46, %v32066_v50 }
 0x13b   :  { %27324 = vmatpush3.bf16.msra.mxu1 %v29609_v0  ;;  %25033 = vmatprep.mubr.msk.f32.mxu1 %vm28717_vm0, %v32072_v55  ;;  %v32067_v0 = vand.u32 4294901760, %v29784_v45  ;;  %v5712_v63 = vand.u32 4294901760, %v5711_v15  ;;  %v29836_v32 = vpack.c.bf16 %v5227_v36, %v5220_v59 }
 0x13c   :  { %27325 = vmatprep.subr.bf16.mxu1 %v32100_v8  ;;  %v5234_v12 = vand.u32 4294901760, %v5233_v13  ;;  %v5719_v15 = vand.u32 4294901760, %v5718_v49  ;;  %v29884_v13 = vpack.c.bf16 %v29784_v45, %v29782_v46  ;;  %v32158_v49 = vand.u32 4294901760, %v29752_v14 }
 0x13d   :  { %27291 = vmatpush3.bf16.msra.mxu0 %v29611_v27  ;;  %v5704_v27 = vsub.f32 %v29759_v39, %v32154_v35  ;;  %v32157_v35 = vand.u32 4294901760, %v29769_v38 }
 0x13e   :  { %27328 = vmatprep.subr.bf16.mxu0 %v32100_v8 }
 0x13f   :  { %27327 = vmatpush3.bf16.msra.mxu1 %v29635_v56  ;;  %v5240_v56 = vsub.f32 %v29769_v38, %v32157_v35  ;;  %v5705_v43 = vand.u32 4294901760, %v5704_v27  ;;  %v5725_v35 = vsub.f32 %v29784_v45, %v32067_v0 }
 0x140   :  { %24968 = vmatmul.mubr.f32.vlgmr.msra.gmra.mrb[8].mxu0 %v28833_v23  ;;  %27364 = vmatprep.subr.bf16.mxu1 %v32100_v8 }
 0x141   :  { %27330 = vmatpush3.bf16.msra.mxu0 %v29775_v40  ;;  %25044 = vmatprep.mubr.msk.f32.mxu0 %vm28717_vm0, %v32072_v55  ;;  %v5241_v26 = vand.u32 4294901760, %v5240_v56  ;;  %v29841_v27 = vpack.c.bf16 %v5712_v63, %v5705_v43  ;;  %v5726_v50 = vand.u32 4294901760, %v5725_v35  ;;  %v32159_v35 = vand.u32 4294901760, %v29754_v20 }
 0x142   :  { %27331 = vmatprep.subr.bf16.mxu0 %v32100_v8  ;;  %25034 = vmatmul.mubr.f32.vlgmr.msra.gmra.mrb[8].mxu1 %v28833_v23 }
 0x143   :  { %27366 = vmatpush3.bf16.msra.mxu1 %v29797_v1  ;;  %25110 = vmatprep.mubr.msk.f32.mxu1 %vm28717_vm0, %v32072_v55  ;;  %v29845_v0 = vpack.c.bf16 %v5241_v26, %v5234_v12  ;;  %v29852_v56 = vpack.c.bf16 %v5726_v50, %v5719_v15  ;;  %v29860_v26 = vpack.c.bf16 %v29754_v20, %v29752_v14  ;;  %v74_v15 = vld [vmem:[#allocation2 + $0x8] sm:$0xff]  ;;  %v32162_v14 = vand.u32 4294901760, %v29767_v61 }
 0x144   :  { %27367 = vmatprep.subr.bf16.mxu1 %v32100_v8  ;;  %v29873_v50 = vpack.c.bf16 %v29769_v38, %v29767_v61  ;;  %v29910_v12 = vpack.c.bf16 %v32159_v35, %v32158_v49  ;;  %v32163_v20 = vand.u32 4294901760, %v29769_v38  ;;  %v6107_v35 = vsel %vm282_vm1, %v74_v15, 0 }
 0x145   :  { %27333 = vmatpush3.bf16.msra.mxu0 %v29799_v44  ;;  %v29943_v38 = vand.u32 4294901760, %v6107_v35 }
 0x146   :  { %27334 = vmatprep.subr.bf16.mxu0 %v32100_v8  ;;  %v29927_v49 = vpack.c.bf16 %v32163_v20, %v32162_v14  ;;  %v32188_v14 = vld [vmem:[#allocation37_spill] sm:$0xff]  ;;  %v32189_v20 = vld [vmem:[#allocation38_spill] sm:$0xff] }
 0x147   :  { %27369 = vmatpush3.bf16.msra.mxu1 %v29823_v18 }
 0x148   :  { %25045 = vmatmul.mubr.f32.vlgmr.msra.gmra.mrb[10].mxu0 %v28895_v53  ;;  %27370 = vmatprep.subr.bf16.mxu1 %v32100_v8 }
 0x149   :  { %27336 = vmatpush3.bf16.msra.mxu0 %v29836_v32  ;;  %25055 = vmatprep.mubr.msk.f32.mxu0 %vm28717_vm0, %v32072_v55 }
 0x14a   :  { %27337 = vmatprep.subr.bf16.mxu0 %v32100_v8  ;;  %25111 = vmatmul.mubr.f32.vlgmr.msra.gmra.mrb[10].mxu1 %v28895_v53  ;;  %v29867_v53 = vpack.c.bf16 %v29761_v41, %v29759_v39 }
 0x14b   :  { %27372 = vmatpush3.bf16.msra.mxu1 %v29841_v27  ;;  %25121 = vmatprep.mubr.msk.f32.mxu1 %vm28717_vm0, %v32072_v55 }
 0x14c   :  { %27373 = vmatprep.subr.bf16.mxu1 %v32100_v8 }
 0x14d   :  { %27339 = vmatpush3.bf16.msra.mxu0 %v29845_v0 }
 0x14e   :  { %27340 = vmatprep.subr.bf16.mxu0 %v32100_v8 }
 0x14f   :  { %27375 = vmatpush3.bf16.msra.mxu1 %v29852_v56 }
 0x150   :  { %25056 = vmatmul.mubr.f32.vlgmr.msra.gmra.mrb[10].mxu0 %v28833_v23  ;;  %27376 = vmatprep.subr.bf16.mxu1 %v32100_v8 }
 0x151   :  { %27342 = vmatpush3.bf16.msra.mxu0 %v29860_v26  ;;  %25066 = vmatprep.mubr.msk.f32.mxu0 %vm28717_vm0, %v32072_v55 }
 0x152   :  { %27343 = vmatprep.subr.bf16.mxu0 %v32100_v8  ;;  %25122 = vmatmul.mubr.f32.vlgmr.msra.gmra.mrb[10].mxu1 %v28833_v23 }
 0x153   :  { %v29879_v59 = vpop.f32.mrb[0].mxu0  ;;  %27378 = vmatpush3.bf16.msra.mxu1 %v29867_v53  ;;  %25132 = vmatprep.mubr.msk.f32.mxu1 %vm28717_vm0, %v32072_v55 }
 0x154   :  { %v24441_v36 = vpop.f32.mrb[1].mxu0  ;;  %27379 = vmatprep.subr.bf16.mxu1 %v32100_v8 }
 0x155   :  { %27345 = vmatpush3.bf16.msra.mxu0 %v29873_v50  ;;  %v29890_v43 = vpop.f32.mrb[0].mxu1  ;;  %v32161_v36 = vand.u32 4294901760, %v29761_v41  ;;  %v32164_v41 = vand.u32 4294901760, %v29782_v46 }
 0x156   :  { %27346 = vmatprep.subr.bf16.mxu0 %v32100_v8  ;;  %v24507_v63 = vpop.f32.mrb[1].mxu1 }
 0x157   :  { %27381 = vmatpush3.bf16.msra.mxu1 %v29884_v13 }
 0x158   :  { %25067 = vmatmul.mubr.f32.vlgmr.msra.gmra.mrb[10].mxu0 %v28849_v29  ;;  %27382 = vmatprep.subr.bf16.mxu1 %v32100_v8 }
 0x159   :  { %27348 = vmatpush3.bf16.msra.mxu0 %v29775_v40  ;;  %25077 = vmatprep.mubr.msk.f32.mxu0 %vm28717_vm0, %v32072_v55 }
 0x15a   :  { %27349 = vmatprep.subr.bf16.mxu0 %v32100_v8  ;;  %25133 = vmatmul.mubr.f32.vlgmr.msra.gmra.mrb[10].mxu1 %v28849_v29  ;;  %v32160_v29 = vand.u32 4294901760, %v29759_v39  ;;  %v32165_v39 = vand.u32 4294901760, %v29784_v45 }
 0x15b   :  { %27384 = vmatpush3.bf16.msra.mxu1 %v29797_v1  ;;  %25143 = vmatprep.mubr.msk.f32.mxu1 %vm28717_vm0, %v32072_v55 }
 0x15c   :  { %27385 = vmatprep.subr.bf16.mxu1 %v32100_v8  ;;  %v29919_v63 = vpack.c.bf16 %v32161_v36, %v32160_v29  ;;  %v29939_v61 = vpack.c.bf16 %v32165_v39, %v32164_v41  ;;  %v32186_v29 = vld [vmem:[#allocation35_spill] sm:$0xff]  ;;  %v32187_v36 = vld [vmem:[#allocation36_spill] sm:$0xff] }
 0x15d   :  { %27351 = vmatpush3.bf16.msra.mxu0 %v29799_v44  ;;  %v32191_v41 = vld [vmem:[#allocation40_spill] sm:$0xff] }
 0x15e   :  { %27352 = vmatprep.subr.bf16.mxu0 %v32100_v8 }
 0x15f   :  { %27387 = vmatpush3.bf16.msra.mxu1 %v29823_v18 }
 0x160   :  { %25078 = vmatmul.mubr.f32.vlgmr.msra.gmra.mrb[10].mxu0 %v28863_v37  ;;  %27388 = vmatprep.subr.bf16.mxu1 %v32100_v8 }
 0x161   :  { %27354 = vmatpush3.bf16.msra.mxu0 %v29910_v12  ;;  %25088 = vmatprep.mubr.msk.f32.mxu0 %vm28717_vm0, %v32072_v55 }
 0x162   :  { %27355 = vmatprep.subr.bf16.mxu0 %v32100_v8  ;;  %25144 = vmatmul.mubr.f32.vlgmr.msra.gmra.mrb[10].mxu1 %v28863_v37  ;;  %v29951_v37 = vsub.f32 %v6107_v35, %v29943_v38  ;;  %v32190_v35 = vld [vmem:[#allocation39_spill] sm:$0xff] }
 0x163   :  { %27390 = vmatpush3.bf16.msra.mxu1 %v29919_v63  ;;  %25154 = vmatprep.mubr.msk.f32.mxu1 %vm28717_vm0, %v32072_v55 }
 0x164   :  { %27391 = vmatprep.subr.bf16.mxu1 %v32100_v8  ;;  %v29963_v45 = vand.u32 4294901760, %v29951_v37 }
 0x165   :  { %27357 = vmatpush3.bf16.msra.mxu0 %v29927_v49 }
 0x166   :  { %27358 = vmatprep.subr.bf16.mxu0 %v32100_v8  ;;  %v6181_v46 = vsub.f32 %v29951_v37, %v29963_v45 }
 0x167   :  { %27393 = vmatpush3.bf16.msra.mxu1 %v29939_v61 }
 0x168   :  { %25089 = vmatmul.mubr.f32.vlgmr.msra.gmra.mrb[10].mxu0 %v28833_v23  ;;  %27394 = vmatprep.subr.bf16.mxu1 %v32100_v8  ;;  %v29981_v15 = vand.u32 4294901760, %v6181_v46  ;;  %v32192_v46 = vld [vmem:[#allocation41_spill] sm:$0xff] }
 0x169   :  { %27360 = vmatpush3.bf16.msra.mxu0 %v29775_v40  ;;  %25099 = vmatprep.mubr.msk.f32.mxu0 %vm28717_vm0, %v32072_v55 }
 0x16a   :  { %27361 = vmatprep.subr.bf16.mxu0 %v32100_v8  ;;  %25155 = vmatmul.mubr.f32.vlgmr.msra.gmra.mrb[10].mxu1 %v28833_v23 }
 0x16b   :  { %27396 = vmatpush3.bf16.msra.mxu1 %v29797_v1  ;;  %25165 = vmatprep.mubr.msk.f32.mxu1 %vm28717_vm0, %v32072_v55 }
 0x16c   :  { %27397 = vmatprep.subr.bf16.mxu1 %v32100_v8 }
 0x16d   :  { %27363 = vmatpush3.bf16.msra.mxu0 %v29799_v44 }
 0x16e   :  { %27400 = vmatprep.subr.bf16.mxu0 %v32100_v8 }
 0x16f   :  { %27399 = vmatpush3.bf16.msra.mxu1 %v29823_v18 }
 0x170   :  { %25100 = vmatmul.mubr.f32.vlgmr.msra.gmra.mrb[10].mxu0 %v28833_v23  ;;  %27436 = vmatprep.subr.bf16.mxu1 %v32100_v8 }
 0x171   :  { %27402 = vmatpush3.bf16.msra.mxu0 %v28826_v17  ;;  %25176 = vmatprep.mubr.msk.f32.mxu0 %vm28717_vm0, %v32072_v55 }
 0x172   :  { %27403 = vmatprep.subr.bf16.mxu0 %v32100_v8  ;;  %25166 = vmatmul.mubr.f32.vlgmr.msra.gmra.mrb[10].mxu1 %v28833_v23 }
 0x173   :  { %27438 = vmatpush3.bf16.msra.mxu1 %v28829_v21  ;;  %25242 = vmatprep.mubr.msk.f32.mxu1 %vm28717_vm0, %v32072_v55 }
 0x174   :  { %27439 = vmatprep.subr.bf16.mxu1 %v32100_v8 }
 0x175   :  { %27405 = vmatpush3.bf16.msra.mxu0 %v28831_v22 }
 0x176   :  { %27406 = vmatprep.subr.bf16.mxu0 %v32100_v8 }
 0x177   :  { %27441 = vmatpush3.bf16.msra.mxu1 %v28838_v25 }
 0x178   :  { %25177 = vmatmul.mubr.f32.vlgmr.msra.gmra.mrb[12].mxu0 %v29981_v15  ;;  %27442 = vmatprep.subr.bf16.mxu1 %v32100_v8 }
 0x179   :  { %27408 = vmatpush3.bf16.msra.mxu0 %v28899_v57  ;;  %25187 = vmatprep.mubr.msk.f32.mxu0 %vm28717_vm0, %v32072_v55 }
 0x17a   :  { %27409 = vmatprep.subr.bf16.mxu0 %v32100_v8  ;;  %25243 = vmatmul.mubr.f32.vlgmr.msra.gmra.mrb[12].mxu1 %v29981_v15 }
 0x17b   :  { %27444 = vmatpush3.bf16.msra.mxu1 %v28901_v58  ;;  %25253 = vmatprep.mubr.msk.f32.mxu1 %vm28717_vm0, %v32072_v55 }
 0x17c   :  { %27445 = vmatprep.subr.bf16.mxu1 %v32100_v8 }
 0x17d   :  { %27411 = vmatpush3.bf16.msra.mxu0 %v28908_v60 }
 0x17e   :  { %27412 = vmatprep.subr.bf16.mxu0 %v32100_v8 }
 0x17f   :  { %27447 = vmatpush3.bf16.msra.mxu1 %v28922_v3  ;;  %v32167_v3 = vld [vmem:[#allocation16_spill] sm:$0xff] }
 0x180   :  { %25188 = vmatmul.mubr.f32.vlgmr.msra.gmra.mrb[12].mxu0 %v29943_v38  ;;  %27448 = vmatprep.subr.bf16.mxu1 %v32100_v8 }
 0x181   :  { %27414 = vmatpush3.bf16.msra.mxu0 %v28920_v2  ;;  %25198 = vmatprep.mubr.msk.f32.mxu0 %vm28717_vm0, %v32072_v55  ;;  %v32166_v2 = vld [vmem:[#allocation15_spill] sm:$0xff] }
 0x182   :  { %27415 = vmatprep.subr.bf16.mxu0 %v32100_v8  ;;  %25254 = vmatmul.mubr.f32.vlgmr.msra.gmra.mrb[12].mxu1 %v29943_v38 }
 0x183   :  { %v30008_v23 = vpop.f32.mrb[2].mxu0  ;;  %27450 = vmatpush3.bf16.msra.mxu1 %v28929_v4  ;;  %25264 = vmatprep.mubr.msk.f32.mxu1 %vm28717_vm0, %v32072_v55  ;;  %v32168_v4 = vld [vmem:[#allocation17_spill] sm:$0xff] }
 0x184   :  { %v24573_v57 = vpop.f32.mrb[3].mxu0  ;;  %27451 = vmatprep.subr.bf16.mxu1 %v32100_v8 }
 0x185   :  { %27417 = vmatpush3.bf16.msra.mxu0 %v28935_v5  ;;  %v30015_v58 = vpop.f32.mrb[2].mxu1  ;;  %v32169_v5 = vld [vmem:[#allocation18_spill] sm:$0xff] }
 0x186   :  { %27418 = vmatprep.subr.bf16.mxu0 %v32100_v8  ;;  %v24639_v60 = vpop.f32.mrb[3].mxu1 }
 0x187   :  { %27453 = vmatpush3.bf16.msra.mxu1 %v28944_v6  ;;  %v32170_v6 = vld [vmem:[#allocation19_spill] sm:$0xff]  ;;  %v32193_v60 = vld [vmem:[#allocation42_spill] sm:$0xff] }
 0x188   :  { %25199 = vmatmul.mubr.f32.vlgmr.msra.gmra.mrb[12].mxu0 %v29951_v37  ;;  %27454 = vmatprep.subr.bf16.mxu1 %v32100_v8 }
 0x189   :  { %27420 = vmatpush3.bf16.msra.mxu0 %v28826_v17  ;;  %25209 = vmatprep.mubr.msk.f32.mxu0 %vm28717_vm0, %v32072_v55 }
 0x18a   :  { %27421 = vmatprep.subr.bf16.mxu0 %v32100_v8  ;;  %25265 = vmatmul.mubr.f32.vlgmr.msra.gmra.mrb[12].mxu1 %v29951_v37 }
 0x18b   :  { %27456 = vmatpush3.bf16.msra.mxu1 %v28829_v21  ;;  %25275 = vmatprep.mubr.msk.f32.mxu1 %vm28717_vm0, %v32072_v55 }
 0x18c   :  { %27457 = vmatprep.subr.bf16.mxu1 %v32100_v8 }
 0x18d   :  { %27423 = vmatpush3.bf16.msra.mxu0 %v28831_v22 }
 0x18e   :  { %27424 = vmatprep.subr.bf16.mxu0 %v32100_v8 }
 0x18f   :  { %27459 = vmatpush3.bf16.msra.mxu1 %v28838_v25 }
 0x190   :  { %25210 = vmatmul.mubr.f32.vlgmr.msra.gmra.mrb[12].mxu0 %v29963_v45  ;;  %27460 = vmatprep.subr.bf16.mxu1 %v32100_v8 }
 0x191   :  { %27426 = vmatpush3.bf16.msra.mxu0 %v28968_v7  ;;  %25220 = vmatprep.mubr.msk.f32.mxu0 %vm28717_vm0, %v32072_v55  ;;  %v32171_v7 = vld [vmem:[#allocation20_spill] sm:$0xff] }
 0x192   :  { %27427 = vmatprep.subr.bf16.mxu0 %v32100_v8  ;;  %25276 = vmatmul.mubr.f32.vlgmr.msra.gmra.mrb[12].mxu1 %v29963_v45 }
 0x193   :  { %27462 = vmatpush3.bf16.msra.mxu1 %v28977_v10  ;;  %25286 = vmatprep.mubr.msk.f32.mxu1 %vm28717_vm0, %v32072_v55  ;;  %v32172_v10 = vld [vmem:[#allocation21_spill] sm:$0xff] }
 0x194   :  { %27463 = vmatprep.subr.bf16.mxu1 %v32100_v8 }
 0x195   :  { %27429 = vmatpush3.bf16.msra.mxu0 %v28985_v11  ;;  %v32173_v11 = vld [vmem:[#allocation22_spill] sm:$0xff] }
 0x196   :  { %27430 = vmatprep.subr.bf16.mxu0 %v32100_v8 }
 0x197   :  { %27465 = vmatpush3.bf16.msra.mxu1 %v28994_v19  ;;  %v32174_v19 = vld [vmem:[#allocation23_spill] sm:$0xff] }
 0x198   :  { %25221 = vmatmul.mubr.f32.vlgmr.msra.gmra.mrb[12].mxu0 %v29943_v38  ;;  %27466 = vmatprep.subr.bf16.mxu1 %v32100_v8 }
 0x199   :  { %27432 = vmatpush3.bf16.msra.mxu0 %v28826_v17  ;;  %25231 = vmatprep.mubr.msk.f32.mxu0 %vm28717_vm0, %v32072_v55 }
 0x19a   :  { %27433 = vmatprep.subr.bf16.mxu0 %v32100_v8  ;;  %25287 = vmatmul.mubr.f32.vlgmr.msra.gmra.mrb[12].mxu1 %v29943_v38 }
 0x19b   :  { %27468 = vmatpush3.bf16.msra.mxu1 %v28829_v21  ;;  %25297 = vmatprep.mubr.msk.f32.mxu1 %vm28717_vm0, %v32072_v55 }
 0x19c   :  { %27469 = vmatprep.subr.bf16.mxu1 %v32100_v8 }
 0x19d   :  { %27435 = vmatpush3.bf16.msra.mxu0 %v28831_v22 }
 0x19e   :  { %27472 = vmatprep.subr.bf16.mxu0 %v32100_v8 }
 0x19f   :  { %27471 = vmatpush3.bf16.msra.mxu1 %v28838_v25 }
 0x1a0   :  { %25232 = vmatmul.mubr.f32.vlgmr.msra.gmra.mrb[12].mxu0 %v29943_v38  ;;  %27508 = vmatprep.subr.bf16.mxu1 %v32100_v8 }
 0x1a1   :  { %27474 = vmatpush3.bf16.msra.mxu0 %v29023_v42  ;;  %25308 = vmatprep.mubr.msk.f32.mxu0 %vm28717_vm0, %v32072_v55 }
 0x1a2   :  { %27475 = vmatprep.subr.bf16.mxu0 %v32100_v8  ;;  %25298 = vmatmul.mubr.f32.vlgmr.msra.gmra.mrb[12].mxu1 %v29943_v38 }
 0x1a3   :  { %27510 = vmatpush3.bf16.msra.mxu1 %v29045_v51  ;;  %25374 = vmatprep.mubr.msk.f32.mxu1 %vm28717_vm0, %v32072_v55 }
 0x1a4   :  { %27511 = vmatprep.subr.bf16.mxu1 %v32100_v8 }
 0x1a5   :  { %27477 = vmatpush3.bf16.msra.mxu0 %v29047_v52 }
 0x1a6   :  { %27478 = vmatprep.subr.bf16.mxu0 %v32100_v8 }
 0x1a7   :  { %27513 = vmatpush3.bf16.msra.mxu1 %v29071_v9 }
 0x1a8   :  { %25309 = vmatmul.mubr.f32.vlgmr.msra.gmra.mrb[14].mxu0 %v29981_v15  ;;  %27514 = vmatprep.subr.bf16.mxu1 %v32100_v8 }
 0x1a9   :  { %27480 = vmatpush3.bf16.msra.mxu0 %v29084_v16  ;;  %25319 = vmatprep.mubr.msk.f32.mxu0 %vm28717_vm0, %v32072_v55  ;;  %v32177_v16 = vld [vmem:[#allocation26_spill] sm:$0xff] }
 0x1aa   :  { %27481 = vmatprep.subr.bf16.mxu0 %v32100_v8  ;;  %25375 = vmatmul.mubr.f32.vlgmr.msra.gmra.mrb[14].mxu1 %v29981_v15 }
 0x1ab   :  { %27516 = vmatpush3.bf16.msra.mxu1 %v29089_v24  ;;  %25385 = vmatprep.mubr.msk.f32.mxu1 %vm28717_vm0, %v32072_v55 }
 0x1ac   :  { %27517 = vmatprep.subr.bf16.mxu1 %v32100_v8 }
 0x1ad   :  { %27483 = vmatpush3.bf16.msra.mxu0 %v29093_v28 }
 0x1ae   :  { %27484 = vmatprep.subr.bf16.mxu0 %v32100_v8 }
 0x1af   :  { %27519 = vmatpush3.bf16.msra.mxu1 %v29100_v30  ;;  %v32178_v30 = vld [vmem:[#allocation27_spill] sm:$0xff] }
 0x1b0   :  { %25320 = vmatmul.mubr.f32.vlgmr.msra.gmra.mrb[14].mxu0 %v29943_v38  ;;  %27520 = vmatprep.subr.bf16.mxu1 %v32100_v8 }
 0x1b1   :  { %27486 = vmatpush3.bf16.msra.mxu0 %v29108_v33  ;;  %25330 = vmatprep.mubr.msk.f32.mxu0 %vm28717_vm0, %v32072_v55  ;;  %v32179_v33 = vld [vmem:[#allocation28_spill] sm:$0xff] }
 0x1b2   :  { %27487 = vmatprep.subr.bf16.mxu0 %v32100_v8  ;;  %25386 = vmatmul.mubr.f32.vlgmr.msra.gmra.mrb[14].mxu1 %v29943_v38 }
 0x1b3   :  { %v30096_v17 = vpop.f32.mrb[4].mxu0  ;;  %27522 = vmatpush3.bf16.msra.mxu1 %v29115_v34  ;;  %25396 = vmatprep.mubr.msk.f32.mxu1 %vm28717_vm0, %v32072_v55  ;;  %v32180_v34 = vld [vmem:[#allocation29_spill] sm:$0xff] }
 0x1b4   :  { %v24705_v21 = vpop.f32.mrb[5].mxu0  ;;  %27523 = vmatprep.subr.bf16.mxu1 %v32100_v8 }
 0x1b5   :  { %27489 = vmatpush3.bf16.msra.mxu0 %v29121_v47  ;;  %v30103_v22 = vpop.f32.mrb[4].mxu1  ;;  %v32181_v47 = vld [vmem:[#allocation30_spill] sm:$0xff] }
 0x1b6   :  { %27490 = vmatprep.subr.bf16.mxu0 %v32100_v8  ;;  %v24771_v25 = vpop.f32.mrb[5].mxu1 }
 0x1b7   :  { %27525 = vmatpush3.bf16.msra.mxu1 %v29130_v48  ;;  %v32182_v48 = vld [vmem:[#allocation31_spill] sm:$0xff] }
 0x1b8   :  { %25331 = vmatmul.mubr.f32.vlgmr.msra.gmra.mrb[14].mxu0 %v29951_v37  ;;  %27526 = vmatprep.subr.bf16.mxu1 %v32100_v8 }
 0x1b9   :  { %27492 = vmatpush3.bf16.msra.mxu0 %v29023_v42  ;;  %25341 = vmatprep.mubr.msk.f32.mxu0 %vm28717_vm0, %v32072_v55 }
 0x1ba   :  { %27493 = vmatprep.subr.bf16.mxu0 %v32100_v8  ;;  %25397 = vmatmul.mubr.f32.vlgmr.msra.gmra.mrb[14].mxu1 %v29951_v37 }
 0x1bb   :  { %27528 = vmatpush3.bf16.msra.mxu1 %v29045_v51  ;;  %25407 = vmatprep.mubr.msk.f32.mxu1 %vm28717_vm0, %v32072_v55 }
 0x1bc   :  { %27529 = vmatprep.subr.bf16.mxu1 %v32100_v8 }
 0x1bd   :  { %27495 = vmatpush3.bf16.msra.mxu0 %v29047_v52 }
 0x1be   :  { %27496 = vmatprep.subr.bf16.mxu0 %v32100_v8 }
 0x1bf   :  { %27531 = vmatpush3.bf16.msra.mxu1 %v29071_v9 }
 0x1c0   :  { %25342 = vmatmul.mubr.f32.vlgmr.msra.gmra.mrb[14].mxu0 %v29963_v45  ;;  %27532 = vmatprep.subr.bf16.mxu1 %v32100_v8 }
 0x1c1   :  { %27498 = vmatpush3.bf16.msra.mxu0 %v29154_v54  ;;  %25352 = vmatprep.mubr.msk.f32.mxu0 %vm28717_vm0, %v32072_v55  ;;  %v32183_v54 = vld [vmem:[#allocation32_spill] sm:$0xff] }
 0x1c2   :  { %27499 = vmatprep.subr.bf16.mxu0 %v32100_v8  ;;  %25408 = vmatmul.mubr.f32.vlgmr.msra.gmra.mrb[14].mxu1 %v29963_v45 }
 0x1c3   :  { %27534 = vmatpush3.bf16.msra.mxu1 %v29163_v62  ;;  %25418 = vmatprep.mubr.msk.f32.mxu1 %vm28717_vm0, %v32072_v55  ;;  %v32184_v62 = vld [vmem:[#allocation33_spill] sm:$0xff] }
 0x1c4   :  { %27535 = vmatprep.subr.bf16.mxu1 %v32100_v8 }
 0x1c5   :  { %27501 = vmatpush3.bf16.msra.mxu0 %v29171_v31  ;;  %v32185_v31 = vld [vmem:[#allocation34_spill] sm:$0xff] }
 0x1c6   :  { %27502 = vmatprep.subr.bf16.mxu0 %v32100_v8 }
 0x1c7   :  { %27537 = vmatpush3.bf16.msra.mxu1 %v32166_v2  ;;  %v32194_v2 = vld [vmem:[#allocation43_spill] sm:$0xff] }
 0x1c8   :  { %25353 = vmatmul.mubr.f32.vlgmr.msra.gmra.mrb[14].mxu0 %v29943_v38  ;;  %27538 = vmatprep.subr.bf16.mxu1 %v32100_v8 }
 0x1c9   :  { %27504 = vmatpush3.bf16.msra.mxu0 %v29023_v42  ;;  %25363 = vmatprep.mubr.msk.f32.mxu0 %vm28717_vm0, %v32072_v55  ;;  %v32175_v42 = vld [vmem:[#allocation24_spill] sm:$0xff] }
 0x1ca   :  { %27505 = vmatprep.subr.bf16.mxu0 %v32100_v8  ;;  %25419 = vmatmul.mubr.f32.vlgmr.msra.gmra.mrb[14].mxu1 %v29943_v38 }
 0x1cb   :  { %27540 = vmatpush3.bf16.msra.mxu1 %v29045_v51  ;;  %25429 = vmatprep.mubr.msk.f32.mxu1 %vm28717_vm0, %v32072_v55 }
 0x1cc   :  { %27541 = vmatprep.subr.bf16.mxu1 %v32100_v8 }
 0x1cd   :  { %27507 = vmatpush3.bf16.msra.mxu0 %v29047_v52  ;;  %v32176_v52 = vld [vmem:[#allocation25_spill] sm:$0xff] }
 0x1ce   :  { %27544 = vmatprep.subr.bf16.mxu0 %v32100_v8 }
 0x1cf   :  { %27543 = vmatpush3.bf16.msra.mxu1 %v29071_v9 }
 0x1d0   :  { %25364 = vmatmul.mubr.f32.vlgmr.msra.gmra.mrb[14].mxu0 %v29943_v38  ;;  %27580 = vmatprep.subr.bf16.mxu1 %v32100_v8 }
 0x1d1   :  { %27546 = vmatpush3.bf16.msra.mxu0 %v32167_v3  ;;  %25440 = vmatprep.mubr.msk.f32.mxu0 %vm28717_vm0, %v32072_v55 }
 0x1d2   :  { %27547 = vmatprep.subr.bf16.mxu0 %v32100_v8  ;;  %25430 = vmatmul.mubr.f32.vlgmr.msra.gmra.mrb[14].mxu1 %v29943_v38 }
 0x1d3   :  { %27582 = vmatpush3.bf16.msra.mxu1 %v32168_v4  ;;  %25506 = vmatprep.mubr.msk.f32.mxu1 %vm28717_vm0, %v32072_v55 }
 0x1d4   :  { %27583 = vmatprep.subr.bf16.mxu1 %v32100_v8 }
 0x1d5   :  { %27549 = vmatpush3.bf16.msra.mxu0 %v32169_v5 }
 0x1d6   :  { %27550 = vmatprep.subr.bf16.mxu0 %v32100_v8 }
 0x1d7   :  { %27585 = vmatpush3.bf16.msra.mxu1 %v32170_v6 }
 0x1d8   :  { %25441 = vmatmul.mubr.f32.vlgmr.msra.gmra.mrb[16].mxu0 %v29981_v15  ;;  %27586 = vmatprep.subr.bf16.mxu1 %v32100_v8 }
 0x1d9   :  { %27552 = vmatpush3.bf16.msra.mxu0 %v32171_v7  ;;  %25451 = vmatprep.mubr.msk.f32.mxu0 %vm28717_vm0, %v32072_v55  ;;  %v32199_v7 = vld [vmem:[#allocation48_spill] sm:$0xff] }
 0x1da   :  { %27553 = vmatprep.subr.bf16.mxu0 %v32100_v8  ;;  %25507 = vmatmul.mubr.f32.vlgmr.msra.gmra.mrb[16].mxu1 %v29981_v15 }
 0x1db   :  { %27588 = vmatpush3.bf16.msra.mxu1 %v32172_v10  ;;  %25517 = vmatprep.mubr.msk.f32.mxu1 %vm28717_vm0, %v32072_v55  ;;  %v32200_v10 = vld [vmem:[#allocation49_spill] sm:$0xff] }
 0x1dc   :  { %27589 = vmatprep.subr.bf16.mxu1 %v32100_v8 }
 0x1dd   :  { %27555 = vmatpush3.bf16.msra.mxu0 %v32173_v11  ;;  %v32201_v11 = vld [vmem:[#allocation50_spill] sm:$0xff] }
 0x1de   :  { %27556 = vmatprep.subr.bf16.mxu0 %v32100_v8 }
 0x1df   :  { %27591 = vmatpush3.bf16.msra.mxu1 %v32174_v19  ;;  %v32202_v19 = vld [vmem:[#allocation51_spill] sm:$0xff] }
 0x1e0   :  { %25452 = vmatmul.mubr.f32.vlgmr.msra.gmra.mrb[16].mxu0 %v29943_v38  ;;  %27592 = vmatprep.subr.bf16.mxu1 %v32100_v8 }
 0x1e1   :  { %27558 = vmatpush3.bf16.msra.mxu0 %v32175_v42  ;;  %25462 = vmatprep.mubr.msk.f32.mxu0 %vm28717_vm0, %v32072_v55  ;;  %v32203_v42 = vld [vmem:[#allocation52_spill] sm:$0xff] }
 0x1e2   :  { %27559 = vmatprep.subr.bf16.mxu0 %v32100_v8  ;;  %25518 = vmatmul.mubr.f32.vlgmr.msra.gmra.mrb[16].mxu1 %v29943_v38 }
 0x1e3   :  { %v30184_v51 = vpop.f32.mrb[6].mxu0  ;;  %27594 = vmatpush3.bf16.msra.mxu1 %v32176_v52  ;;  %25528 = vmatprep.mubr.msk.f32.mxu1 %vm28717_vm0, %v32072_v55  ;;  %v32204_v52 = vld [vmem:[#allocation53_spill] sm:$0xff] }
 0x1e4   :  { %v24837_v9 = vpop.f32.mrb[7].mxu0  ;;  %27595 = vmatprep.subr.bf16.mxu1 %v32100_v8 }
 0x1e5   :  { %27561 = vmatpush3.bf16.msra.mxu0 %v32177_v16  ;;  %v30191_v24 = vpop.f32.mrb[6].mxu1  ;;  %v32205_v9 = vld [vmem:[#allocation54_spill] sm:$0xff]  ;;  %v32206_v16 = vld [vmem:[#allocation55_spill] sm:$0xff] }
 0x1e6   :  { %27562 = vmatprep.subr.bf16.mxu0 %v32100_v8  ;;  %v24903_v28 = vpop.f32.mrb[7].mxu1 }
 0x1e7   :  { %27597 = vmatpush3.bf16.msra.mxu1 %v32178_v30  ;;  %v32207_v28 = vld [vmem:[#allocation56_spill] sm:$0xff] }
 0x1e8   :  { %25463 = vmatmul.mubr.f32.vlgmr.msra.gmra.mrb[16].mxu0 %v29951_v37  ;;  %27598 = vmatprep.subr.bf16.mxu1 %v32100_v8 }
 0x1e9   :  { %27564 = vmatpush3.bf16.msra.mxu0 %v32167_v3  ;;  %25473 = vmatprep.mubr.msk.f32.mxu0 %vm28717_vm0, %v32072_v55 }
 0x1ea   :  { %27565 = vmatprep.subr.bf16.mxu0 %v32100_v8  ;;  %25529 = vmatmul.mubr.f32.vlgmr.msra.gmra.mrb[16].mxu1 %v29951_v37 }
 0x1eb   :  { %27600 = vmatpush3.bf16.msra.mxu1 %v32168_v4  ;;  %25539 = vmatprep.mubr.msk.f32.mxu1 %vm28717_vm0, %v32072_v55 }
 0x1ec   :  { %27601 = vmatprep.subr.bf16.mxu1 %v32100_v8 }
 0x1ed   :  { %27567 = vmatpush3.bf16.msra.mxu0 %v32169_v5 }
 0x1ee   :  { %27568 = vmatprep.subr.bf16.mxu0 %v32100_v8 }
 0x1ef   :  { %27603 = vmatpush3.bf16.msra.mxu1 %v32170_v6 }
 0x1f0   :  { %25474 = vmatmul.mubr.f32.vlgmr.msra.gmra.mrb[16].mxu0 %v29963_v45  ;;  %27604 = vmatprep.subr.bf16.mxu1 %v32100_v8 }
 0x1f1   :  { %27570 = vmatpush3.bf16.msra.mxu0 %v32179_v33  ;;  %25484 = vmatprep.mubr.msk.f32.mxu0 %vm28717_vm0, %v32072_v55  ;;  %v32208_v33 = vld [vmem:[#allocation57_spill] sm:$0xff] }
 0x1f2   :  { %27571 = vmatprep.subr.bf16.mxu0 %v32100_v8  ;;  %25540 = vmatmul.mubr.f32.vlgmr.msra.gmra.mrb[16].mxu1 %v29963_v45 }
 0x1f3   :  { %27606 = vmatpush3.bf16.msra.mxu1 %v32180_v34  ;;  %25550 = vmatprep.mubr.msk.f32.mxu1 %vm28717_vm0, %v32072_v55 }
 0x1f4   :  { %27607 = vmatprep.subr.bf16.mxu1 %v32100_v8 }
 0x1f5   :  { %27573 = vmatpush3.bf16.msra.mxu0 %v32181_v47  ;;  %v32209_v47 = vld [vmem:[#allocation58_spill] sm:$0xff] }
 0x1f6   :  { %27574 = vmatprep.subr.bf16.mxu0 %v32100_v8 }
 0x1f7   :  { %27609 = vmatpush3.bf16.msra.mxu1 %v32182_v48 }
 0x1f8   :  { %25485 = vmatmul.mubr.f32.vlgmr.msra.gmra.mrb[16].mxu0 %v29943_v38  ;;  %27610 = vmatprep.subr.bf16.mxu1 %v32100_v8 }
 0x1f9   :  { %27576 = vmatpush3.bf16.msra.mxu0 %v32167_v3  ;;  %25495 = vmatprep.mubr.msk.f32.mxu0 %vm28717_vm0, %v32072_v55  ;;  %v32195_v3 = vld [vmem:[#allocation44_spill] sm:$0xff] }
 0x1fa   :  { %27577 = vmatprep.subr.bf16.mxu0 %v32100_v8  ;;  %25551 = vmatmul.mubr.f32.vlgmr.msra.gmra.mrb[16].mxu1 %v29943_v38 }
 0x1fb   :  { %27612 = vmatpush3.bf16.msra.mxu1 %v32168_v4  ;;  %25561 = vmatprep.mubr.msk.f32.mxu1 %vm28717_vm0, %v32072_v55  ;;  %v32196_v4 = vld [vmem:[#allocation45_spill] sm:$0xff] }
 0x1fc   :  { %27613 = vmatprep.subr.bf16.mxu1 %v32100_v8 }
 0x1fd   :  { %27579 = vmatpush3.bf16.msra.mxu0 %v32169_v5  ;;  %v32197_v5 = vld [vmem:[#allocation46_spill] sm:$0xff] }
 0x1fe   :  { %27616 = vmatprep.subr.bf16.mxu0 %v32100_v8 }
 0x1ff   :  { %27615 = vmatpush3.bf16.msra.mxu1 %v32170_v6  ;;  %v32198_v6 = vld [vmem:[#allocation47_spill] sm:$0xff] }
 0x200   :  { %25496 = vmatmul.mubr.f32.vlgmr.msra.gmra.mrb[16].mxu0 %v29943_v38  ;;  %27652 = vmatprep.subr.bf16.mxu1 %v32100_v8 }
 0x201   :  { %27618 = vmatpush3.bf16.msra.mxu0 %v32183_v54  ;;  %25572 = vmatprep.mubr.msk.f32.mxu0 %vm28717_vm0, %v32072_v55 }
 0x202   :  { %27619 = vmatprep.subr.bf16.mxu0 %v32100_v8  ;;  %25562 = vmatmul.mubr.f32.vlgmr.msra.gmra.mrb[16].mxu1 %v29943_v38 }
 0x203   :  { %27654 = vmatpush3.bf16.msra.mxu1 %v32184_v62  ;;  %25638 = vmatprep.mubr.msk.f32.mxu1 %vm28717_vm0, %v32072_v55 }
 0x204   :  { %27655 = vmatprep.subr.bf16.mxu1 %v32100_v8 }
 0x205   :  { %27621 = vmatpush3.bf16.msra.mxu0 %v32185_v31 }
 0x206   :  { %27622 = vmatprep.subr.bf16.mxu0 %v32100_v8 }
 0x207   :  { %27657 = vmatpush3.bf16.msra.mxu1 %v32186_v29 }
 0x208   :  { %25573 = vmatmul.mubr.f32.vlgmr.msra.gmra.mrb[18].mxu0 %v29981_v15  ;;  %27658 = vmatprep.subr.bf16.mxu1 %v32100_v8 }
 0x209   :  { %27624 = vmatpush3.bf16.msra.mxu0 %v32187_v36  ;;  %25583 = vmatprep.mubr.msk.f32.mxu0 %vm28717_vm0, %v32072_v55  ;;  %v32213_v36 = vld [vmem:[#allocation62_spill] sm:$0xff] }
 0x20a   :  { %27625 = vmatprep.subr.bf16.mxu0 %v32100_v8  ;;  %25639 = vmatmul.mubr.f32.vlgmr.msra.gmra.mrb[18].mxu1 %v29981_v15 }
 0x20b   :  { %27660 = vmatpush3.bf16.msra.mxu1 %v32188_v14  ;;  %25649 = vmatprep.mubr.msk.f32.mxu1 %vm28717_vm0, %v32072_v55  ;;  %v32214_v14 = vld [vmem:[#allocation63_spill] sm:$0xff] }
 0x20c   :  { %27661 = vmatprep.subr.bf16.mxu1 %v32100_v8 }
 0x20d   :  { %27627 = vmatpush3.bf16.msra.mxu0 %v32189_v20  ;;  %v28719_v20 = vmov 1966171168  }
 0x20e   :  { %27628 = vmatprep.subr.bf16.mxu0 %v32100_v8 }
 0x20f   :  { %27663 = vmatpush3.bf16.msra.mxu1 %v32190_v35  ;;  %v151_v35 = vunpack.c.l.s4 %v28719_v20 }
 0x210   :  { %25584 = vmatmul.mubr.f32.vlgmr.msra.gmra.mrb[18].mxu0 %v29943_v38  ;;  %27664 = vmatprep.subr.bf16.mxu1 %v32100_v8 }
 0x211   :  { %27630 = vmatpush3.bf16.msra.mxu0 %v32191_v41  ;;  %25594 = vmatprep.mubr.msk.f32.mxu0 %vm28717_vm0, %v32072_v55  ;;  %v153_v41 = vlaneseq }
 0x212   :  { %27631 = vmatprep.subr.bf16.mxu0 %v32100_v8  ;;  %25650 = vmatmul.mubr.f32.vlgmr.msra.gmra.mrb[18].mxu1 %v29943_v38 }
 0x213   :  { %v30272_v39 = vpop.f32.mrb[8].mxu0  ;;  %27666 = vmatpush3.bf16.msra.mxu1 %v32192_v46  ;;  %25660 = vmatprep.mubr.msk.f32.mxu1 %vm28717_vm0, %v32072_v55  ;;  %v152_v46 = vunpack.c.0.s8 %v151_v35 }
 0x214   :  { %v24969_v57 = vpop.f32.mrb[9].mxu0  ;;  %27667 = vmatprep.subr.bf16.mxu1 %v32100_v8 }
 0x215   :  { %27633 = vmatpush3.bf16.msra.mxu0 %v32193_v60  ;;  %v30279_v21 = vpop.f32.mrb[8].mxu1  ;;  %v154_v57 = vshrl.u32 %v153_v41, 7 }
 0x216   :  { %27634 = vmatprep.subr.bf16.mxu0 %v32100_v8  ;;  %v25035_v25 = vpop.f32.mrb[9].mxu1 }
 0x217   :  { %27669 = vmatpush3.bf16.msra.mxu1 %v32194_v2  ;;  %v30440_v60 = vsub.s32 %v152_v46, %v154_v57 }
 0x218   :  { %25595 = vmatmul.mubr.f32.vlgmr.msra.gmra.mrb[18].mxu0 %v29951_v37  ;;  %27670 = vmatprep.subr.bf16.mxu1 %v32100_v8 }
 0x219   :  { %27636 = vmatpush3.bf16.msra.mxu0 %v32183_v54  ;;  %25605 = vmatprep.mubr.msk.f32.mxu0 %vm28717_vm0, %v32072_v55 }
 0x21a   :  { %27637 = vmatprep.subr.bf16.mxu0 %v32100_v8  ;;  %25661 = vmatmul.mubr.f32.vlgmr.msra.gmra.mrb[18].mxu1 %v29951_v37 }
 0x21b   :  { %27672 = vmatpush3.bf16.msra.mxu1 %v32184_v62  ;;  %25671 = vmatprep.mubr.msk.f32.mxu1 %vm28717_vm0, %v32072_v55 }
 0x21c   :  { %27673 = vmatprep.subr.bf16.mxu1 %v32100_v8 }
 0x21d   :  { %27639 = vmatpush3.bf16.msra.mxu0 %v32185_v31 }
 0x21e   :  { %27640 = vmatprep.subr.bf16.mxu0 %v32100_v8 }
 0x21f   :  { %27675 = vmatpush3.bf16.msra.mxu1 %v32186_v29 }
 0x220   :  { %25606 = vmatmul.mubr.f32.vlgmr.msra.gmra.mrb[18].mxu0 %v29963_v45  ;;  %27676 = vmatprep.subr.bf16.mxu1 %v32100_v8 }
 0x221   :  { %27642 = vmatpush3.bf16.msra.mxu0 %v32195_v3  ;;  %25616 = vmatprep.mubr.msk.f32.mxu0 %vm28717_vm0, %v32072_v55 }
 0x222   :  { %27643 = vmatprep.subr.bf16.mxu0 %v32100_v8  ;;  %25672 = vmatmul.mubr.f32.vlgmr.msra.gmra.mrb[18].mxu1 %v29963_v45 }
 0x223   :  { %27678 = vmatpush3.bf16.msra.mxu1 %v32196_v4  ;;  %25682 = vmatprep.mubr.msk.f32.mxu1 %vm28717_vm0, %v32072_v55 }
 0x224   :  { %27679 = vmatprep.subr.bf16.mxu1 %v32100_v8 }
 0x225   :  { %27645 = vmatpush3.bf16.msra.mxu0 %v32197_v5  ;;  %v30465_v5 = vsub.s32 0, %v154_v57 }
 0x226   :  { %27646 = vmatprep.subr.bf16.mxu0 %v32100_v8 }
 0x227   :  { %27681 = vmatpush3.bf16.msra.mxu1 %v32198_v6 }
 0x228   :  { %25617 = vmatmul.mubr.f32.vlgmr.msra.gmra.mrb[18].mxu0 %v29943_v38  ;;  %27682 = vmatprep.subr.bf16.mxu1 %v32100_v8 }
 0x229   :  { %27648 = vmatpush3.bf16.msra.mxu0 %v32183_v54  ;;  %25627 = vmatprep.mubr.msk.f32.mxu0 %vm28717_vm0, %v32072_v55 }
 0x22a   :  { %27649 = vmatprep.subr.bf16.mxu0 %v32100_v8  ;;  %25683 = vmatmul.mubr.f32.vlgmr.msra.gmra.mrb[18].mxu1 %v29943_v38 }
 0x22b   :  { %27684 = vmatpush3.bf16.msra.mxu1 %v32184_v62  ;;  %25693 = vmatprep.mubr.msk.f32.mxu1 %vm28717_vm0, %v32072_v55  ;;  %v32210_v62 = vld [vmem:[#allocation59_spill] sm:$0xff] }
 0x22c   :  { %27685 = vmatprep.subr.bf16.mxu1 %v32100_v8 }
 0x22d   :  { %27651 = vmatpush3.bf16.msra.mxu0 %v32185_v31  ;;  %v32211_v31 = vld [vmem:[#allocation60_spill] sm:$0xff] }
 0x22e   :  { %27688 = vmatprep.subr.bf16.mxu0 %v32100_v8 }
 0x22f   :  { %27687 = vmatpush3.bf16.msra.mxu1 %v32186_v29  ;;  %v32212_v29 = vld [vmem:[#allocation61_spill] sm:$0xff] }
 0x230   :  { %25628 = vmatmul.mubr.f32.vlgmr.msra.gmra.mrb[18].mxu0 %v29943_v38  ;;  %27724 = vmatprep.subr.bf16.mxu1 %v32100_v8 }
 0x231   :  { %27690 = vmatpush3.bf16.msra.mxu0 %v32199_v7  ;;  %25704 = vmatprep.mubr.msk.f32.mxu0 %vm28717_vm0, %v32072_v55 }
 0x232   :  { %27691 = vmatprep.subr.bf16.mxu0 %v32100_v8  ;;  %25694 = vmatmul.mubr.f32.vlgmr.msra.gmra.mrb[18].mxu1 %v29943_v38 }
 0x233   :  { %27726 = vmatpush3.bf16.msra.mxu1 %v32200_v10  ;;  %25770 = vmatprep.mubr.msk.f32.mxu1 %vm28717_vm0, %v32072_v55 }
 0x234   :  { %27727 = vmatprep.subr.bf16.mxu1 %v32100_v8 }
 0x235   :  { %27693 = vmatpush3.bf16.msra.mxu0 %v32201_v11 }
 0x236   :  { %27694 = vmatprep.subr.bf16.mxu0 %v32100_v8 }
 0x237   :  { %27729 = vmatpush3.bf16.msra.mxu1 %v32202_v19 }
 0x238   :  { %25705 = vmatmul.mubr.f32.vlgmr.msra.gmra.mrb[20].mxu0 %v29981_v15  ;;  %27730 = vmatprep.subr.bf16.mxu1 %v32100_v8 }
 0x239   :  { %27696 = vmatpush3.bf16.msra.mxu0 %v32203_v42  ;;  %25715 = vmatprep.mubr.msk.f32.mxu0 %vm28717_vm0, %v32072_v55 }
 0x23a   :  { %27697 = vmatprep.subr.bf16.mxu0 %v32100_v8  ;;  %25771 = vmatmul.mubr.f32.vlgmr.msra.gmra.mrb[20].mxu1 %v29981_v15 }
 0x23b   :  { %27732 = vmatpush3.bf16.msra.mxu1 %v32204_v52  ;;  %25781 = vmatprep.mubr.msk.f32.mxu1 %vm28717_vm0, %v32072_v55 }
 0x23c   :  { %27733 = vmatprep.subr.bf16.mxu1 %v32100_v8 }
 0x23d   :  { %27699 = vmatpush3.bf16.msra.mxu0 %v32205_v9 }
 0x23e   :  { %27700 = vmatprep.subr.bf16.mxu0 %v32100_v8 }
 0x23f   :  { %27735 = vmatpush3.bf16.msra.mxu1 %v32206_v16 }
 0x240   :  { %25716 = vmatmul.mubr.f32.vlgmr.msra.gmra.mrb[20].mxu0 %v29943_v38  ;;  %27736 = vmatprep.subr.bf16.mxu1 %v32100_v8 }
 0x241   :  { %27702 = vmatpush3.bf16.msra.mxu0 %v32207_v28  ;;  %25726 = vmatprep.mubr.msk.f32.mxu0 %vm28717_vm0, %v32072_v55 }
 0x242   :  { %27703 = vmatprep.subr.bf16.mxu0 %v32100_v8  ;;  %25782 = vmatmul.mubr.f32.vlgmr.msra.gmra.mrb[20].mxu1 %v29943_v38 }
 0x243   :  { %v30360_v30 = vpop.f32.mrb[10].mxu0  ;;  %27738 = vmatpush3.bf16.msra.mxu1 %v32208_v33  ;;  %25792 = vmatprep.mubr.msk.f32.mxu1 %vm28717_vm0, %v32072_v55 }
 0x244   :  { %v25101_v34 = vpop.f32.mrb[11].mxu0  ;;  %27739 = vmatprep.subr.bf16.mxu1 %v32100_v8 }
 0x245   :  { %27705 = vmatpush3.bf16.msra.mxu0 %v32209_v47  ;;  %v30367_v48 = vpop.f32.mrb[10].mxu1 }
 0x246   :  { %27706 = vmatprep.subr.bf16.mxu0 %v32100_v8  ;;  %v25167_v54 = vpop.f32.mrb[11].mxu1 }
 0x247   :  { %27741 = vmatpush3.bf16.msra.mxu1 %v32210_v62 }
 0x248   :  { %25727 = vmatmul.mubr.f32.vlgmr.msra.gmra.mrb[20].mxu0 %v29951_v37  ;;  %27742 = vmatprep.subr.bf16.mxu1 %v32100_v8 }
 0x249   :  { %27708 = vmatpush3.bf16.msra.mxu0 %v32199_v7  ;;  %25737 = vmatprep.mubr.msk.f32.mxu0 %vm28717_vm0, %v32072_v55 }
 0x24a   :  { %27709 = vmatprep.subr.bf16.mxu0 %v32100_v8  ;;  %25793 = vmatmul.mubr.f32.vlgmr.msra.gmra.mrb[20].mxu1 %v29951_v37 }
 0x24b   :  { %27744 = vmatpush3.bf16.msra.mxu1 %v32200_v10  ;;  %25803 = vmatprep.mubr.msk.f32.mxu1 %vm28717_vm0, %v32072_v55 }
 0x24c   :  { %27745 = vmatprep.subr.bf16.mxu1 %v32100_v8 }
 0x24d   :  { %27711 = vmatpush3.bf16.msra.mxu0 %v32201_v11 }
 0x24e   :  { %27712 = vmatprep.subr.bf16.mxu0 %v32100_v8 }
 0x24f   :  { %27747 = vmatpush3.bf16.msra.mxu1 %v32202_v19 }
 0x250   :  { %25738 = vmatmul.mubr.f32.vlgmr.msra.gmra.mrb[20].mxu0 %v29963_v45  ;;  %27748 = vmatprep.subr.bf16.mxu1 %v32100_v8 }
 0x251   :  { %27714 = vmatpush3.bf16.msra.mxu0 %v32211_v31  ;;  %25748 = vmatprep.mubr.msk.f32.mxu0 %vm28717_vm0, %v32072_v55 }
 0x252   :  { %27715 = vmatprep.subr.bf16.mxu0 %v32100_v8  ;;  %25804 = vmatmul.mubr.f32.vlgmr.msra.gmra.mrb[20].mxu1 %v29963_v45 }
 0x253   :  { %27750 = vmatpush3.bf16.msra.mxu1 %v32212_v29  ;;  %25814 = vmatprep.mubr.msk.f32.mxu1 %vm28717_vm0, %v32072_v55 }
 0x254   :  { %27751 = vmatprep.subr.bf16.mxu1 %v32100_v8 }
 0x255   :  { %27717 = vmatpush3.bf16.msra.mxu0 %v32213_v36 }
 0x256   :  { %27718 = vmatprep.subr.bf16.mxu0 %v32100_v8 }
 0x257   :  { %27753 = vmatpush3.bf16.msra.mxu1 %v32214_v14 }
 0x258   :  { %25749 = vmatmul.mubr.f32.vlgmr.msra.gmra.mrb[20].mxu0 %v29943_v38  ;;  %27754 = vmatprep.subr.bf16.mxu1 %v32100_v8 }
 0x259   :  { %27720 = vmatpush3.bf16.msra.mxu0 %v32199_v7  ;;  %25759 = vmatprep.mubr.msk.f32.mxu0 %vm28717_vm0, %v32072_v55 }
 0x25a   :  { %27721 = vmatprep.subr.bf16.mxu0 %v32100_v8  ;;  %25815 = vmatmul.mubr.f32.vlgmr.msra.gmra.mrb[20].mxu1 %v29943_v38 }
 0x25b   :  { %27756 = vmatpush3.bf16.msra.mxu1 %v32200_v10  ;;  %25825 = vmatprep.mubr.msk.f32.mxu1 %vm28717_vm0, %v32072_v55 }
 0x25c   :  { %27757 = vmatprep.subr.bf16.mxu1 %v32100_v8 }
 0x25d   :  { %27723 = vmatpush3.bf16.msra.mxu0 %v32201_v11 }
 0x25e   :  { %27760 = vmatprep.subr.bf16.mxu0 %v32100_v8 }
 0x25f   :  { %27759 = vmatpush3.bf16.msra.mxu1 %v32202_v19 }
 0x260   :  { %25760 = vmatmul.mubr.f32.vlgmr.msra.gmra.mrb[20].mxu0 %v29943_v38  ;;  %27796 = vmatprep.subr.bf16.mxu1 %v32100_v8 }
 0x261   :  { %27762 = vmatpush3.bf16.msra.mxu0 %v29775_v40  ;;  %25836 = vmatprep.mubr.msk.f32.mxu0 %vm28717_vm0, %v32072_v55 }
 0x262   :  { %27763 = vmatprep.subr.bf16.mxu0 %v32100_v8  ;;  %25826 = vmatmul.mubr.f32.vlgmr.msra.gmra.mrb[20].mxu1 %v29943_v38 }
 0x263   :  { %27798 = vmatpush3.bf16.msra.mxu1 %v29797_v1  ;;  %25902 = vmatprep.mubr.msk.f32.mxu1 %vm28717_vm0, %v32072_v55 }
 0x264   :  { %27799 = vmatprep.subr.bf16.mxu1 %v32100_v8 }
 0x265   :  { %27765 = vmatpush3.bf16.msra.mxu0 %v29799_v44 }
 0x266   :  { %27766 = vmatprep.subr.bf16.mxu0 %v32100_v8 }
 0x267   :  { %27801 = vmatpush3.bf16.msra.mxu1 %v29823_v18 }
 0x268   :  { %25837 = vmatmul.mubr.f32.vlgmr.msra.gmra.mrb[22].mxu0 %v29981_v15  ;;  %27802 = vmatprep.subr.bf16.mxu1 %v32100_v8 }
 0x269   :  { %27768 = vmatpush3.bf16.msra.mxu0 %v29836_v32  ;;  %25847 = vmatprep.mubr.msk.f32.mxu0 %vm28717_vm0, %v32072_v55  ;;  %v142_v32 = vld [vmem:[#allocation8] sm:$0xff] }
 0x26a   :  { %27769 = vmatprep.subr.bf16.mxu0 %v32100_v8  ;;  %25903 = vmatmul.mubr.f32.vlgmr.msra.gmra.mrb[22].mxu1 %v29981_v15  ;;  %v149_v25 = vcombine.high %v142_v32, %v142_v32 }
 0x26b   :  { %27804 = vmatpush3.bf16.msra.mxu1 %v29841_v27  ;;  %25913 = vmatprep.mubr.msk.f32.mxu1 %vm28717_vm0, %v32072_v55 }
 0x26c   :  { %27805 = vmatprep.subr.bf16.mxu1 %v32100_v8  ;;  %v163_v15 = vrot.slane %v149_v25, %v30440_v60 }
 0x26d   :  { %27771 = vmatpush3.bf16.msra.mxu0 %v29845_v0  ;;  %v156_v0 = vrot.slane %v142_v32, %v30440_v60 }
 0x26e   :  { %27772 = vmatprep.subr.bf16.mxu0 %v32100_v8  ;;  %v30470_v6 = vrot.slane %v163_v15, %v30440_v60 }
 0x26f   :  { %27807 = vmatpush3.bf16.msra.mxu1 %v29852_v56  ;;  %v164_v2 = vcombine.high %v156_v0, %v156_v0  ;;  %v30463_v4 = vrot.slane %v156_v0, %v30440_v60 }
 0x270   :  { %25848 = vmatmul.mubr.f32.vlgmr.msra.gmra.mrb[22].mxu0 %v29943_v38  ;;  %27808 = vmatprep.subr.bf16.mxu1 %v32100_v8  ;;  %v30493_v10 = vrot.slane %v30470_v6, %v30465_v5  ;;  %v195_v41 = vcombine.high %v30470_v6, %v30470_v6 }
 0x271   :  { %27774 = vmatpush3.bf16.msra.mxu0 %v29860_v26  ;;  %25858 = vmatprep.mubr.msk.f32.mxu0 %vm28717_vm0, %v32072_v55  ;;  %v194_v35 = vcombine.high %v30463_v4, %v30463_v4 }
 0x272   :  { %27775 = vmatprep.subr.bf16.mxu0 %v32100_v8  ;;  %25914 = vmatmul.mubr.f32.vlgmr.msra.gmra.mrb[22].mxu1 %v29943_v38  ;;  %v28124_v42 = vadd.f32 %v30096_v17, %v30493_v10 }
 0x273   :  { %v30451_v27 = vpop.f32.mrb[12].mxu0  ;;  %27810 = vmatpush3.bf16.msra.mxu1 %v29867_v53  ;;  %25924 = vmatprep.mubr.msk.f32.mxu1 %vm28717_vm0, %v32072_v55  ;;  %v165_v53 = vcombine.high %v163_v15, %v163_v15  ;;  %v30623_v0 = vrot.slane %v194_v35, %v30465_v5  ;;  %v30627_v15 = vrot.slane %v195_v41, %v30465_v5 }
 0x274   :  { %v25233_v56 = vpop.f32.mrb[13].mxu0  ;;  %27811 = vmatprep.subr.bf16.mxu1 %v32100_v8 }
 0x275   :  { %27777 = vmatpush3.bf16.msra.mxu0 %v29873_v50  ;;  %v30459_v26 = vpop.f32.mrb[12].mxu1  ;;  %v30478_v50 = vrot.slane %v164_v2, %v30440_v60  ;;  %v30486_v7 = vrot.slane %v165_v53, %v30440_v60 }
 0x276   :  { %27778 = vmatprep.subr.bf16.mxu0 %v32100_v8  ;;  %v25299_v3 = vpop.f32.mrb[13].mxu1 }
 0x277   :  { %27813 = vmatpush3.bf16.msra.mxu1 %v29884_v13  ;;  %v30483_v13 = vrot.slane %v30463_v4, %v30465_v5  ;;  %v30506_v19 = vrot.slane %v30486_v7, %v30465_v5  ;;  %v196_v57 = vcombine.high %v30478_v50, %v30478_v50  ;;  %v197_v25 = vcombine.high %v30486_v7, %v30486_v7 }
 0x278   :  { %25859 = vmatmul.mubr.f32.vlgmr.msra.gmra.mrb[22].mxu0 %v29951_v37  ;;  %27814 = vmatprep.subr.bf16.mxu1 %v32100_v8  ;;  %v28122_v3 = vadd.f32 %v30008_v23, %v30623_v0  ;;  %v28126_v4 = vadd.f32 %v30184_v51, %v30627_v15 }
 0x279   :  { %27780 = vmatpush3.bf16.msra.mxu0 %v29775_v40  ;;  %25869 = vmatprep.mubr.msk.f32.mxu0 %vm28717_vm0, %v32072_v55  ;;  %v28120_v11 = vadd.f32 %v29879_v59, %v30483_v13  ;;  %v28125_v9 = vadd.f32 %v30103_v22, %v30506_v19  ;;  %v30633_v56 = vrot.slane %v196_v57, %v30465_v5 }
 0x27a   :  { %27781 = vmatprep.subr.bf16.mxu0 %v32100_v8  ;;  %25925 = vmatmul.mubr.f32.vlgmr.msra.gmra.mrb[22].mxu1 %v29951_v37  ;;  %v30500_v37 = vrot.slane %v30478_v50, %v30465_v5  ;;  %v30637_v2 = vrot.slane %v197_v25, %v30465_v5  ;;  %v12834_v50 = vsel %vm282_vm1, %v28122_v3, 0  ;;  %v12837_v23 = vsel %vm282_vm1, %v28126_v4, 0 }
 0x27b   :  { %27816 = vmatpush3.bf16.msra.mxu1 %v29797_v1  ;;  %25935 = vmatprep.mubr.msk.f32.mxu1 %vm28717_vm0, %v32072_v55  ;;  %v11930_v52 = vsel %vm282_vm1, %v28120_v11, 0  ;;  %v12385_v22 = vsel %vm282_vm1, %v28125_v9, 0  ;;  %v28123_v53 = vadd.f32 %v30015_v58, %v30633_v56  ;;  %v30662_v58 = vand.u32 4294901760, %v12834_v50 }
 0x27c   :  { %27817 = vmatprep.subr.bf16.mxu1 %v32100_v8  ;;  %v28121_v59 = vadd.f32 %v29890_v43, %v30500_v37  ;;  %v30530_v43 = vand.u32 4294901760, %v11930_v52  ;;  %v30548_v16 = vand.u32 4294901760, %v12385_v22  ;;  %v28127_v6 = vadd.f32 %v30191_v24, %v30637_v2 }
 0x27d   :  { %27783 = vmatpush3.bf16.msra.mxu0 %v29799_v44  ;;  %v13286_v51 = vsel %vm282_vm1, %v28123_v53, 0  ;;  %v30667_v7 = vand.u32 4294901760, %v12837_v23 }
 0x27e   :  { %27784 = vmatprep.subr.bf16.mxu0 %v32100_v8  ;;  %v30565_v33 = vsub.f32 %v12385_v22, %v30548_v16  ;;  %v13289_v24 = vsel %vm282_vm1, %v28127_v6, 0  ;;  %v30673_v11 = vand.u32 4294901760, %v13286_v51 }
 0x27f   :  { %27819 = vmatpush3.bf16.msra.mxu1 %v29823_v18 }
 0x280   :  { %25870 = vmatmul.mubr.f32.vlgmr.msra.gmra.mrb[22].mxu0 %v29963_v45  ;;  %27820 = vmatprep.subr.bf16.mxu1 %v32100_v8  ;;  %v30686_v9 = vsub.f32 %v13286_v51, %v30673_v11 }
 0x281   :  { %27786 = vmatpush3.bf16.msra.mxu0 %v29910_v12  ;;  %25880 = vmatprep.mubr.msk.f32.mxu0 %vm28717_vm0, %v32072_v55  ;;  %v11933_v12 = vsel %vm282_vm1, %v28124_v42, 0  ;;  %v30676_v42 = vand.u32 4294901760, %v13289_v24 }
 0x282   :  { %27787 = vmatprep.subr.bf16.mxu0 %v32100_v8  ;;  %25936 = vmatmul.mubr.f32.vlgmr.msra.gmra.mrb[22].mxu1 %v29963_v45  ;;  %v12382_v45 = vsel %vm282_vm1, %v28121_v59, 0  ;;  %v30533_v17 = vand.u32 4294901760, %v11933_v12  ;;  %v30679_v59 = vsub.f32 %v12834_v50, %v30662_v58 }
 0x283   :  { %27822 = vmatpush3.bf16.msra.mxu1 %v29919_v63  ;;  %25946 = vmatprep.mubr.msk.f32.mxu1 %vm28717_vm0, %v32072_v55  ;;  %v30540_v63 = vand.u32 4294901760, %v12382_v45 }
 0x284   :  { %27823 = vmatprep.subr.bf16.mxu1 %v32100_v8 }
 0x285   :  { %27789 = vmatpush3.bf16.msra.mxu0 %v29927_v49  ;;  %v30546_v49 = vsub.f32 %v11930_v52, %v30530_v43  ;;  %v30682_v52 = vsub.f32 %v12837_v23, %v30667_v7 }
 0x286   :  { %27790 = vmatprep.subr.bf16.mxu0 %v32100_v8 }
 0x287   :  { %27825 = vmatpush3.bf16.msra.mxu1 %v29939_v61  ;;  %v30552_v61 = vsub.f32 %v11933_v12, %v30533_v17  ;;  %v12003_v28 = vand.u32 4294901760, %v30546_v49  ;;  %v30692_v12 = vsub.f32 %v13289_v24, %v30676_v42  ;;  %v12918_v22 = vand.u32 4294901760, %v30682_v52 }
 0x288   :  { %25881 = vmatmul.mubr.f32.vlgmr.msra.gmra.mrb[22].mxu0 %v29943_v38  ;;  %27826 = vmatprep.subr.bf16.mxu1 %v32100_v8 }
 0x289   :  { %27792 = vmatpush3.bf16.msra.mxu0 %v29775_v40  ;;  %25891 = vmatprep.mubr.msk.f32.mxu0 %vm28717_vm0, %v32072_v55  ;;  %v30560_v40 = vsub.f32 %v12382_v45, %v30540_v63  ;;  %v12014_v34 = vand.u32 4294901760, %v30552_v61  ;;  %v12004_v47 = vsub.f32 %v30546_v49, %v12003_v28  ;;  %v12907_v45 = vand.u32 4294901760, %v30679_v59 }
 0x28a   :  { %27793 = vmatprep.subr.bf16.mxu0 %v32100_v8  ;;  %25947 = vmatmul.mubr.f32.vlgmr.msra.gmra.mrb[22].mxu1 %v29943_v38 }
 0x28b   :  { %27828 = vmatpush3.bf16.msra.mxu1 %v29797_v1  ;;  %25957 = vmatprep.mubr.msk.f32.mxu1 %vm28717_vm0, %v32072_v55  ;;  %v12455_v1 = vand.u32 4294901760, %v30560_v40  ;;  %v12005_v62 = vand.u32 4294901760, %v12004_v47 }
 0x28c   :  { %27829 = vmatprep.subr.bf16.mxu1 %v32100_v8 }
 0x28d   :  { %27795 = vmatpush3.bf16.msra.mxu0 %v29799_v44  ;;  %v12466_v44 = vand.u32 4294901760, %v30565_v33  ;;  %v12456_v54 = vsub.f32 %v30560_v40, %v12455_v1 }
 0x28e   :  { %25960 = vmatprep.subr.mxu0 %v32072_v55 }
 0x28f   :  { %27831 = vmatpush3.bf16.msra.mxu1 %v29823_v18  ;;  %v12015_v18 = vsub.f32 %v30552_v61, %v12014_v34  ;;  %v12457_v29 = vand.u32 4294901760, %v12456_v54  ;;  %v28132_v54 = vadd.f32 %v30451_v27, %v30483_v13 }
 0x290   :  { %25892 = vmatmul.mubr.f32.vlgmr.msra.gmra.mrb[22].mxu0 %v29943_v38  ;;  %25990 = vmatprep.subr.mxu1 %v32072_v55 }
 0x291   :  { %25962 = vmatprep.mubr.msk.f32.mxu0 %vm28717_vm0, %v32072_v55  ;;  %v12016_v31 = vand.u32 4294901760, %v12015_v18 }
 0x292   :  { %25958 = vmatmul.mubr.f32.vlgmr.msra.gmra.mrb[22].mxu1 %v29943_v38  ;;  %v12467_v38 = vsub.f32 %v30565_v33, %v12466_v44 }
 0x293   :  { %25992 = vmatprep.mubr.msk.f32.mxu1 %vm28717_vm0, %v32072_v55 }
 0x294   :  { %v12468_v36 = vand.u32 4294901760, %v12467_v38  ;;  %v28133_v38 = vadd.f32 %v30459_v26, %v30500_v37 }
 0x296   :  { %25961 = vmatpush3.xpose.msra.mxu0 %v30533_v17  ;;  %v14190_v27 = vsel %vm282_vm1, %v28133_v38, 0 }
 0x297   :  { %25965 = vmatprep.subr.mxu0 %v32072_v55  ;;  %v30763_v37 = vand.u32 4294901760, %v14190_v27 }
 0x298   :  { %25991 = vmatpush3.xpose.msra.mxu1 %v30548_v16 }
 0x299   :  { %25963 = vmatmul.mubr.f32.vlgmr.msra.gmra.mrb[24].mxu0 %v12005_v62  ;;  %25995 = vmatprep.subr.mxu1 %v32072_v55  ;;  %v30775_v41 = vsub.f32 %v14190_v27, %v30763_v37 }
 0x29a   :  { %25966 = vmatpush3.xpose.msra.mxu0 %v12016_v31  ;;  %25967 = vmatprep.mubr.msk.f32.mxu0 %vm28717_vm0, %v32072_v55 }
 0x29b   :  { %25970 = vmatprep.subr.mxu0 %v32072_v55  ;;  %25993 = vmatmul.mubr.f32.vlgmr.msra.gmra.mrb[24].mxu1 %v12457_v29  ;;  %v13738_v29 = vsel %vm282_vm1, %v28132_v54, 0  ;;  %v14263_v3 = vand.u32 4294901760, %v30775_v41 }
 0x29c   :  { %25996 = vmatpush3.xpose.msra.mxu1 %v12468_v36  ;;  %25997 = vmatprep.mubr.msk.f32.mxu1 %vm28717_vm0, %v32072_v55  ;;  %v30755_v13 = vand.u32 4294901760, %v13738_v29 }
 0x29d   :  { %26000 = vmatprep.subr.mxu1 %v32072_v55  ;;  %v14264_v50 = vsub.f32 %v30775_v41, %v14263_v3 }
 0x29f   :  { %v14265_v24 = vand.u32 4294901760, %v14264_v50 }
 0x2a1   :  { %25968 = vmatmul.mubr.f32.vlgmr.msra.gmra.mrb[24].mxu0 %v30530_v43 }
 0x2a2   :  { %25971 = vmatpush3.xpose.msra.mxu0 %v30552_v61  ;;  %25972 = vmatprep.mubr.msk.f32.mxu0 %vm28717_vm0, %v32072_v55  ;;  %v12908_v61 = vsub.f32 %v30679_v59, %v12907_v45 }
 0x2a3   :  { %v30604_v14 = vpop.f32.mrb[14].mxu0  ;;  %25975 = vmatprep.subr.mxu0 %v32072_v55  ;;  %25998 = vmatmul.mubr.f32.vlgmr.msra.gmra.mrb[24].mxu1 %v30540_v63 }
 0x2a4   :  { %v25365_v20 = vpop.f32.mrb[15].mxu0  ;;  %26001 = vmatpush3.xpose.msra.mxu1 %v30565_v33  ;;  %26002 = vmatprep.mubr.msk.f32.mxu1 %vm28717_vm0, %v32072_v55  ;;  %v12909_v33 = vand.u32 4294901760, %v12908_v61 }
 0x2a5   :  { %v30615_v46 = vpop.f32.mrb[14].mxu1  ;;  %26005 = vmatprep.subr.mxu1 %v32072_v55  ;;  %v30769_v20 = vsub.f32 %v13738_v29, %v30755_v13 }
 0x2a6   :  { %v25431_v32 = vpop.f32.mrb[15].mxu1 }
 0x2a7   :  { %v13811_v32 = vand.u32 4294901760, %v30769_v20 }
 0x2a9   :  { %25973 = vmatmul.mubr.f32.vlgmr.msra.gmra.mrb[24].mxu0 %v30546_v49  ;;  %v13370_v49 = vand.u32 4294901760, %v30692_v12  ;;  %v13812_v53 = vsub.f32 %v30769_v20, %v13811_v32 }
 0x2aa   :  { %25976 = vmatpush3.xpose.msra.mxu0 %v30533_v17  ;;  %25977 = vmatprep.mubr.msk.f32.mxu0 %vm28717_vm0, %v32072_v55 }
 0x2ab   :  { %25980 = vmatprep.subr.mxu0 %v32072_v55  ;;  %26003 = vmatmul.mubr.f32.vlgmr.msra.gmra.mrb[24].mxu1 %v30560_v40  ;;  %v12919_v40 = vsub.f32 %v30682_v52, %v12918_v22  ;;  %v13813_v51 = vand.u32 4294901760, %v13812_v53 }
 0x2ac   :  { %26006 = vmatpush3.xpose.msra.mxu1 %v30548_v16  ;;  %26007 = vmatprep.mubr.msk.f32.mxu1 %vm28717_vm0, %v32072_v55 }
 0x2ad   :  { %26010 = vmatprep.subr.mxu1 %v32072_v55 }
 0x2b1   :  { %25978 = vmatmul.mubr.f32.vlgmr.msra.gmra.mrb[24].mxu0 %v12003_v28  ;;  %v13371_v28 = vsub.f32 %v30692_v12, %v13370_v49 }
 0x2b2   :  { %25981 = vmatpush3.xpose.msra.mxu0 %v12014_v34  ;;  %25982 = vmatprep.mubr.msk.f32.mxu0 %vm28717_vm0, %v32072_v55 }
 0x2b3   :  { %25985 = vmatprep.subr.mxu0 %v32072_v55  ;;  %26008 = vmatmul.mubr.f32.vlgmr.msra.gmra.mrb[24].mxu1 %v12455_v1  ;;  %v13372_v1 = vand.u32 4294901760, %v13371_v28 }
 0x2b4   :  { %26011 = vmatpush3.xpose.msra.mxu1 %v12466_v44  ;;  %26012 = vmatprep.mubr.msk.f32.mxu1 %vm28717_vm0, %v32072_v55 }
 0x2b5   :  { %26015 = vmatprep.subr.mxu1 %v32072_v55 }
 0x2b9   :  { %25983 = vmatmul.mubr.f32.vlgmr.msra.gmra.mrb[24].mxu0 %v30530_v43 }
 0x2ba   :  { %25986 = vmatpush3.xpose.msra.mxu0 %v30533_v17  ;;  %25987 = vmatprep.mubr.msk.f32.mxu0 %vm28717_vm0, %v32072_v55  ;;  %v13359_v17 = vand.u32 4294901760, %v30686_v9 }
 0x2bb   :  { %26020 = vmatprep.subr.mxu0 %v32072_v55  ;;  %26013 = vmatmul.mubr.f32.vlgmr.msra.gmra.mrb[24].mxu1 %v30540_v63 }
 0x2bc   :  { %26016 = vmatpush3.xpose.msra.mxu1 %v30548_v16  ;;  %26017 = vmatprep.mubr.msk.f32.mxu1 %vm28717_vm0, %v32072_v55  ;;  %v13360_v16 = vsub.f32 %v30686_v9, %v13359_v17 }
 0x2bd   :  { %26050 = vmatprep.subr.mxu1 %v32072_v55 }
 0x2be   :  { %v13361_v34 = vand.u32 4294901760, %v13360_v16 }
 0x2c1   :  { %25988 = vmatmul.mubr.f32.vlgmr.msra.gmra.mrb[24].mxu0 %v30530_v43  ;;  %v12920_v43 = vand.u32 4294901760, %v12919_v40 }
 0x2c2   :  { %26021 = vmatpush3.xpose.msra.mxu0 %v30667_v7  ;;  %26022 = vmatprep.mubr.msk.f32.mxu0 %vm28717_vm0, %v32072_v55 }
 0x2c3   :  { %26025 = vmatprep.subr.mxu0 %v32072_v55  ;;  %26018 = vmatmul.mubr.f32.vlgmr.msra.gmra.mrb[24].mxu1 %v30540_v63 }
 0x2c4   :  { %26051 = vmatpush3.xpose.msra.mxu1 %v30676_v42  ;;  %26052 = vmatprep.mubr.msk.f32.mxu1 %vm28717_vm0, %v32072_v55 }
 0x2c5   :  { %26055 = vmatprep.subr.mxu1 %v32072_v55  ;;  %26023 = vmatmul.mubr.f32.vlgmr.msra.gmra.mrb[26].mxu0 %v12909_v33 }
 0x2c6   :  { %26026 = vmatpush3.xpose.msra.mxu0 %v12920_v43  ;;  %26027 = vmatprep.mubr.msk.f32.mxu0 %vm28717_vm0, %v32072_v55 }
 0x2c7   :  { %26053 = vmatmul.mubr.f32.vlgmr.msra.gmra.mrb[26].mxu1 %v13361_v34  ;;  %26030 = vmatprep.subr.mxu0 %v32072_v55 }
 0x2c8   :  { %26056 = vmatpush3.xpose.msra.mxu1 %v13372_v1  ;;  %26057 = vmatprep.mubr.msk.f32.mxu1 %vm28717_vm0, %v32072_v55 }
 0x2c9   :  { %26060 = vmatprep.subr.mxu1 %v32072_v55 }
 0x2cd   :  { %26028 = vmatmul.mubr.f32.vlgmr.msra.gmra.mrb[26].mxu0 %v30662_v58 }
 0x2ce   :  { %26031 = vmatpush3.xpose.msra.mxu0 %v30682_v52  ;;  %26032 = vmatprep.mubr.msk.f32.mxu0 %vm28717_vm0, %v32072_v55 }
 0x2cf   :  { %26058 = vmatmul.mubr.f32.vlgmr.msra.gmra.mrb[26].mxu1 %v30673_v11  ;;  %26035 = vmatprep.subr.mxu0 %v32072_v55 }
 0x2d0   :  { %26061 = vmatpush3.xpose.msra.mxu1 %v30692_v12  ;;  %26062 = vmatprep.mubr.msk.f32.mxu1 %vm28717_vm0, %v32072_v55  ;;  %v28135_v12 = vadd.f32 %v30615_v46, %v30633_v56 }
 0x2d1   :  { %26065 = vmatprep.subr.mxu1 %v32072_v55 }
 0x2d3   :  { %v8530_v63 = vpop.f32.mrb[16].mxu0 }
 0x2d4   :  { %v25497_v44 = vpop.f32.mrb[17].mxu0  ;;  %v28136_v62 = vadd.f32 %v8530_v63, %v30493_v10 }
 0x2d5   :  { %v9015_v47 = vpop.f32.mrb[16].mxu1  ;;  %26033 = vmatmul.mubr.f32.vlgmr.msra.gmra.mrb[26].mxu0 %v30679_v59  ;;  %v28134_v59 = vadd.f32 %v30604_v14, %v30623_v0  ;;  %v15094_v0 = vsel %vm282_vm1, %v28135_v12, 0 }
 0x2d6   :  { %v25563_v18 = vpop.f32.mrb[17].mxu1  ;;  %26036 = vmatpush3.xpose.msra.mxu0 %v30667_v7  ;;  %26037 = vmatprep.mubr.msk.f32.mxu0 %vm28717_vm0, %v32072_v55  ;;  %v28137_v31 = vadd.f32 %v9015_v47, %v30506_v19  ;;  %v13741_v36 = vsel %vm282_vm1, %v28136_v62, 0  ;;  %v30853_v56 = vand.u32 4294901760, %v15094_v0 }
 0x2d7   :  { %26063 = vmatmul.mubr.f32.vlgmr.msra.gmra.mrb[26].mxu1 %v30686_v9  ;;  %26040 = vmatprep.subr.mxu0 %v32072_v55  ;;  %v30759_v26 = vand.u32 4294901760, %v13741_v36 }
 0x2d8   :  { %26066 = vmatpush3.xpose.msra.mxu1 %v30676_v42  ;;  %26067 = vmatprep.mubr.msk.f32.mxu1 %vm28717_vm0, %v32072_v55  ;;  %v14193_v10 = vsel %vm282_vm1, %v28137_v31, 0  ;;  %v30861_v16 = vsub.f32 %v15094_v0, %v30853_v56 }
 0x2d9   :  { %26070 = vmatprep.subr.mxu1 %v32072_v55  ;;  %v30766_v19 = vand.u32 4294901760, %v14193_v10  ;;  %v30772_v35 = vsub.f32 %v13741_v36, %v30759_v26  ;;  %v23220_v36 = vld.sshfl [vmem:[#allocation8 + $0x8] sm:$0x33 pattern:$0x75316420] }
 0x2da   :  { %v15167_v34 = vand.u32 4294901760, %v30861_v16 }
 0x2db   :  { %v30779_v57 = vsub.f32 %v14193_v10, %v30766_v19  ;;  %v13822_v25 = vand.u32 4294901760, %v30772_v35  ;;  %v205_v10 = vcombine.high %v23220_v36, %v23220_v36 }
 0x2dc   :  { %v15168_v47 = vsub.f32 %v30861_v16, %v15167_v34 }
 0x2dd   :  { %26038 = vmatmul.mubr.f32.vlgmr.msra.gmra.mrb[26].mxu0 %v12907_v45  ;;  %v14274_v4 = vand.u32 4294901760, %v30779_v57  ;;  %v13823_v6 = vsub.f32 %v30772_v35, %v13822_v25 }
 0x2de   :  { %26041 = vmatpush3.xpose.msra.mxu0 %v12918_v22  ;;  %26042 = vmatprep.mubr.msk.f32.mxu0 %vm28717_vm0, %v32072_v55  ;;  %v15169_v38 = vand.u32 4294901760, %v15168_v47 }
 0x2df   :  { %26068 = vmatmul.mubr.f32.vlgmr.msra.gmra.mrb[26].mxu1 %v13359_v17  ;;  %26045 = vmatprep.subr.mxu0 %v32072_v55  ;;  %v14275_v23 = vsub.f32 %v30779_v57, %v14274_v4  ;;  %v14642_v17 = vsel %vm282_vm1, %v28134_v59, 0 }
 0x2e0   :  { %26071 = vmatpush3.xpose.msra.mxu1 %v13370_v49  ;;  %26072 = vmatprep.mubr.msk.f32.mxu1 %vm28717_vm0, %v32072_v55 }
 0x2e1   :  { %26075 = vmatprep.subr.mxu1 %v32072_v55 }
 0x2e5   :  { %26043 = vmatmul.mubr.f32.vlgmr.msra.gmra.mrb[26].mxu0 %v30662_v58 }
 0x2e6   :  { %26046 = vmatpush3.xpose.msra.mxu0 %v30667_v7  ;;  %26047 = vmatprep.mubr.msk.f32.mxu0 %vm28717_vm0, %v32072_v55  ;;  %v14276_v7 = vand.u32 4294901760, %v14275_v23 }
 0x2e7   :  { %26073 = vmatmul.mubr.f32.vlgmr.msra.gmra.mrb[26].mxu1 %v30673_v11  ;;  %26080 = vmatprep.subr.mxu0 %v32072_v55 }
 0x2e8   :  { %26076 = vmatpush3.xpose.msra.mxu1 %v30676_v42  ;;  %26077 = vmatprep.mubr.msk.f32.mxu1 %vm28717_vm0, %v32072_v55 }
 0x2e9   :  { %26110 = vmatprep.subr.mxu1 %v32072_v55 }
 0x2ed   :  { %26048 = vmatmul.mubr.f32.vlgmr.msra.gmra.mrb[26].mxu0 %v30662_v58  ;;  %v13824_v58 = vand.u32 4294901760, %v13823_v6 }
 0x2ee   :  { %26081 = vmatpush3.xpose.msra.mxu0 %v30759_v26  ;;  %26082 = vmatprep.mubr.msk.f32.mxu0 %vm28717_vm0, %v32072_v55 }
 0x2ef   :  { %26078 = vmatmul.mubr.f32.vlgmr.msra.gmra.mrb[26].mxu1 %v30673_v11  ;;  %26085 = vmatprep.subr.mxu0 %v32072_v55 }
 0x2f0   :  { %26111 = vmatpush3.xpose.msra.mxu1 %v30766_v19  ;;  %26112 = vmatprep.mubr.msk.f32.mxu1 %vm28717_vm0, %v32072_v55 }
 0x2f1   :  { %26115 = vmatprep.subr.mxu1 %v32072_v55  ;;  %26083 = vmatmul.mubr.f32.vlgmr.msra.gmra.mrb[28].mxu0 %v13813_v51 }
 0x2f2   :  { %26086 = vmatpush3.xpose.msra.mxu0 %v13824_v58  ;;  %26087 = vmatprep.mubr.msk.f32.mxu0 %vm28717_vm0, %v32072_v55 }
 0x2f3   :  { %26113 = vmatmul.mubr.f32.vlgmr.msra.gmra.mrb[28].mxu1 %v14265_v24  ;;  %26090 = vmatprep.subr.mxu0 %v32072_v55 }
 0x2f4   :  { %26116 = vmatpush3.xpose.msra.mxu1 %v14276_v7  ;;  %26117 = vmatprep.mubr.msk.f32.mxu1 %vm28717_vm0, %v32072_v55 }
 0x2f5   :  { %26120 = vmatprep.subr.mxu1 %v32072_v55 }
 0x2f9   :  { %26088 = vmatmul.mubr.f32.vlgmr.msra.gmra.mrb[28].mxu0 %v30755_v13 }
 0x2fa   :  { %26091 = vmatpush3.xpose.msra.mxu0 %v30772_v35  ;;  %26092 = vmatprep.mubr.msk.f32.mxu0 %vm28717_vm0, %v32072_v55 }
 0x2fb   :  { %26118 = vmatmul.mubr.f32.vlgmr.msra.gmra.mrb[28].mxu1 %v30763_v37  ;;  %26095 = vmatprep.subr.mxu0 %v32072_v55 }
 0x2fc   :  { %26121 = vmatpush3.xpose.msra.mxu1 %v30779_v57  ;;  %26122 = vmatprep.mubr.msk.f32.mxu1 %vm28717_vm0, %v32072_v55 }
 0x2fd   :  { %26125 = vmatprep.subr.mxu1 %v32072_v55 }
 0x301   :  { %26093 = vmatmul.mubr.f32.vlgmr.msra.gmra.mrb[28].mxu0 %v30769_v20 }
 0x302   :  { %26096 = vmatpush3.xpose.msra.mxu0 %v30759_v26  ;;  %26097 = vmatprep.mubr.msk.f32.mxu0 %vm28717_vm0, %v32072_v55 }
 0x303   :  { %v9500_v11 = vpop.f32.mrb[18].mxu0  ;;  %26123 = vmatmul.mubr.f32.vlgmr.msra.gmra.mrb[28].mxu1 %v30775_v41  ;;  %26100 = vmatprep.subr.mxu0 %v32072_v55 }
 0x304   :  { %v25629_v42 = vpop.f32.mrb[19].mxu0  ;;  %26126 = vmatpush3.xpose.msra.mxu1 %v30766_v19  ;;  %26127 = vmatprep.mubr.msk.f32.mxu1 %vm28717_vm0, %v32072_v55  ;;  %v28138_v52 = vadd.f32 %v9500_v11, %v30627_v15  ;;  %v30845_v15 = vand.u32 4294901760, %v14642_v17 }
 0x305   :  { %v9985_v9 = vpop.f32.mrb[18].mxu1  ;;  %26130 = vmatprep.subr.mxu1 %v32072_v55 }
 0x306   :  { %v25695_v45 = vpop.f32.mrb[19].mxu1  ;;  %v28139_v22 = vadd.f32 %v9985_v9, %v30637_v2  ;;  %v14645_v14 = vsel %vm282_vm1, %v28138_v52, 0  ;;  %v14714_v61 = vsub.f32 %v14642_v17, %v30845_v15 }
 0x307   :  { %v30849_v46 = vand.u32 4294901760, %v14645_v14 }
 0x308   :  { %v15097_v49 = vsel %vm282_vm1, %v28139_v22, 0  ;;  %v14715_v33 = vand.u32 4294901760, %v14714_v61 }
 0x309   :  { %26098 = vmatmul.mubr.f32.vlgmr.msra.gmra.mrb[28].mxu0 %v13811_v32  ;;  %v30856_v2 = vand.u32 4294901760, %v15097_v49  ;;  %v14725_v40 = vsub.f32 %v14645_v14, %v30849_v46 }
 0x30a   :  { %26101 = vmatpush3.xpose.msra.mxu0 %v13822_v25  ;;  %26102 = vmatprep.mubr.msk.f32.mxu0 %vm28717_vm0, %v32072_v55  ;;  %v14716_v63 = vsub.f32 %v14714_v61, %v14715_v33 }
 0x30b   :  { %26128 = vmatmul.mubr.f32.vlgmr.msra.gmra.mrb[28].mxu1 %v14263_v3  ;;  %26105 = vmatprep.subr.mxu0 %v32072_v55  ;;  %v30865_v28 = vsub.f32 %v15097_v49, %v30856_v2  ;;  %v14726_v43 = vand.u32 4294901760, %v14725_v40  ;;  %v76_v49 = vld [vmem:[#allocation5 + $0x8] sm:$0xff] }
 0x30c   :  { %26131 = vmatpush3.xpose.msra.mxu1 %v14274_v4  ;;  %26132 = vmatprep.mubr.msk.f32.mxu1 %vm28717_vm0, %v32072_v55  ;;  %v14717_v54 = vand.u32 4294901760, %v14716_v63  ;;  %v75_v4 = vld [vmem:[#allocation5] sm:$0xff]  ;;  %vm15554_vm4 = vcmp.ge.f32.partialorder %v76_v49, 0.5 }
 0x30d   :  { %26135 = vmatprep.subr.mxu1 %v32072_v55  ;;  %v15178_v1 = vand.u32 4294901760, %v30865_v28  ;;  %v14727_v44 = vsub.f32 %v14725_v40, %v14726_v43  ;;  %vm15553_vm2 = vcmp.ge.f32.partialorder %v75_v4, 0.5 }
 0x30f   :  { %v15179_v18 = vsub.f32 %v30865_v28, %v15178_v1  ;;  %v14728_v62 = vand.u32 4294901760, %v14727_v44 }
 0x311   :  { %26103 = vmatmul.mubr.f32.vlgmr.msra.gmra.mrb[28].mxu0 %v30755_v13  ;;  %v15180_v31 = vand.u32 4294901760, %v15179_v18 }
 0x312   :  { %26106 = vmatpush3.xpose.msra.mxu0 %v30759_v26  ;;  %26107 = vmatprep.mubr.msk.f32.mxu0 %vm28717_vm0, %v32072_v55 }
 0x313   :  { %26133 = vmatmul.mubr.f32.vlgmr.msra.gmra.mrb[28].mxu1 %v30763_v37  ;;  %26140 = vmatprep.subr.mxu0 %v32072_v55 }
 0x314   :  { %26136 = vmatpush3.xpose.msra.mxu1 %v30766_v19  ;;  %26137 = vmatprep.mubr.msk.f32.mxu1 %vm28717_vm0, %v32072_v55  ;;  %v30928_v19 = vrot.slane %v205_v10, %v30440_v60 }
 0x315   :  { %26170 = vmatprep.subr.mxu1 %v32072_v55 }
 0x316   :  { %v30937_v35 = vrot.slane %v30928_v19, %v30465_v5 }
 0x318   :  { %v30954_v41 = vadd.f32 %v30279_v21, %v30937_v35 }
 0x319   :  { %26108 = vmatmul.mubr.f32.vlgmr.msra.gmra.mrb[28].mxu0 %v30755_v13 }
 0x31a   :  { %26141 = vmatpush3.xpose.msra.mxu0 %v30849_v46  ;;  %26142 = vmatprep.mubr.msk.f32.mxu0 %vm28717_vm0, %v32072_v55  ;;  %v30961_v32 = vand.u32 4294901760, %v30954_v41 }
 0x31b   :  { %26138 = vmatmul.mubr.f32.vlgmr.msra.gmra.mrb[28].mxu1 %v30763_v37  ;;  %26145 = vmatprep.subr.mxu0 %v32072_v55  ;;  %v30922_v37 = vrot.slane %v23220_v36, %v30440_v60 }
 0x31c   :  { %26171 = vmatpush3.xpose.msra.mxu1 %v30856_v2  ;;  %26172 = vmatprep.mubr.msk.f32.mxu1 %vm28717_vm0, %v32072_v55 }
 0x31d   :  { %26175 = vmatprep.subr.mxu1 %v32072_v55  ;;  %26143 = vmatmul.mubr.f32.vlgmr.msra.gmra.mrb[30].mxu0 %v14717_v54  ;;  %v30932_v20 = vrot.slane %v30922_v37, %v30465_v5 }
 0x31e   :  { %26146 = vmatpush3.xpose.msra.mxu0 %v14728_v62  ;;  %26147 = vmatprep.mubr.msk.f32.mxu0 %vm28717_vm0, %v32072_v55 }
 0x31f   :  { %26173 = vmatmul.mubr.f32.vlgmr.msra.gmra.mrb[30].mxu1 %v15169_v38  ;;  %26150 = vmatprep.subr.mxu0 %v32072_v55  ;;  %v30946_v60 = vadd.f32 %v30272_v39, %v30932_v20 }
 0x320   :  { %26176 = vmatpush3.xpose.msra.mxu1 %v15180_v31  ;;  %26177 = vmatprep.mubr.msk.f32.mxu1 %vm28717_vm0, %v32072_v55 }
 0x321   :  { %26180 = vmatprep.subr.mxu1 %v32072_v55  ;;  %v30957_v57 = vand.u32 4294901760, %v30946_v60 }
 0x325   :  { %26148 = vmatmul.mubr.f32.vlgmr.msra.gmra.mrb[30].mxu0 %v30845_v15 }
 0x326   :  { %26151 = vmatpush3.xpose.msra.mxu0 %v14725_v40  ;;  %26152 = vmatprep.mubr.msk.f32.mxu0 %vm28717_vm0, %v32072_v55 }
 0x327   :  { %26178 = vmatmul.mubr.f32.vlgmr.msra.gmra.mrb[30].mxu1 %v30853_v56  ;;  %26155 = vmatprep.subr.mxu0 %v32072_v55 }
 0x328   :  { %26181 = vmatpush3.xpose.msra.mxu1 %v30865_v28  ;;  %26182 = vmatprep.mubr.msk.f32.mxu1 %vm28717_vm0, %v32072_v55 }
 0x329   :  { %26185 = vmatprep.subr.mxu1 %v32072_v55 }
 0x32d   :  { %26153 = vmatmul.mubr.f32.vlgmr.msra.gmra.mrb[30].mxu0 %v14714_v61 }
 0x32e   :  { %26156 = vmatpush3.xpose.msra.mxu0 %v30849_v46  ;;  %26157 = vmatprep.mubr.msk.f32.mxu0 %vm28717_vm0, %v32072_v55 }
 0x32f   :  { %26183 = vmatmul.mubr.f32.vlgmr.msra.gmra.mrb[30].mxu1 %v30861_v16  ;;  %26160 = vmatprep.subr.mxu0 %v32072_v55 }
 0x330   :  { %26186 = vmatpush3.xpose.msra.mxu1 %v30856_v2  ;;  %26187 = vmatprep.mubr.msk.f32.mxu1 %vm28717_vm0, %v32072_v55 }
 0x331   :  { %26190 = vmatprep.subr.mxu1 %v32072_v55 }
 0x333   :  { %v30914_v29 = vpop.f32.mrb[20].mxu0 }
 0x334   :  { %v25761_v27 = vpop.f32.mrb[21].mxu0 }
 0x335   :  { %v30916_v13 = vpop.f32.mrb[20].mxu1  ;;  %26158 = vmatmul.mubr.f32.vlgmr.msra.gmra.mrb[30].mxu0 %v14715_v33 }
 0x336   :  { %v25827_v26 = vpop.f32.mrb[21].mxu1  ;;  %26161 = vmatpush3.xpose.msra.mxu0 %v14726_v43  ;;  %26162 = vmatprep.mubr.msk.f32.mxu0 %vm28717_vm0, %v32072_v55 }
 0x337   :  { %26188 = vmatmul.mubr.f32.vlgmr.msra.gmra.mrb[30].mxu1 %v15167_v34  ;;  %26165 = vmatprep.subr.mxu0 %v32072_v55 }
 0x338   :  { %26191 = vmatpush3.xpose.msra.mxu1 %v15178_v1  ;;  %26192 = vmatprep.mubr.msk.f32.mxu1 %vm28717_vm0, %v32072_v55 }
 0x339   :  { %26195 = vmatprep.subr.mxu1 %v32072_v55 }
 0x33d   :  { %26163 = vmatmul.mubr.f32.vlgmr.msra.gmra.mrb[30].mxu0 %v30845_v15 }
 0x33e   :  { %26166 = vmatpush3.xpose.msra.mxu0 %v30849_v46  ;;  %26167 = vmatprep.mubr.msk.f32.mxu0 %vm28717_vm0, %v32072_v55 }
 0x33f   :  { %26193 = vmatmul.mubr.f32.vlgmr.msra.gmra.mrb[30].mxu1 %v30853_v56  ;;  %26200 = vmatprep.subr.mxu0 %v32072_v55 }
 0x340   :  { %26196 = vmatpush3.xpose.msra.mxu1 %v30856_v2  ;;  %26197 = vmatprep.mubr.msk.f32.mxu1 %vm28717_vm0, %v32072_v55 }
 0x341   :  { %26230 = vmatprep.subr.mxu1 %v32072_v55 }
 0x345   :  { %26168 = vmatmul.mubr.f32.vlgmr.msra.gmra.mrb[30].mxu0 %v30845_v15 }
 0x346   :  { %26201 = vmatpush3.msra.mxu0 %v30957_v57  ;;  %26202 = vmatprep.mubr.msk.f32.mxu0 %vm28717_vm0, %v32072_v55 }
 0x347   :  { %26198 = vmatmul.mubr.f32.vlgmr.msra.gmra.mrb[30].mxu1 %v30853_v56  ;;  %26205 = vmatprep.subr.mxu0 %v32072_v55 }
 0x348   :  { %26231 = vmatpush3.msra.mxu1 %v30961_v32  ;;  %26232 = vmatprep.mubr.msk.f32.mxu1 %vm28717_vm0, %v32072_v55 }
 0x349   :  { %26235 = vmatprep.subr.mxu1 %v32072_v55 }
 0x363   :  { %v30972_v39 = vpop.f32.mrb[22].mxu0 }
 0x364   :  { %v25893_v21 = vpop.f32.mrb[23].mxu0 }
 0x365   :  { %v30974_v25 = vpop.f32.mrb[22].mxu1 }
 0x366   :  { %v25959_v3 = vpop.f32.mrb[23].mxu1 }
 0x394   :  { %v12377_v53 = vpop.f32.mrb[24].mxu0 }
 0x395   :  { %v15545_v6 = vmul.f32 0.35355338, %v12377_v53  ;;  %v25989_v50 = vpop.f32.mrb[25].mxu0 }
 0x396   :  { %v12829_v23 = vpop.f32.mrb[24].mxu1 }
 0x397   :  { %v15555_v51 = vsel %vm15553_vm2, -1e+09, %v15545_v6  ;;  %v15546_v58 = vmul.f32 0.35355338, %v12829_v23  ;;  %v26019_v24 = vpop.f32.mrb[25].mxu1 }
 0x398   :  { %v15564_v7 = vsel %vm15563_vm3, %v15555_v51, -inf }
 0x399   :  { %15565 = vmax.xlane.f32.xlu0 %v15564_v7  ;;  %v15556_v11 = vsel %vm15553_vm2, -1e+09, %v15546_v58 }
 0x39a   :  { %v15567_v42 = vsel %vm15563_vm3, %v15556_v11, -inf }
 0x39d   :  { %15568 = vmax.xlane.f32.xlu0 %v15567_v42 }
 0x3c0   :  { %v13281_v59 = vpop.f32.mrb[26].mxu0 }
 0x3c1   :  { %v15547_v52 = vmul.f32 0.35355338, %v13281_v59  ;;  %v26049_v9 = vpop.f32.mrb[27].mxu0 }
 0x3c2   :  { %v13733_v12 = vpop.f32.mrb[26].mxu1 }
 0x3c3   :  { %v15548_v45 = vmul.f32 0.35355338, %v13733_v12  ;;  %v26079_v22 = vpop.f32.mrb[27].mxu1  ;;  %v15557_v17 = vsel %vm15553_vm2, -1e+09, %v15547_v52 }
 0x3c4   :  { %v15570_v14 = vsel %vm15563_vm3, %v15557_v17, -inf }
 0x3c5   :  { %15571 = vmax.xlane.f32.xlu1 %v15570_v14  ;;  %v15558_v0 = vsel %vm15553_vm2, -1e+09, %v15548_v45 }
 0x3c6   :  { %v15573_v15 = vsel %vm15563_vm3, %v15558_v0, -inf }
 0x3c9   :  { %15574 = vmax.xlane.f32.xlu1 %v15573_v15 }
 0x3ec   :  { %v14185_v46 = vpop.f32.mrb[28].mxu0 }
 0x3ed   :  { %v15549_v56 = vmul.f32 0.35355338, %v14185_v46  ;;  %v26109_v2 = vpop.f32.mrb[29].mxu0 }
 0x3ee   :  { %v14637_v61 = vpop.f32.mrb[28].mxu1 }
 0x3ef   :  { %v15550_v40 = vmul.f32 0.35355338, %v14637_v61  ;;  %v26139_v16 = vpop.f32.mrb[29].mxu1  ;;  %v15559_v28 = vsel %vm15554_vm4, -1e+09, %v15549_v56 }
 0x3f0   :  { %v15576_v33 = vsel %vm15563_vm3, %v15559_v28, -inf }
 0x3f1   :  { %15577 = vmax.xlane.f32.xlu1 %v15576_v33  ;;  %v15560_v43 = vsel %vm15554_vm4, -1e+09, %v15550_v40 }
 0x3f2   :  { %v15579_v34 = vsel %vm15563_vm3, %v15560_v43, -inf }
 0x3f5   :  { %15580 = vmax.xlane.f32.xlu1 %v15579_v34 }
 0x418   :  { %v15089_v1 = vpop.f32.mrb[30].mxu0 }
 0x419   :  { %v15551_v63 = vmul.f32 0.35355338, %v15089_v1  ;;  %v26169_v44 = vpop.f32.mrb[31].mxu0 }
 0x41a   :  { %v15541_v47 = vpop.f32.mrb[30].mxu1 }
 0x41b   :  { %v15552_v18 = vmul.f32 0.35355338, %v15541_v47  ;;  %v26199_v54 = vpop.f32.mrb[31].mxu1  ;;  %v15561_v62 = vsel %vm15554_vm4, -1e+09, %v15551_v63 }
 0x41c   :  { %v15582_v38 = vsel %vm15563_vm3, %v15561_v62, -inf }
 0x41d   :  { %15583 = vmax.xlane.f32.xlu1 %v15582_v38  ;;  %v15562_v31 = vsel %vm15554_vm4, -1e+09, %v15552_v18 }
 0x41e   :  { %v15585_v36 = vsel %vm15563_vm3, %v15562_v31, -inf }
 0x421   :  { %15586 = vmax.xlane.f32.xlu1 %v15585_v36 }
 0x426   :  { %v15566_v27 = vpop.xlane.xlu0 %15565 }
 0x427   :  { %v15588_v10 = vsub.f32 %v15555_v51, %v15566_v27 }
 0x429   :  { %v15596_v26 = vmul.f32 1.442695, %v15588_v10 }
 0x42a   :  { %v15569_v21 = vpop.xlane.xlu0 %15568 }
 0x42b   :  { %28556 = vpow2.f32 %v15596_v26  ;;  %v15589_v3 = vsub.f32 %v15556_v11, %v15569_v21  ;;  %v16182_v26 = vsub.f32 %v30954_v41, %v30961_v32 }
 0x42d   :  { %v15598_v4 = vmul.f32 1.442695, %v15589_v3 }
 0x42f   :  { %28558 = vpow2.f32 %v15598_v4 }
 0x435   :  { %v28557_v53 = vpop.eup %28556 }
 0x436   :  { %v15612_v6 = vsel %vm15563_vm3, %v28557_v53, 0.0 }
 0x437   :  { %15613 = vadd.xlane.f32.xlu0 %v15612_v6 }
 0x439   :  { %v28559_v50 = vpop.eup %28558 }
 0x43a   :  { %v15615_v23 = vsel %vm15563_vm3, %v28559_v50, 0.0 }
 0x43b   :  { %15616 = vadd.xlane.f32.xlu0 %v15615_v23 }
 0x452   :  { %v15572_v58 = vpop.xlane.xlu1 %15571 }
 0x453   :  { %v15590_v24 = vsub.f32 %v15557_v17, %v15572_v58 }
 0x455   :  { %v15600_v7 = vmul.f32 1.442695, %v15590_v24 }
 0x456   :  { %v15575_v42 = vpop.xlane.xlu1 %15574 }
 0x457   :  { %28560 = vpow2.f32 %v15600_v7  ;;  %v15591_v51 = vsub.f32 %v15558_v0, %v15575_v42 }
 0x459   :  { %v15602_v59 = vmul.f32 1.442695, %v15591_v51 }
 0x45b   :  { %28562 = vpow2.f32 %v15602_v59 }
 0x461   :  { %v30994_v52 = vpop.eup %28560 }
 0x462   :  { %v15618_v11 = vsel %vm15563_vm3, %v30994_v52, 0.0 }
 0x463   :  { %15619 = vadd.xlane.f32.xlu0 %v15618_v11 }
 0x465   :  { %v30998_v9 = vpop.eup %28562 }
 0x466   :  { %v15621_v12 = vsel %vm15563_vm3, %v30998_v9, 0.0 }
 0x467   :  { %15622 = vadd.xlane.f32.xlu0 %v15621_v12  ;;  %v220_v12 = vcombine.high %v30922_v37, %v30922_v37 }
 0x47e   :  { %v15578_v45 = vpop.xlane.xlu1 %15577 }
 0x47f   :  { %v15592_v22 = vsub.f32 %v15559_v28, %v15578_v45  ;;  %v31051_v45 = vrot.slane %v220_v12, %v30465_v5 }
 0x481   :  { %v15604_v17 = vmul.f32 1.442695, %v15592_v22  ;;  %v221_v22 = vcombine.high %v30928_v19, %v30928_v19  ;;  %v28130_v37 = vadd.f32 %v30360_v30, %v31051_v45 }
 0x482   :  { %v15581_v14 = vpop.xlane.xlu1 %15580 }
 0x483   :  { %28564 = vpow2.f32 %v15604_v17  ;;  %v15593_v0 = vsub.f32 %v15560_v43, %v15581_v14  ;;  %v31062_v14 = vrot.slane %v221_v22, %v30465_v5  ;;  %v31067_v19 = vand.u32 4294901760, %v28130_v37 }
 0x485   :  { %v15606_v15 = vmul.f32 1.442695, %v15593_v0  ;;  %v31075_v5 = vsub.f32 %v28130_v37, %v31067_v19 }
 0x487   :  { %28566 = vpow2.f32 %v15606_v15  ;;  %v28131_v15 = vadd.f32 %v30367_v48, %v31062_v14 }
 0x48d   :  { %v31002_v49 = vpop.eup %28564 }
 0x48e   :  { %v15624_v46 = vsel %vm15563_vm3, %v31002_v49, 0.0 }
 0x48f   :  { %15625 = vadd.xlane.f32.xlu0 %v15624_v46  ;;  %v31077_v46 = vand.u32 4294901760, %v28131_v15 }
 0x491   :  { %v31006_v56 = vpop.eup %28566 }
 0x492   :  { %v15627_v2 = vsel %vm15563_vm3, %v31006_v56, 0.0 }
 0x493   :  { %15628 = vadd.xlane.f32.xlu1 %v15627_v2 }
 0x4aa   :  { %v15584_v61 = vpop.xlane.xlu1 %15583 }
 0x4ab   :  { %v15594_v40 = vsub.f32 %v15561_v62, %v15584_v61  ;;  %v15733_v62 = vsub.f32 %v30946_v60, %v30957_v57  ;;  %v16183_v60 = vand.u32 4294901760, %v16182_v26 }
 0x4ad   :  { %v15608_v16 = vmul.f32 1.442695, %v15594_v40  ;;  %v15734_v10 = vand.u32 4294901760, %v15733_v62  ;;  %v16184_v51 = vsub.f32 %v16182_v26, %v16183_v60 }
 0x4ae   :  { %v15587_v28 = vpop.xlane.xlu1 %15586 }
 0x4af   :  { %28568 = vpow2.f32 %v15608_v16  ;;  %v15595_v33 = vsub.f32 %v15562_v31, %v15587_v28  ;;  %v15735_v58 = vsub.f32 %v15733_v62, %v15734_v10  ;;  %v16632_v16 = vand.u32 4294901760, %v31075_v5 }
 0x4b0   :  { %v31090_v28 = vsub.f32 %v28131_v15, %v31077_v46 }
 0x4b1   :  { %v15610_v43 = vmul.f32 1.442695, %v15595_v33  ;;  %v15736_v59 = vand.u32 4294901760, %v15735_v58 }
 0x4b3   :  { %28570 = vpow2.f32 %v15610_v43 }
 0x4b9   :  { %v31010_v34 = vpop.eup %28568 }
 0x4ba   :  { %v15630_v1 = vsel %vm15563_vm3, %v31010_v34, 0.0 }
 0x4bb   :  { %15631 = vadd.xlane.f32.xlu0 %v15630_v1 }
 0x4bd   :  { %v31014_v63 = vpop.eup %28570 }
 0x4be   :  { %v15633_v44 = vsel %vm15563_vm3, %v31014_v63, 0.0 }
 0x4bf   :  { %15634 = vadd.xlane.f32.xlu1 %v15633_v44  ;;  %v16633_v44 = vsub.f32 %v31075_v5, %v16632_v16 }
 0x4c4   :  { %v15614_v47 = vpop.xlane.xlu0 %15613 }
 0x4c5   :  { %28572 = vrcp.f32 %v15614_v47 }
 0x4c8   :  { %v15617_v18 = vpop.xlane.xlu0 %15616 }
 0x4c9   :  { %28574 = vrcp.f32 %v15617_v18 }
 0x4cf   :  { %v28573_v54 = vpop.eup %28572 }
 0x4d0   :  { %v15644_v38 = vmul.f32 %v28573_v54, %v28557_v53 }
 0x4d2   :  { %v15653_v31 = vsel %vm15563_vm3, %v15644_v38, 0  ;;  %v16634_v38 = vand.u32 4294901760, %v16633_v44  ;;  %v31265_v44 = vld [vmem:[#allocation7 + $0x190] sm:$0xff] }
 0x4d3   :  { %v28575_v36 = vpop.eup %28574  ;;  %v31021_v27 = vand.u32 4294901760, %v15653_v31 }
 0x4d4   :  { %v15645_v21 = vmul.f32 %v28575_v36, %v28559_v50  ;;  %v16185_v50 = vand.u32 4294901760, %v16184_v51 }
 0x4d5   :  { %v15722_v3 = vsub.f32 %v15653_v31, %v31021_v27 }
 0x4d6   :  { %v16102_v4 = vsel %vm15563_vm3, %v15645_v21, 0 }
 0x4d7   :  { %v15723_v6 = vand.u32 4294901760, %v15722_v3  ;;  %v31027_v23 = vand.u32 4294901760, %v16102_v4 }
 0x4d9   :  { %v15724_v53 = vsub.f32 %v15722_v3, %v15723_v6  ;;  %v16171_v24 = vsub.f32 %v16102_v4, %v31027_v23  ;;  %v28141_v4 = vadd.f32 %v30916_v13, %v30937_v35 }
 0x4db   :  { %v15725_v7 = vand.u32 4294901760, %v15724_v53  ;;  %v16172_v42 = vand.u32 4294901760, %v16171_v24 }
 0x4dd   :  { %26203 = vmatmul.mubr.f32.vlgmr.msra.gmra.mrb[32].mxu0 %v15725_v7  ;;  %v16173_v11 = vsub.f32 %v16171_v24, %v16172_v42 }
 0x4de   :  { %26206 = vmatpush3.msra.mxu0 %v15736_v59  ;;  %26207 = vmatprep.mubr.msk.f32.mxu0 %vm28717_vm0, %v32072_v55 }
 0x4df   :  { %v16174_v41 = vand.u32 4294901760, %v16173_v11  ;;  %26210 = vmatprep.subr.mxu0 %v32072_v55 }
 0x4e1   :  { %26233 = vmatmul.mubr.f32.vlgmr.msra.gmra.mrb[32].mxu1 %v16174_v41 }
 0x4e2   :  { %26236 = vmatpush3.msra.mxu1 %v16185_v50  ;;  %26237 = vmatprep.mubr.msk.f32.mxu1 %vm28717_vm0, %v32072_v55 }
 0x4e3   :  { %26240 = vmatprep.subr.mxu1 %v32072_v55 }
 0x4e5   :  { %26208 = vmatmul.mubr.f32.vlgmr.msra.gmra.mrb[32].mxu0 %v31021_v27 }
 0x4e6   :  { %26211 = vmatpush3.msra.mxu0 %v15733_v62  ;;  %26212 = vmatprep.mubr.msk.f32.mxu0 %vm28717_vm0, %v32072_v55 }
 0x4e7   :  { %26215 = vmatprep.subr.mxu0 %v32072_v55 }
 0x4e9   :  { %26238 = vmatmul.mubr.f32.vlgmr.msra.gmra.mrb[32].mxu1 %v31027_v23 }
 0x4ea   :  { %26241 = vmatpush3.msra.mxu1 %v16182_v26  ;;  %26242 = vmatprep.mubr.msk.f32.mxu1 %vm28717_vm0, %v32072_v55  ;;  %v28140_v26 = vadd.f32 %v30914_v29, %v30932_v20 }
 0x4eb   :  { %26245 = vmatprep.subr.mxu1 %v32072_v55 }
 0x4ed   :  { %26213 = vmatmul.mubr.f32.vlgmr.msra.gmra.mrb[32].mxu0 %v15722_v3  ;;  %v31145_v3 = vand.u32 4294901760, %v28140_v26 }
 0x4ee   :  { %26216 = vmatpush3.msra.mxu0 %v30957_v57  ;;  %26217 = vmatprep.mubr.msk.f32.mxu0 %vm28717_vm0, %v32072_v55 }
 0x4ef   :  { %26220 = vmatprep.subr.mxu0 %v32072_v55  ;;  %v31153_v20 = vsub.f32 %v28140_v26, %v31145_v3 }
 0x4f0   :  { %v15620_v17 = vpop.xlane.xlu0 %15619 }
 0x4f1   :  { %26243 = vmatmul.mubr.f32.vlgmr.msra.gmra.mrb[32].mxu1 %v16171_v24  ;;  %28576 = vrcp.f32 %v15620_v17 }
 0x4f2   :  { %26246 = vmatpush3.msra.mxu1 %v30961_v32  ;;  %26247 = vmatprep.mubr.msk.f32.mxu1 %vm28717_vm0, %v32072_v55 }
 0x4f3   :  { %26250 = vmatprep.subr.mxu1 %v32072_v55 }
 0x4f4   :  { %v15623_v0 = vpop.xlane.xlu0 %15622 }
 0x4f5   :  { %26218 = vmatmul.mubr.f32.vlgmr.msra.gmra.mrb[32].mxu0 %v15723_v6  ;;  %28578 = vrcp.f32 %v15623_v0  ;;  %v31155_v6 = vand.u32 4294901760, %v28141_v4 }
 0x4f6   :  { %26221 = vmatpush3.msra.mxu0 %v15734_v10  ;;  %26222 = vmatprep.mubr.msk.f32.mxu0 %vm28717_vm0, %v32072_v55 }
 0x4f7   :  { %26225 = vmatprep.subr.mxu0 %v32072_v55  ;;  %v31168_v53 = vsub.f32 %v28141_v4, %v31155_v6 }
 0x4f9   :  { %26248 = vmatmul.mubr.f32.vlgmr.msra.gmra.mrb[32].mxu1 %v16172_v42 }
 0x4fa   :  { %26251 = vmatpush3.msra.mxu1 %v16183_v60  ;;  %26252 = vmatprep.mubr.msk.f32.mxu1 %vm28717_vm0, %v32072_v55  ;;  %v17530_v60 = vand.u32 4294901760, %v31153_v20 }
 0x4fb   :  { %26255 = vmatprep.subr.mxu1 %v32072_v55  ;;  %v28577_v30 = vpop.eup %28576 }
 0x4fc   :  { %v15646_v2 = vmul.f32 %v28577_v30, %v30994_v52  ;;  %v17531_v59 = vsub.f32 %v31153_v20, %v17530_v60  ;;  %v28142_v30 = vadd.f32 %v30972_v39, %v31051_v45 }
 0x4fd   :  { %26223 = vmatmul.mubr.f32.vlgmr.msra.gmra.mrb[32].mxu0 %v31021_v27 }
 0x4fe   :  { %26226 = vmatpush3.msra.mxu0 %v30957_v57  ;;  %26227 = vmatprep.mubr.msk.f32.mxu0 %vm28717_vm0, %v32072_v55  ;;  %v16551_v48 = vsel %vm15563_vm3, %v15646_v2, 0  ;;  %v17532_v17 = vand.u32 4294901760, %v17531_v59  ;;  %v28143_v2 = vadd.f32 %v30974_v25, %v31062_v14 }
 0x4ff   :  { %26260 = vmatprep.subr.mxu0 %v32072_v55  ;;  %v28579_v61 = vpop.eup %28578  ;;  %v31086_v40 = vand.u32 4294901760, %v16551_v48 }
 0x500   :  { %v15647_v52 = vmul.f32 %v28579_v61, %v30998_v9  ;;  %v17081_v9 = vand.u32 4294901760, %v31090_v28 }
 0x501   :  { %26253 = vmatmul.mubr.f32.vlgmr.msra.gmra.mrb[32].mxu1 %v31027_v23  ;;  %v16620_v57 = vsub.f32 %v16551_v48, %v31086_v40  ;;  %v31233_v48 = vand.u32 4294901760, %v28143_v2 }
 0x502   :  { %26256 = vmatpush3.msra.mxu1 %v30961_v32  ;;  %26257 = vmatprep.mubr.msk.f32.mxu1 %vm28717_vm0, %v32072_v55  ;;  %v17000_v33 = vsel %vm15563_vm3, %v15647_v52, 0  ;;  %v17082_v62 = vsub.f32 %v31090_v28, %v17081_v9 }
 0x503   :  { %26290 = vmatprep.subr.mxu1 %v32072_v55  ;;  %v16621_v43 = vand.u32 4294901760, %v16620_v57  ;;  %v31100_v1 = vand.u32 4294901760, %v17000_v33 }
 0x505   :  { %26228 = vmatmul.mubr.f32.vlgmr.msra.gmra.mrb[32].mxu0 %v31021_v27  ;;  %v16622_v32 = vsub.f32 %v16620_v57, %v16621_v43  ;;  %v17069_v47 = vsub.f32 %v17000_v33, %v31100_v1  ;;  %v17083_v27 = vand.u32 4294901760, %v17082_v62  ;;  %v19254_v62 = vand.u32 4294901760, %v31265_v44 }
 0x506   :  { %26261 = vmatpush3.msra.mxu0 %v31067_v19  ;;  %26262 = vmatprep.mubr.msk.f32.mxu0 %vm28717_vm0, %v32072_v55 }
 0x507   :  { %26265 = vmatprep.subr.mxu0 %v32072_v55  ;;  %v16623_v18 = vand.u32 4294901760, %v16622_v32  ;;  %v17070_v54 = vand.u32 4294901760, %v17069_v47  ;;  %v19342_v26 = vsub.f32 %v31265_v44, %v19254_v62 }
 0x509   :  { %26258 = vmatmul.mubr.f32.vlgmr.msra.gmra.mrb[32].mxu1 %v31027_v23  ;;  %26263 = vmatmul.mubr.f32.vlgmr.msra.gmra.mrb[34].mxu0 %v16623_v18  ;;  %v17071_v31 = vsub.f32 %v17069_v47, %v17070_v54 }
 0x50a   :  { %26291 = vmatpush3.msra.mxu1 %v31077_v46  ;;  %26266 = vmatpush3.msra.mxu0 %v16634_v38 }
 0x50b   :  { %26292 = vmatprep.mubr.msk.f32.mxu1 %vm28717_vm0, %v32072_v55  ;;  %26295 = vmatprep.subr.mxu1 %v32072_v55  ;;  %v17072_v36 = vand.u32 4294901760, %v17071_v31 }
 0x50c   :  { %26267 = vmatprep.mubr.msk.f32.mxu0 %vm28717_vm0, %v32072_v55  ;;  %26270 = vmatprep.subr.mxu0 %v32072_v55 }
 0x50d   :  { %26293 = vmatmul.mubr.f32.vlgmr.msra.gmra.mrb[34].mxu1 %v17072_v36 }
 0x50e   :  { %26296 = vmatpush3.msra.mxu1 %v17083_v27  ;;  %26297 = vmatprep.mubr.msk.f32.mxu1 %vm28717_vm0, %v32072_v55 }
 0x50f   :  { %26300 = vmatprep.subr.mxu1 %v32072_v55 }
 0x511   :  { %26268 = vmatmul.mubr.f32.vlgmr.msra.gmra.mrb[34].mxu0 %v31086_v40 }
 0x512   :  { %26271 = vmatpush3.msra.mxu0 %v31075_v5  ;;  %26272 = vmatprep.mubr.msk.f32.mxu0 %vm28717_vm0, %v32072_v55 }
 0x513   :  { %26275 = vmatprep.subr.mxu0 %v32072_v55 }
 0x515   :  { %26298 = vmatmul.mubr.f32.vlgmr.msra.gmra.mrb[34].mxu1 %v31100_v1 }
 0x516   :  { %26301 = vmatpush3.msra.mxu1 %v31090_v28  ;;  %26302 = vmatprep.mubr.msk.f32.mxu1 %vm28717_vm0, %v32072_v55  ;;  %v31246_v28 = vsub.f32 %v28143_v2, %v31233_v48 }
 0x517   :  { %26305 = vmatprep.subr.mxu1 %v32072_v55 }
 0x519   :  { %26273 = vmatmul.mubr.f32.vlgmr.msra.gmra.mrb[34].mxu0 %v16620_v57 }
 0x51a   :  { %26276 = vmatpush3.msra.mxu0 %v31067_v19  ;;  %26277 = vmatprep.mubr.msk.f32.mxu0 %vm28717_vm0, %v32072_v55 }
 0x51b   :  { %26280 = vmatprep.subr.mxu0 %v32072_v55 }
 0x51c   :  { %v15626_v10 = vpop.xlane.xlu0 %15625 }
 0x51d   :  { %28580 = vrcp.f32 %v15626_v10  ;;  %26303 = vmatmul.mubr.f32.vlgmr.msra.gmra.mrb[34].mxu1 %v17069_v47 }
 0x51e   :  { %26306 = vmatpush3.msra.mxu1 %v31077_v46  ;;  %26307 = vmatprep.mubr.msk.f32.mxu1 %vm28717_vm0, %v32072_v55 }
 0x51f   :  { %26310 = vmatprep.subr.mxu1 %v32072_v55 }
 0x520   :  { %v15629_v21 = vpop.xlane.xlu1 %15628 }
 0x521   :  { %28582 = vrcp.f32 %v15629_v21  ;;  %26278 = vmatmul.mubr.f32.vlgmr.msra.gmra.mrb[34].mxu0 %v16621_v43 }
 0x522   :  { %26281 = vmatpush3.msra.mxu0 %v16632_v16  ;;  %26282 = vmatprep.mubr.msk.f32.mxu0 %vm28717_vm0, %v32072_v55 }
 0x523   :  { %26285 = vmatprep.subr.mxu0 %v32072_v55 }
 0x525   :  { %26308 = vmatmul.mubr.f32.vlgmr.msra.gmra.mrb[34].mxu1 %v17070_v54 }
 0x526   :  { %26311 = vmatpush3.msra.mxu1 %v17081_v9  ;;  %26312 = vmatprep.mubr.msk.f32.mxu1 %vm28717_vm0, %v32072_v55  ;;  %v31267_v9 = vld [vmem:[#allocation7 + $0x198] sm:$0xff] }
 0x527   :  { %v28581_v29 = vpop.eup %28580  ;;  %26315 = vmatprep.subr.mxu1 %v32072_v55  ;;  %v19257_v38 = vand.u32 4294901760, %v31267_v9 }
 0x528   :  { %v15648_v23 = vmul.f32 %v28581_v29, %v31002_v49  ;;  %v19343_v29 = vand.u32 4294901760, %v19342_v26 }
 0x529   :  { %26283 = vmatmul.mubr.f32.vlgmr.msra.gmra.mrb[34].mxu0 %v31086_v40  ;;  %v19349_v21 = vsub.f32 %v31267_v9, %v19257_v38 }
 0x52a   :  { %26286 = vmatpush3.msra.mxu0 %v31067_v19  ;;  %26287 = vmatprep.mubr.msk.f32.mxu0 %vm28717_vm0, %v32072_v55  ;;  %v17449_v13 = vsel %vm15563_vm3, %v15648_v23, 0  ;;  %v126_v23 = vld [vmem:[#allocation7 + $0x180] sm:$0xff] }
 0x52b   :  { %v28583_v35 = vpop.eup %28582  ;;  %26320 = vmatprep.subr.mxu0 %v32072_v55  ;;  %v31164_v58 = vand.u32 4294901760, %v17449_v13  ;;  %v31295_v4 = vpack.c.bf16 %v19349_v21, %v19342_v26 }
 0x52c   :  { %v15649_v49 = vmul.f32 %v28583_v35, %v31006_v56  ;;  %v17979_v56 = vand.u32 4294901760, %v31168_v53  ;;  %v19248_v35 = vand.u32 4294901760, %v126_v23 }
 0x52d   :  { %26313 = vmatmul.mubr.f32.vlgmr.msra.gmra.mrb[34].mxu1 %v31100_v1  ;;  %v17518_v24 = vsub.f32 %v17449_v13, %v31164_v58  ;;  %v127_v13 = vld [vmem:[#allocation7 + $0x188] sm:$0xff] }
 0x52e   :  { %26316 = vmatpush3.msra.mxu1 %v31077_v46  ;;  %26317 = vmatprep.mubr.msk.f32.mxu1 %vm28717_vm0, %v32072_v55  ;;  %v17898_v7 = vsel %vm15563_vm3, %v15649_v49, 0  ;;  %v17980_v22 = vsub.f32 %v31168_v53, %v17979_v56  ;;  %v31223_v46 = vand.u32 4294901760, %v28142_v30 }
 0x52f   :  { %26350 = vmatprep.subr.mxu1 %v32072_v55  ;;  %v17519_v42 = vand.u32 4294901760, %v17518_v24  ;;  %v31178_v51 = vand.u32 4294901760, %v17898_v7 }
 0x530   :  { %v17981_v19 = vand.u32 4294901760, %v17980_v22  ;;  %v31231_v45 = vsub.f32 %v28142_v30, %v31223_v46 }
 0x531   :  { %26288 = vmatmul.mubr.f32.vlgmr.msra.gmra.mrb[34].mxu0 %v31086_v40  ;;  %v17520_v11 = vsub.f32 %v17518_v24, %v17519_v42  ;;  %v17967_v41 = vsub.f32 %v17898_v7, %v31178_v51 }
 0x532   :  { %26321 = vmatpush3.msra.mxu0 %v31145_v3  ;;  %26322 = vmatprep.mubr.msk.f32.mxu0 %vm28717_vm0, %v32072_v55  ;;  %v18428_v16 = vand.u32 4294901760, %v31231_v45 }
 0x533   :  { %26325 = vmatprep.subr.mxu0 %v32072_v55  ;;  %v17521_v50 = vand.u32 4294901760, %v17520_v11  ;;  %v17968_v12 = vand.u32 4294901760, %v17967_v41 }
 0x535   :  { %26318 = vmatmul.mubr.f32.vlgmr.msra.gmra.mrb[34].mxu1 %v31100_v1  ;;  %26323 = vmatmul.mubr.f32.vlgmr.msra.gmra.mrb[36].mxu0 %v17521_v50  ;;  %v17969_v37 = vsub.f32 %v17967_v41, %v17968_v12  ;;  %v18877_v1 = vand.u32 4294901760, %v31246_v28 }
 0x536   :  { %26326 = vmatpush3.msra.mxu0 %v17532_v17  ;;  %26351 = vmatpush3.msra.mxu1 %v31155_v6  ;;  %v31366_v17 = vpack.c.bf16 %v19257_v38, %v19254_v62 }
 0x537   :  { %26352 = vmatprep.mubr.msk.f32.mxu1 %vm28717_vm0, %v32072_v55  ;;  %26355 = vmatprep.subr.mxu1 %v32072_v55  ;;  %v17970_v0 = vand.u32 4294901760, %v17969_v37  ;;  %v18878_v31 = vsub.f32 %v31246_v28, %v18877_v1 }
 0x538   :  { %26327 = vmatprep.mubr.msk.f32.mxu0 %vm28717_vm0, %v32072_v55  ;;  %26330 = vmatprep.subr.mxu0 %v32072_v55 }
 0x539   :  { %26353 = vmatmul.mubr.f32.vlgmr.msra.gmra.mrb[36].mxu1 %v17970_v0  ;;  %v31379_v0 = vld [vmem:[#allocation7 + $0x1a0] sm:$0xff] }
 0x53a   :  { %26356 = vmatpush3.msra.mxu1 %v17981_v19  ;;  %26357 = vmatprep.mubr.msk.f32.mxu1 %vm28717_vm0, %v32072_v55  ;;  %v31381_v19 = vld [vmem:[#allocation7 + $0x1a8] sm:$0xff] }
 0x53b   :  { %26360 = vmatprep.subr.mxu1 %v32072_v55  ;;  %v19739_v30 = vand.u32 4294901760, %v31381_v19 }
 0x53d   :  { %26328 = vmatmul.mubr.f32.vlgmr.msra.gmra.mrb[36].mxu0 %v31164_v58 }
 0x53e   :  { %26331 = vmatpush3.msra.mxu0 %v31153_v20  ;;  %26332 = vmatprep.mubr.msk.f32.mxu0 %vm28717_vm0, %v32072_v55  ;;  %v19350_v20 = vand.u32 4294901760, %v19349_v21 }
 0x53f   :  { %26335 = vmatprep.subr.mxu0 %v32072_v55 }
 0x540   :  { %v19351_v11 = vsub.f32 %v19349_v21, %v19350_v20 }
 0x541   :  { %26358 = vmatmul.mubr.f32.vlgmr.msra.gmra.mrb[36].mxu1 %v31178_v51 }
 0x542   :  { %26361 = vmatpush3.msra.mxu1 %v31168_v53  ;;  %26362 = vmatprep.mubr.msk.f32.mxu1 %vm28717_vm0, %v32072_v55  ;;  %v19352_v22 = vand.u32 4294901760, %v19351_v11 }
 0x543   :  { %26365 = vmatprep.subr.mxu1 %v32072_v55 }
 0x545   :  { %26333 = vmatmul.mubr.f32.vlgmr.msra.gmra.mrb[36].mxu0 %v17518_v24 }
 0x546   :  { %26336 = vmatpush3.msra.mxu0 %v31145_v3  ;;  %26337 = vmatprep.mubr.msk.f32.mxu0 %vm28717_vm0, %v32072_v55 }
 0x547   :  { %26340 = vmatprep.subr.mxu0 %v32072_v55 }
 0x548   :  { %v15632_v15 = vpop.xlane.xlu0 %15631 }
 0x549   :  { %28584 = vrcp.f32 %v15632_v15  ;;  %26363 = vmatmul.mubr.f32.vlgmr.msra.gmra.mrb[36].mxu1 %v17967_v41  ;;  %v19736_v15 = vand.u32 4294901760, %v31379_v0 }
 0x54a   :  { %26366 = vmatpush3.msra.mxu1 %v31155_v6  ;;  %26367 = vmatprep.mubr.msk.f32.mxu1 %vm28717_vm0, %v32072_v55 }
 0x54b   :  { %26370 = vmatprep.subr.mxu1 %v32072_v55 }
 0x54c   :  { %v15635_v5 = vpop.xlane.xlu1 %15634 }
 0x54d   :  { %28586 = vrcp.f32 %v15635_v5  ;;  %26338 = vmatmul.mubr.f32.vlgmr.msra.gmra.mrb[36].mxu0 %v17519_v42  ;;  %v31385_v5 = vld [vmem:[#allocation7 + $0x1b0] sm:$0xff] }
 0x54e   :  { %26341 = vmatpush3.msra.mxu0 %v17530_v60  ;;  %26342 = vmatprep.mubr.msk.f32.mxu0 %vm28717_vm0, %v32072_v55  ;;  %v31321_v60 = vsub.f32 %v126_v23, %v19248_v35  ;;  %v31467_v23 = vld [vmem:[#allocation7 + $0x1c8] sm:$0xff] }
 0x54f   :  { %26345 = vmatprep.subr.mxu0 %v32072_v55 }
 0x550   :  { %v19329_v49 = vand.u32 4294901760, %v31321_v60 }
 0x551   :  { %26368 = vmatmul.mubr.f32.vlgmr.msra.gmra.mrb[36].mxu1 %v17968_v12 }
 0x552   :  { %26371 = vmatpush3.msra.mxu1 %v17979_v56  ;;  %26372 = vmatprep.mubr.msk.f32.mxu1 %vm28717_vm0, %v32072_v55  ;;  %v19330_v7 = vsub.f32 %v31321_v60, %v19329_v49  ;;  %v19344_v56 = vsub.f32 %v19342_v26, %v19343_v29 }
 0x553   :  { %v28585_v39 = vpop.eup %28584  ;;  %26375 = vmatprep.subr.mxu1 %v32072_v55 }
 0x554   :  { %v15650_v61 = vmul.f32 %v28585_v39, %v31010_v34  ;;  %v19345_v12 = vand.u32 4294901760, %v19344_v56  ;;  %v31392_v39 = vsub.f32 %v31379_v0, %v19736_v15 }
 0x555   :  { %26343 = vmatmul.mubr.f32.vlgmr.msra.gmra.mrb[36].mxu0 %v31164_v58 }
 0x556   :  { %26346 = vmatpush3.msra.mxu0 %v31145_v3  ;;  %26347 = vmatprep.mubr.msk.f32.mxu0 %vm28717_vm0, %v32072_v55  ;;  %v18347_v25 = vsel %vm15563_vm3, %v15650_v61, 0  ;;  %v18879_v3 = vand.u32 4294901760, %v18878_v31  ;;  %v31370_v37 = vpack.c.bf16 %v19352_v22, %v19345_v12  ;;  %v31398_v61 = vsub.f32 %v31381_v19, %v19739_v30 }
 0x557   :  { %v28587_v14 = vpop.eup %28586  ;;  %26380 = vmatprep.subr.mxu0 %v32072_v55  ;;  %v31242_v40 = vand.u32 4294901760, %v18347_v25 }
 0x558   :  { %v15651_v34 = vmul.f32 %v28587_v14, %v31014_v63  ;;  %v18429_v63 = vsub.f32 %v31231_v45, %v18428_v16 }
 0x559   :  { %26373 = vmatmul.mubr.f32.vlgmr.msra.gmra.mrb[36].mxu1 %v31178_v51  ;;  %v31251_v52 = vsub.f32 %v18347_v25, %v31242_v40  ;;  %v19742_v25 = vand.u32 4294901760, %v31385_v5 }
 0x55a   :  { %26376 = vmatpush3.msra.mxu1 %v31155_v6  ;;  %26377 = vmatprep.mubr.msk.f32.mxu1 %vm28717_vm0, %v32072_v55  ;;  %v18796_v57 = vsel %vm15563_vm3, %v15651_v34, 0  ;;  %v18430_v36 = vand.u32 4294901760, %v18429_v63  ;;  %v31306_v6 = vpack.c.bf16 %v19350_v20, %v19343_v29  ;;  %v31465_v20 = vld [vmem:[#allocation7 + $0x1c0] sm:$0xff] }
 0x55b   :  { %26410 = vmatprep.subr.mxu1 %v32072_v55  ;;  %v18417_v33 = vand.u32 4294901760, %v31251_v52  ;;  %v31259_v43 = vand.u32 4294901760, %v18796_v57 }
 0x55d   :  { %26348 = vmatmul.mubr.f32.vlgmr.msra.gmra.mrb[36].mxu0 %v31164_v58  ;;  %v18418_v32 = vsub.f32 %v31251_v52, %v18417_v33  ;;  %v18865_v47 = vsub.f32 %v18796_v57, %v31259_v43  ;;  %v19251_v58 = vand.u32 4294901760, %v127_v13  ;;  %v19824_v57 = vand.u32 4294901760, %v31398_v61 }
 0x55e   :  { %26381 = vmatpush3.msra.mxu0 %v31223_v46  ;;  %26382 = vmatprep.mubr.msk.f32.mxu0 %vm28717_vm0, %v32072_v55 }
 0x55f   :  { %26385 = vmatprep.subr.mxu0 %v32072_v55  ;;  %v18419_v18 = vand.u32 4294901760, %v18418_v32  ;;  %v18866_v54 = vand.u32 4294901760, %v18865_v47  ;;  %v31327_v53 = vsub.f32 %v127_v13, %v19251_v58  ;;  %v31352_v41 = vpack.c.bf16 %v19251_v58, %v19248_v35 }
 0x560   :  { %v19825_v32 = vsub.f32 %v31398_v61, %v19824_v57  ;;  %v20224_v35 = vand.u32 4294901760, %v31465_v20  ;;  %v20227_v58 = vand.u32 4294901760, %v31467_v23 }
 0x561   :  { %26378 = vmatmul.mubr.f32.vlgmr.msra.gmra.mrb[36].mxu1 %v31178_v51  ;;  %26383 = vmatmul.mubr.f32.vlgmr.msra.gmra.mrb[38].mxu0 %v18419_v18  ;;  %v18867_v27 = vsub.f32 %v18865_v47, %v18866_v54  ;;  %v19336_v24 = vand.u32 4294901760, %v31327_v53  ;;  %v19331_v51 = vand.u32 4294901760, %v19330_v7  ;;  %v31424_v44 = vpack.c.bf16 %v31327_v53, %v31321_v60 }
 0x562   :  { %26386 = vmatpush3.msra.mxu0 %v18430_v36  ;;  %26411 = vmatpush3.msra.mxu1 %v31233_v48  ;;  %v19826_v38 = vand.u32 4294901760, %v19825_v32  ;;  %v31500_v7 = vsub.f32 %v31465_v20, %v20224_v35  ;;  %v31585_v32 = vld [vmem:[#allocation7 + $0x1e0] sm:$0xff] }
 0x563   :  { %26412 = vmatprep.mubr.msk.f32.mxu1 %vm28717_vm0, %v32072_v55  ;;  %26415 = vmatprep.subr.mxu1 %v32072_v55  ;;  %v18868_v10 = vand.u32 4294901760, %v18867_v27  ;;  %v19337_v42 = vsub.f32 %v31327_v53, %v19336_v24  ;;  %v31481_v53 = vld [vmem:[#allocation7 + $0x1d0] sm:$0xff] }
 0x564   :  { %26387 = vmatprep.mubr.msk.f32.mxu0 %vm28717_vm0, %v32072_v55  ;;  %26390 = vmatprep.subr.mxu0 %v32072_v55  ;;  %v20305_v12 = vand.u32 4294901760, %v31500_v7 }
 0x565   :  { %26413 = vmatmul.mubr.f32.vlgmr.msra.gmra.mrb[38].mxu1 %v18868_v10  ;;  %v19338_v59 = vand.u32 4294901760, %v19337_v42  ;;  %v31457_v10 = vpack.c.bf16 %v19336_v24, %v19329_v49  ;;  %v31483_v49 = vld [vmem:[#allocation7 + $0x1d8] sm:$0xff]  ;;  %v31493_v24 = vpack.c.bf16 %v19739_v30, %v19736_v15  ;;  %v31505_v42 = vsub.f32 %v31467_v23, %v20227_v58 }
 0x566   :  { %26416 = vmatpush3.msra.mxu1 %v18879_v3  ;;  %26417 = vmatprep.mubr.msk.f32.mxu1 %vm28717_vm0, %v32072_v55  ;;  %v31543_v30 = vpack.c.bf16 %v31398_v61, %v31392_v39 }
 0x567   :  { %26420 = vmatprep.subr.mxu1 %v32072_v55  ;;  %v31356_v50 = vpack.c.bf16 %v19338_v59, %v19331_v51  ;;  %v20230_v51 = vand.u32 4294901760, %v31481_v53  ;;  %v20233_v59 = vand.u32 4294901760, %v31483_v49  ;;  %v20312_v22 = vand.u32 4294901760, %v31505_v42 }
 0x569   :  { %26388 = vmatmul.mubr.f32.vlgmr.msra.gmra.mrb[38].mxu0 %v31242_v40  ;;  %v31527_v0 = vsub.f32 %v31481_v53, %v20230_v51  ;;  %v31532_v19 = vsub.f32 %v31483_v49, %v20233_v59 }
 0x56a   :  { %26391 = vmatpush3.msra.mxu0 %v31231_v45  ;;  %26392 = vmatprep.mubr.msk.f32.mxu0 %vm28717_vm0, %v32072_v55 }
 0x56b   :  { %26395 = vmatprep.subr.mxu0 %v32072_v55 }
 0x56d   :  { %26418 = vmatmul.mubr.f32.vlgmr.msra.gmra.mrb[38].mxu1 %v31259_v43 }
 0x56e   :  { %26421 = vmatpush3.msra.mxu1 %v31246_v28  ;;  %26422 = vmatprep.mubr.msk.f32.mxu1 %vm28717_vm0, %v32072_v55 }
 0x56f   :  { %26425 = vmatprep.subr.mxu1 %v32072_v55 }
 0x571   :  { %26393 = vmatmul.mubr.f32.vlgmr.msra.gmra.mrb[38].mxu0 %v31251_v52  ;;  %v19817_v52 = vand.u32 4294901760, %v31392_v39 }
 0x572   :  { %26396 = vmatpush3.msra.mxu0 %v31223_v46  ;;  %26397 = vmatprep.mubr.msk.f32.mxu0 %vm28717_vm0, %v32072_v55 }
 0x573   :  { %26400 = vmatprep.subr.mxu0 %v32072_v55  ;;  %v19818_v9 = vsub.f32 %v31392_v39, %v19817_v52  ;;  %v20712_v39 = vand.u32 4294901760, %v31585_v32 }
 0x575   :  { %26423 = vmatmul.mubr.f32.vlgmr.msra.gmra.mrb[38].mxu1 %v18865_v47  ;;  %v19819_v62 = vand.u32 4294901760, %v19818_v9 }
 0x576   :  { %26426 = vmatpush3.msra.mxu1 %v31233_v48  ;;  %26427 = vmatprep.mubr.msk.f32.mxu1 %vm28717_vm0, %v32072_v55 }
 0x577   :  { %26430 = vmatprep.subr.mxu1 %v32072_v55  ;;  %v31459_v26 = vpack.c.bf16 %v19826_v38, %v19819_v62 }
 0x579   :  { %26398 = vmatmul.mubr.f32.vlgmr.msra.gmra.mrb[38].mxu0 %v18417_v33  ;;  %v31414_v33 = vsub.f32 %v31385_v5, %v19742_v25  ;;  %v20306_v5 = vsub.f32 %v31500_v7, %v20305_v12 }
 0x57a   :  { %26401 = vmatpush3.msra.mxu0 %v18428_v16  ;;  %26402 = vmatprep.mubr.msk.f32.mxu0 %vm28717_vm0, %v32072_v55 }
 0x57b   :  { %26405 = vmatprep.subr.mxu0 %v32072_v55  ;;  %v19831_v47 = vand.u32 4294901760, %v31414_v33 }
 0x57d   :  { %26428 = vmatmul.mubr.f32.vlgmr.msra.gmra.mrb[38].mxu1 %v18866_v54  ;;  %v19832_v31 = vsub.f32 %v31414_v33, %v19831_v47 }
 0x57e   :  { %26431 = vmatpush3.msra.mxu1 %v18877_v1  ;;  %26432 = vmatprep.mubr.msk.f32.mxu1 %vm28717_vm0, %v32072_v55 }
 0x57f   :  { %26435 = vmatprep.subr.mxu1 %v32072_v55  ;;  %v19833_v21 = vand.u32 4294901760, %v19832_v31 }
 0x581   :  { %26403 = vmatmul.mubr.f32.vlgmr.msra.gmra.mrb[38].mxu0 %v31242_v40 }
 0x582   :  { %26406 = vmatpush3.msra.mxu0 %v31223_v46  ;;  %26407 = vmatprep.mubr.msk.f32.mxu0 %vm28717_vm0, %v32072_v55  ;;  %v31387_v46 = vld [vmem:[#allocation7 + $0x1b8] sm:$0xff] }
 0x583   :  { %27832 = vmatprep.subr.bf16.mxu0 %v32100_v8  ;;  %v19745_v14 = vand.u32 4294901760, %v31387_v46 }
 0x585   :  { %26433 = vmatmul.mubr.f32.vlgmr.msra.gmra.mrb[38].mxu1 %v31259_v43  ;;  %v31518_v11 = vpack.c.bf16 %v19745_v14, %v19742_v25 }
 0x586   :  { %26436 = vmatpush3.msra.mxu1 %v31233_v48  ;;  %26437 = vmatprep.mubr.msk.f32.mxu1 %vm28717_vm0, %v32072_v55 }
 0x587   :  { %27838 = vmatprep.subr.bf16.mxu1 %v32100_v8 }
 0x589   :  { %26408 = vmatmul.mubr.f32.vlgmr.msra.gmra.mrb[38].mxu0 %v31242_v40 }
 0x58a   :  { %27834 = vmatpush3.bf16.msra.mxu0 %v31352_v41  ;;  %26448 = vmatprep.mubr.msk.f32.mxu0 %vm28717_vm0, %v32072_v55 }
 0x58b   :  { %27835 = vmatprep.subr.bf16.mxu0 %v32100_v8 }
 0x58d   :  { %26438 = vmatmul.mubr.f32.vlgmr.msra.gmra.mrb[38].mxu1 %v31259_v43  ;;  %v31419_v43 = vsub.f32 %v31387_v46, %v19745_v14  ;;  %v20313_v46 = vsub.f32 %v31505_v42, %v20312_v22  ;;  %v20307_v14 = vand.u32 4294901760, %v20306_v5 }
 0x58e   :  { %27840 = vmatpush3.bf16.msra.mxu1 %v31356_v50  ;;  %26459 = vmatprep.mubr.msk.f32.mxu1 %vm28717_vm0, %v32072_v55 }
 0x58f   :  { %27841 = vmatprep.subr.bf16.mxu1 %v32100_v8  ;;  %27837 = vmatpush3.bf16.msra.mxu0 %v31366_v17  ;;  %v19838_v18 = vand.u32 4294901760, %v31419_v43  ;;  %v31559_v25 = vpack.c.bf16 %v31419_v43, %v31414_v33 }
 0x590   :  { %27844 = vmatprep.subr.bf16.mxu0 %v32100_v8 }
 0x591   :  { %v19839_v36 = vsub.f32 %v31419_v43, %v19838_v18  ;;  %v31622_v43 = vpack.c.bf16 %v20227_v58, %v20224_v35 }
 0x592   :  { %27843 = vmatpush3.bf16.msra.mxu1 %v31370_v37 }
 0x593   :  { %27850 = vmatprep.subr.bf16.mxu1 %v32100_v8  ;;  %v19840_v3 = vand.u32 4294901760, %v19839_v36  ;;  %v31608_v36 = vld [vmem:[#allocation7 + $0x1f0] sm:$0xff] }
 0x594   :  { %v20718_v20 = vand.u32 4294901760, %v31608_v36 }
 0x595   :  { %v31472_v13 = vpack.c.bf16 %v19840_v3, %v19833_v21 }
 0x5d8   :  { %v16097_v2 = vpop.f32.mrb[32].mxu0 }
 0x5d9   :  { %v19245_v45 = vsel %vm282_vm1, %v16097_v2, 0  ;;  %v26229_v48 = vpop.f32.mrb[33].mxu0  ;;  %v20319_v2 = vand.u32 4294901760, %v31527_v0 }
 0x5da   :  { %v31402_v40 = vand.u32 4294901760, %v19245_v45 }
 0x5dc   :  { %v19317_v16 = vsub.f32 %v19245_v45, %v31402_v40  ;;  %v16546_v28 = vpop.f32.mrb[32].mxu1  ;;  %26460 = vmatmul.mubr.f32.vlgmr.msra.gmra.mrb[40].mxu1 %v31402_v40  ;;  %v20326_v45 = vand.u32 4294901760, %v31532_v19 }
 0x5dd   :  { %27852 = vmatpush3.bf16.msra.mxu1 %v31352_v41  ;;  %v26259_v34 = vpop.f32.mrb[33].mxu1  ;;  %26481 = vmatprep.mubr.msk.f32.mxu1 %vm28717_vm0, %v32072_v55  ;;  %v19733_v27 = vsel %vm282_vm1, %v16546_v28, 0 }
 0x5de   :  { %v19318_v63 = vand.u32 4294901760, %v19317_v16  ;;  %27853 = vmatprep.subr.bf16.mxu1 %v32100_v8  ;;  %v31461_v29 = vand.u32 4294901760, %v19733_v27  ;;  %v20327_v28 = vsub.f32 %v31532_v19, %v20326_v45  ;;  %v31581_v34 = vpack.c.bf16 %v19824_v57, %v19817_v52 }
 0x5df   :  { %v31600_v52 = vpack.c.bf16 %v19838_v18, %v19831_v47  ;;  %v31627_v47 = vsub.f32 %v31585_v32, %v20712_v39 }
 0x5e0   :  { %v19319_v1 = vsub.f32 %v19317_v16, %v19318_v63  ;;  %v31477_v60 = vsub.f32 %v19733_v27, %v31461_v29  ;;  %v20328_v9 = vand.u32 4294901760, %v20327_v28  ;;  %v31610_v27 = vld [vmem:[#allocation7 + $0x1f8] sm:$0xff] }
 0x5e1   :  { %27855 = vmatpush3.bf16.msra.mxu1 %v31366_v17  ;;  %v20721_v23 = vand.u32 4294901760, %v31610_v27 }
 0x5e2   :  { %v19320_v54 = vand.u32 4294901760, %v19319_v1  ;;  %27862 = vmatprep.subr.bf16.mxu1 %v32100_v8  ;;  %v19806_v56 = vand.u32 4294901760, %v31477_v60 }
 0x5e3   :  { %v31661_v53 = vsub.f32 %v31610_v27, %v20721_v23 }
 0x5e4   :  { %26482 = vmatmul.mubr.f32.vlgmr.msra.gmra.mrb[42].mxu1 %v19318_v63  ;;  %26449 = vmatmul.mubr.f32.vlgmr.msra.gmra.mrb[40].mxu0 %v19320_v54  ;;  %v19807_v15 = vsub.f32 %v31477_v60, %v19806_v56  ;;  %v31589_v54 = vld [vmem:[#allocation7 + $0x1e8] sm:$0xff] }
 0x5e5   :  { %27846 = vmatpush3.bf16.msra.mxu0 %v31424_v44  ;;  %27864 = vmatpush3.bf16.msra.mxu1 %v31352_v41  ;;  %v20715_v62 = vand.u32 4294901760, %v31589_v54 }
 0x5e6   :  { %27847 = vmatprep.subr.bf16.mxu0 %v32100_v8  ;;  %27865 = vmatprep.subr.bf16.mxu1 %v32100_v8  ;;  %v19808_v48 = vand.u32 4294901760, %v19807_v15 }
 0x5e7   :  { %26470 = vmatprep.mubr.msk.f32.mxu0 %vm28717_vm0, %v32072_v55  ;;  %26503 = vmatprep.mubr.msk.f32.mxu1 %vm28717_vm0, %v32072_v55  ;;  %v31635_v3 = vsub.f32 %v31589_v54, %v20715_v62 }
 0x5e9   :  { %27849 = vmatpush3.bf16.msra.mxu0 %v31295_v4  ;;  %27867 = vmatpush3.bf16.msra.mxu1 %v31366_v17  ;;  %v20800_v15 = vand.u32 4294901760, %v31635_v3 }
 0x5ea   :  { %27856 = vmatprep.subr.bf16.mxu0 %v32100_v8  ;;  %27874 = vmatprep.subr.bf16.mxu1 %v32100_v8 }
 0x5eb   :  { %v20801_v5 = vsub.f32 %v31635_v3, %v20800_v15 }
 0x5ec   :  { %26471 = vmatmul.mubr.f32.vlgmr.msra.gmra.mrb[42].mxu0 %v19317_v16  ;;  %26504 = vmatmul.mubr.f32.vlgmr.msra.gmra.mrb[44].mxu1 %v31402_v40  ;;  %v20320_v16 = vsub.f32 %v31527_v0, %v20319_v2 }
 0x5ed   :  { %27858 = vmatpush3.bf16.msra.mxu0 %v31457_v10  ;;  %27876 = vmatpush3.bf16.msra.mxu1 %v31459_v26  ;;  %v20802_v28 = vand.u32 4294901760, %v20801_v5 }
 0x5ee   :  { %27859 = vmatprep.subr.bf16.mxu0 %v32100_v8  ;;  %27877 = vmatprep.subr.bf16.mxu1 %v32100_v8  ;;  %v20321_v1 = vand.u32 4294901760, %v20320_v16 }
 0x5ef   :  { %26492 = vmatprep.mubr.msk.f32.mxu0 %vm28717_vm0, %v32072_v55  ;;  %26525 = vmatprep.mubr.msk.f32.mxu1 %vm28717_vm0, %v32072_v55 }
 0x5f0   :  { %v31602_v57 = vpack.c.bf16 %v20328_v9, %v20321_v1 }
 0x5f1   :  { %27861 = vmatpush3.bf16.msra.mxu0 %v31306_v6  ;;  %27879 = vmatpush3.bf16.msra.mxu1 %v31472_v13 }
 0x5f2   :  { %27868 = vmatprep.subr.bf16.mxu0 %v32100_v8  ;;  %27886 = vmatprep.subr.bf16.mxu1 %v32100_v8 }
 0x5f4   :  { %26493 = vmatmul.mubr.f32.vlgmr.msra.gmra.mrb[44].mxu0 %v31402_v40  ;;  %26526 = vmatmul.mubr.f32.vlgmr.msra.gmra.mrb[46].mxu1 %v31461_v29  ;;  %v20314_v40 = vand.u32 4294901760, %v20313_v46 }
 0x5f5   :  { %27870 = vmatpush3.bf16.msra.mxu0 %v31493_v24  ;;  %27888 = vmatpush3.bf16.msra.mxu1 %v31493_v24 }
 0x5f6   :  { %27871 = vmatprep.subr.bf16.mxu0 %v32100_v8  ;;  %27889 = vmatprep.subr.bf16.mxu1 %v32100_v8  ;;  %v31583_v63 = vpack.c.bf16 %v20314_v40, %v20307_v14  ;;  %v31687_v40 = vpack.c.bf16 %v31532_v19, %v31527_v0  ;;  %v31754_v19 = vpack.c.bf16 %v20721_v23, %v20718_v20 }
 0x5f7   :  { %26514 = vmatprep.mubr.msk.f32.mxu0 %vm28717_vm0, %v32072_v55  ;;  %26547 = vmatprep.mubr.msk.f32.mxu1 %vm28717_vm0, %v32072_v55 }
 0x5f9   :  { %27873 = vmatpush3.bf16.msra.mxu0 %v31518_v11  ;;  %27891 = vmatpush3.bf16.msra.mxu1 %v31518_v11 }
 0x5fa   :  { %27880 = vmatprep.subr.bf16.mxu0 %v32100_v8  ;;  %27898 = vmatprep.subr.bf16.mxu1 %v32100_v8 }
 0x5fc   :  { %26515 = vmatmul.mubr.f32.vlgmr.msra.gmra.mrb[46].mxu0 %v19808_v48  ;;  %26548 = vmatmul.mubr.f32.vlgmr.msra.gmra.mrb[48].mxu1 %v19806_v56  ;;  %v20793_v56 = vand.u32 4294901760, %v31627_v47  ;;  %v20814_v48 = vand.u32 4294901760, %v31661_v53 }
 0x5fd   :  { %27882 = vmatpush3.bf16.msra.mxu0 %v31543_v30  ;;  %27900 = vmatpush3.bf16.msra.mxu1 %v31493_v24 }
 0x5fe   :  { %27883 = vmatprep.subr.bf16.mxu0 %v32100_v8  ;;  %27901 = vmatprep.subr.bf16.mxu1 %v32100_v8  ;;  %v20815_v9 = vsub.f32 %v31661_v53, %v20814_v48 }
 0x5ff   :  { %26536 = vmatprep.mubr.msk.f32.mxu0 %vm28717_vm0, %v32072_v55  ;;  %26569 = vmatprep.mubr.msk.f32.mxu1 %vm28717_vm0, %v32072_v55 }
 0x601   :  { %27885 = vmatpush3.bf16.msra.mxu0 %v31559_v25  ;;  %27903 = vmatpush3.bf16.msra.mxu1 %v31518_v11 }
 0x602   :  { %27892 = vmatprep.subr.bf16.mxu0 %v32100_v8  ;;  %27910 = vmatprep.subr.bf16.mxu1 %v32100_v8 }
 0x604   :  { %26537 = vmatmul.mubr.f32.vlgmr.msra.gmra.mrb[48].mxu0 %v31477_v60  ;;  %26570 = vmatmul.mubr.f32.vlgmr.msra.gmra.mrb[50].mxu1 %v31461_v29  ;;  %v16995_v61 = vpop.f32.mrb[34].mxu0  ;;  %v31647_v60 = vpack.c.bf16 %v20233_v59, %v20230_v51  ;;  %v31671_v51 = vpack.c.bf16 %v31505_v42, %v31500_v7  ;;  %v20794_v59 = vsub.f32 %v31627_v47, %v20793_v56 }
 0x605   :  { %27894 = vmatpush3.bf16.msra.mxu0 %v31581_v34  ;;  %27912 = vmatpush3.bf16.msra.mxu1 %v31583_v63  ;;  %v20221_v38 = vsel %vm282_vm1, %v16995_v61, 0  ;;  %v26289_v31 = vpop.f32.mrb[35].mxu0  ;;  %v31725_v7 = vpack.c.bf16 %v20326_v45, %v20319_v2  ;;  %v31766_v45 = vpack.c.bf16 %v31635_v3, %v31627_v47 }
 0x606   :  { %27895 = vmatprep.subr.bf16.mxu0 %v32100_v8  ;;  %27913 = vmatprep.subr.bf16.mxu1 %v32100_v8  ;;  %v31612_v33 = vand.u32 4294901760, %v20221_v38  ;;  %v20795_v16 = vand.u32 4294901760, %v20794_v59 }
 0x607   :  { %26558 = vmatprep.mubr.msk.f32.mxu0 %vm28717_vm0, %v32072_v55  ;;  %26591 = vmatprep.mubr.msk.f32.mxu1 %vm28717_vm0, %v32072_v55 }
 0x608   :  { %v20293_v18 = vsub.f32 %v20221_v38, %v31612_v33  ;;  %v17444_v21 = vpop.f32.mrb[34].mxu1  ;;  %v31710_v38 = vpack.c.bf16 %v20312_v22, %v20305_v12  ;;  %v31712_v31 = vpack.c.bf16 %v20802_v28, %v20795_v16  ;;  %v31742_v22 = vpack.c.bf16 %v20715_v62, %v20712_v39 }
 0x609   :  { %27897 = vmatpush3.bf16.msra.mxu0 %v31600_v52  ;;  %27915 = vmatpush3.bf16.msra.mxu1 %v31602_v57  ;;  %v26319_v35 = vpop.f32.mrb[35].mxu1  ;;  %v20709_v61 = vsel %vm282_vm1, %v17444_v21, 0  ;;  %v20816_v21 = vand.u32 4294901760, %v20815_v9  ;;  %v31788_v62 = vpack.c.bf16 %v20800_v15, %v20793_v56 }
 0x60a   :  { %27904 = vmatprep.subr.bf16.mxu0 %v32100_v8  ;;  %27922 = vmatprep.subr.bf16.mxu1 %v32100_v8  ;;  %v20294_v58 = vand.u32 4294901760, %v20293_v18 }
 0x60c   :  { %26559 = vmatmul.mubr.f32.vlgmr.msra.gmra.mrb[50].mxu0 %v31461_v29  ;;  %26592 = vmatmul.mubr.f32.vlgmr.msra.gmra.mrb[52].mxu1 %v31612_v33  ;;  %v31656_v29 = vsub.f32 %v31608_v36, %v20718_v20  ;;  %v20295_v49 = vsub.f32 %v20293_v18, %v20294_v58 }
 0x60d   :  { %27906 = vmatpush3.bf16.msra.mxu0 %v31622_v43  ;;  %27924 = vmatpush3.bf16.msra.mxu1 %v31622_v43 }
 0x60e   :  { %27907 = vmatprep.subr.bf16.mxu0 %v32100_v8  ;;  %27925 = vmatprep.subr.bf16.mxu1 %v32100_v8  ;;  %v20807_v46 = vand.u32 4294901760, %v31656_v29  ;;  %v20296_v14 = vand.u32 4294901760, %v20295_v49  ;;  %v31774_v54 = vpack.c.bf16 %v31661_v53, %v31656_v29 }
 0x60f   :  { %26580 = vmatprep.mubr.msk.f32.mxu0 %vm28717_vm0, %v32072_v55  ;;  %26613 = vmatprep.mubr.msk.f32.mxu1 %vm28717_vm0, %v32072_v55 }
 0x610   :  { %v20808_v1 = vsub.f32 %v31656_v29, %v20807_v46  ;;  %v31800_v47 = vpack.c.bf16 %v20814_v48, %v20807_v46 }
 0x611   :  { %27909 = vmatpush3.bf16.msra.mxu0 %v31647_v60  ;;  %27927 = vmatpush3.bf16.msra.mxu1 %v31647_v60 }
 0x612   :  { %27916 = vmatprep.subr.bf16.mxu0 %v32100_v8  ;;  %27934 = vmatprep.subr.bf16.mxu1 %v32100_v8  ;;  %v20809_v35 = vand.u32 4294901760, %v20808_v1 }
 0x614   :  { %26581 = vmatmul.mubr.f32.vlgmr.msra.gmra.mrb[52].mxu0 %v20296_v14  ;;  %26614 = vmatmul.mubr.f32.vlgmr.msra.gmra.mrb[54].mxu1 %v20294_v58  ;;  %v31714_v58 = vand.u32 4294901760, %v20709_v61  ;;  %v31727_v42 = vpack.c.bf16 %v20816_v21, %v20809_v35 }
 0x615   :  { %27918 = vmatpush3.bf16.msra.mxu0 %v31671_v51  ;;  %27936 = vmatpush3.bf16.msra.mxu1 %v31622_v43 }
 0x616   :  { %27919 = vmatprep.subr.bf16.mxu0 %v32100_v8  ;;  %27937 = vmatprep.subr.bf16.mxu1 %v32100_v8  ;;  %v20781_v12 = vsub.f32 %v20709_v61, %v31714_v58 }
 0x617   :  { %26602 = vmatprep.mubr.msk.f32.mxu0 %vm28717_vm0, %v32072_v55  ;;  %26635 = vmatprep.mubr.msk.f32.mxu1 %vm28717_vm0, %v32072_v55 }
 0x618   :  { %v20782_v0 = vand.u32 4294901760, %v20781_v12 }
 0x619   :  { %27921 = vmatpush3.bf16.msra.mxu0 %v31687_v40  ;;  %27939 = vmatpush3.bf16.msra.mxu1 %v31647_v60 }
 0x61a   :  { %27928 = vmatprep.subr.bf16.mxu0 %v32100_v8  ;;  %27946 = vmatprep.subr.bf16.mxu1 %v32100_v8  ;;  %v20783_v2 = vsub.f32 %v20781_v12, %v20782_v0 }
 0x61c   :  { %26603 = vmatmul.mubr.f32.vlgmr.msra.gmra.mrb[54].mxu0 %v20293_v18  ;;  %26636 = vmatmul.mubr.f32.vlgmr.msra.gmra.mrb[56].mxu1 %v31612_v33  ;;  %v20784_v32 = vand.u32 4294901760, %v20783_v2 }
 0x61d   :  { %27930 = vmatpush3.bf16.msra.mxu0 %v31710_v38  ;;  %27948 = vmatpush3.bf16.msra.mxu1 %v31712_v31 }
 0x61e   :  { %27931 = vmatprep.subr.bf16.mxu0 %v32100_v8  ;;  %27949 = vmatprep.subr.bf16.mxu1 %v32100_v8 }
 0x61f   :  { %26624 = vmatprep.mubr.msk.f32.mxu0 %vm28717_vm0, %v32072_v55  ;;  %26657 = vmatprep.mubr.msk.f32.mxu1 %vm28717_vm0, %v32072_v55 }
 0x621   :  { %27933 = vmatpush3.bf16.msra.mxu0 %v31725_v7  ;;  %27951 = vmatpush3.bf16.msra.mxu1 %v31727_v42 }
 0x622   :  { %27940 = vmatprep.subr.bf16.mxu0 %v32100_v8  ;;  %27958 = vmatprep.subr.bf16.mxu1 %v32100_v8 }
 0x624   :  { %26625 = vmatmul.mubr.f32.vlgmr.msra.gmra.mrb[56].mxu0 %v31612_v33  ;;  %26658 = vmatmul.mubr.f32.vlgmr.msra.gmra.mrb[58].mxu1 %v31714_v58 }
 0x625   :  { %27942 = vmatpush3.bf16.msra.mxu0 %v31742_v22  ;;  %27960 = vmatpush3.bf16.msra.mxu1 %v31742_v22 }
 0x626   :  { %27943 = vmatprep.subr.bf16.mxu0 %v32100_v8  ;;  %27961 = vmatprep.subr.bf16.mxu1 %v32100_v8 }
 0x627   :  { %26646 = vmatprep.mubr.msk.f32.mxu0 %vm28717_vm0, %v32072_v55  ;;  %26679 = vmatprep.mubr.msk.f32.mxu1 %vm28717_vm0, %v32072_v55 }
 0x629   :  { %27945 = vmatpush3.bf16.msra.mxu0 %v31754_v19  ;;  %27963 = vmatpush3.bf16.msra.mxu1 %v31754_v19 }
 0x62a   :  { %27952 = vmatprep.subr.bf16.mxu0 %v32100_v8  ;;  %27970 = vmatprep.subr.bf16.mxu1 %v32100_v8 }
 0x62c   :  { %26647 = vmatmul.mubr.f32.vlgmr.msra.gmra.mrb[58].mxu0 %v20784_v32  ;;  %26680 = vmatmul.mubr.f32.vlgmr.msra.gmra.mrb[60].mxu1 %v20782_v0 }
 0x62d   :  { %27954 = vmatpush3.bf16.msra.mxu0 %v31766_v45  ;;  %27972 = vmatpush3.bf16.msra.mxu1 %v31742_v22 }
 0x62e   :  { %27955 = vmatprep.subr.bf16.mxu0 %v32100_v8  ;;  %27973 = vmatprep.subr.bf16.mxu1 %v32100_v8 }
 0x62f   :  { %26668 = vmatprep.mubr.msk.f32.mxu0 %vm28717_vm0, %v32072_v55  ;;  %26701 = vmatprep.mubr.msk.f32.mxu1 %vm28717_vm0, %v32072_v55 }
 0x630   :  { %v17893_v39 = vpop.f32.mrb[36].mxu0 }
 0x631   :  { %27957 = vmatpush3.bf16.msra.mxu0 %v31774_v54  ;;  %27975 = vmatpush3.bf16.msra.mxu1 %v31754_v19  ;;  %v21197_v36 = vsel %vm282_vm1, %v17893_v39, 0  ;;  %v26349_v27 = vpop.f32.mrb[37].mxu0 }
 0x632   :  { %27964 = vmatprep.subr.bf16.mxu0 %v32100_v8  ;;  %27982 = vmatprep.subr.bf16.mxu1 %v32100_v8  ;;  %v21268_v33 = vand.u32 4294901760, %v21197_v36 }
 0x634   :  { %26669 = vmatmul.mubr.f32.vlgmr.msra.gmra.mrb[60].mxu0 %v20781_v12  ;;  %26702 = vmatmul.mubr.f32.vlgmr.msra.gmra.mrb[62].mxu1 %v31714_v58  ;;  %v18342_v18 = vpop.f32.mrb[36].mxu1  ;;  %v21269_v3 = vsub.f32 %v21197_v36, %v21268_v33 }
 0x635   :  { %27966 = vmatpush3.bf16.msra.mxu0 %v31788_v62  ;;  %27984 = vmatpush3.bf16.msra.mxu1 %v31356_v50  ;;  %v26379_v20 = vpop.f32.mrb[37].mxu1  ;;  %v21685_v56 = vsel %vm282_vm1, %v18342_v18, 0 }
 0x636   :  { %27967 = vmatprep.subr.bf16.mxu0 %v32100_v8  ;;  %27985 = vmatprep.subr.bf16.mxu1 %v32100_v8  ;;  %v21270_v50 = vand.u32 4294901760, %v21269_v3  ;;  %v21756_v15 = vand.u32 4294901760, %v21685_v56 }
 0x637   :  { %26690 = vmatprep.mubr.msk.f32.mxu0 %vm28717_vm0, %v32072_v55  ;;  %26723 = vmatprep.mubr.msk.f32.mxu1 %vm28717_vm0, %v32072_v55 }
 0x638   :  { %v21271_v23 = vsub.f32 %v21269_v3, %v21270_v50 }
 0x639   :  { %27969 = vmatpush3.bf16.msra.mxu0 %v31800_v47  ;;  %27987 = vmatpush3.bf16.msra.mxu1 %v31370_v37 }
 0x63a   :  { %27976 = vmatprep.subr.bf16.mxu0 %v32100_v8  ;;  %27994 = vmatprep.subr.bf16.mxu1 %v32100_v8  ;;  %v21272_v37 = vand.u32 4294901760, %v21271_v23 }
 0x63c   :  { %26691 = vmatmul.mubr.f32.vlgmr.msra.gmra.mrb[62].mxu0 %v31714_v58  ;;  %26724 = vmatmul.mubr.f32.vlgmr.msra.gmra.mrb[64].mxu1 %v21268_v33 }
 0x63d   :  { %27978 = vmatpush3.bf16.msra.mxu0 %v31352_v41  ;;  %27996 = vmatpush3.bf16.msra.mxu1 %v31352_v41 }
 0x63e   :  { %27979 = vmatprep.subr.bf16.mxu0 %v32100_v8  ;;  %27997 = vmatprep.subr.bf16.mxu1 %v32100_v8 }
 0x63f   :  { %26712 = vmatprep.mubr.msk.f32.mxu0 %vm28717_vm0, %v32072_v55  ;;  %26745 = vmatprep.mubr.msk.f32.mxu1 %vm28717_vm0, %v32072_v55 }
 0x641   :  { %27981 = vmatpush3.bf16.msra.mxu0 %v31366_v17  ;;  %27999 = vmatpush3.bf16.msra.mxu1 %v31366_v17 }
 0x642   :  { %27988 = vmatprep.subr.bf16.mxu0 %v32100_v8  ;;  %28006 = vmatprep.subr.bf16.mxu1 %v32100_v8 }
 0x644   :  { %26713 = vmatmul.mubr.f32.vlgmr.msra.gmra.mrb[64].mxu0 %v21272_v37  ;;  %26746 = vmatmul.mubr.f32.vlgmr.msra.gmra.mrb[66].mxu1 %v21270_v50 }
 0x645   :  { %27990 = vmatpush3.bf16.msra.mxu0 %v31424_v44  ;;  %28008 = vmatpush3.bf16.msra.mxu1 %v31352_v41  ;;  %v21757_v41 = vsub.f32 %v21685_v56, %v21756_v15 }
 0x646   :  { %27991 = vmatprep.subr.bf16.mxu0 %v32100_v8  ;;  %28009 = vmatprep.subr.bf16.mxu1 %v32100_v8 }
 0x647   :  { %26734 = vmatprep.mubr.msk.f32.mxu0 %vm28717_vm0, %v32072_v55  ;;  %26767 = vmatprep.mubr.msk.f32.mxu1 %vm28717_vm0, %v32072_v55 }
 0x649   :  { %27993 = vmatpush3.bf16.msra.mxu0 %v31295_v4  ;;  %28011 = vmatpush3.bf16.msra.mxu1 %v31366_v17  ;;  %v21758_v4 = vand.u32 4294901760, %v21757_v41 }
 0x64a   :  { %28000 = vmatprep.subr.bf16.mxu0 %v32100_v8  ;;  %28018 = vmatprep.subr.bf16.mxu1 %v32100_v8 }
 0x64b   :  { %v21759_v17 = vsub.f32 %v21757_v41, %v21758_v4 }
 0x64c   :  { %26735 = vmatmul.mubr.f32.vlgmr.msra.gmra.mrb[66].mxu0 %v21269_v3  ;;  %26768 = vmatmul.mubr.f32.vlgmr.msra.gmra.mrb[68].mxu1 %v21268_v33 }
 0x64d   :  { %28002 = vmatpush3.bf16.msra.mxu0 %v31457_v10  ;;  %28020 = vmatpush3.bf16.msra.mxu1 %v31459_v26 }
 0x64e   :  { %28003 = vmatprep.subr.bf16.mxu0 %v32100_v8  ;;  %28021 = vmatprep.subr.bf16.mxu1 %v32100_v8 }
 0x64f   :  { %26756 = vmatprep.mubr.msk.f32.mxu0 %vm28717_vm0, %v32072_v55  ;;  %26789 = vmatprep.mubr.msk.f32.mxu1 %vm28717_vm0, %v32072_v55 }
 0x651   :  { %28005 = vmatpush3.bf16.msra.mxu0 %v31306_v6  ;;  %28023 = vmatpush3.bf16.msra.mxu1 %v31472_v13  ;;  %v21760_v6 = vand.u32 4294901760, %v21759_v17 }
 0x652   :  { %28012 = vmatprep.subr.bf16.mxu0 %v32100_v8  ;;  %28030 = vmatprep.subr.bf16.mxu1 %v32100_v8 }
 0x654   :  { %26757 = vmatmul.mubr.f32.vlgmr.msra.gmra.mrb[68].mxu0 %v21268_v33  ;;  %26790 = vmatmul.mubr.f32.vlgmr.msra.gmra.mrb[70].mxu1 %v21756_v15 }
 0x655   :  { %28014 = vmatpush3.bf16.msra.mxu0 %v31493_v24  ;;  %28032 = vmatpush3.bf16.msra.mxu1 %v31493_v24 }
 0x656   :  { %28015 = vmatprep.subr.bf16.mxu0 %v32100_v8  ;;  %28033 = vmatprep.subr.bf16.mxu1 %v32100_v8 }
 0x657   :  { %26778 = vmatprep.mubr.msk.f32.mxu0 %vm28717_vm0, %v32072_v55  ;;  %26811 = vmatprep.mubr.msk.f32.mxu1 %vm28717_vm0, %v32072_v55 }
 0x659   :  { %28017 = vmatpush3.bf16.msra.mxu0 %v31518_v11  ;;  %28035 = vmatpush3.bf16.msra.mxu1 %v31518_v11 }
 0x65a   :  { %28024 = vmatprep.subr.bf16.mxu0 %v32100_v8  ;;  %28042 = vmatprep.subr.bf16.mxu1 %v32100_v8 }
 0x65c   :  { %26779 = vmatmul.mubr.f32.vlgmr.msra.gmra.mrb[70].mxu0 %v21760_v6  ;;  %26812 = vmatmul.mubr.f32.vlgmr.msra.gmra.mrb[72].mxu1 %v21758_v4  ;;  %v18791_v44 = vpop.f32.mrb[38].mxu0 }
 0x65d   :  { %28026 = vmatpush3.bf16.msra.mxu0 %v31543_v30  ;;  %28044 = vmatpush3.bf16.msra.mxu1 %v31493_v24  ;;  %v26409_v10 = vpop.f32.mrb[39].mxu0  ;;  %v22173_v26 = vsel %vm282_vm1, %v18791_v44, 0 }
 0x65e   :  { %28027 = vmatprep.subr.bf16.mxu0 %v32100_v8  ;;  %28045 = vmatprep.subr.bf16.mxu1 %v32100_v8  ;;  %v22244_v30 = vand.u32 4294901760, %v22173_v26 }
 0x65f   :  { %26800 = vmatprep.mubr.msk.f32.mxu0 %vm28717_vm0, %v32072_v55  ;;  %26833 = vmatprep.mubr.msk.f32.mxu1 %vm28717_vm0, %v32072_v55 }
 0x660   :  { %v19240_v13 = vpop.f32.mrb[38].mxu1  ;;  %v22245_v29 = vsub.f32 %v22173_v26, %v22244_v30 }
 0x661   :  { %28029 = vmatpush3.bf16.msra.mxu0 %v31559_v25  ;;  %28047 = vmatpush3.bf16.msra.mxu1 %v31518_v11  ;;  %v26439_v24 = vpop.f32.mrb[39].mxu1 }
 0x662   :  { %28036 = vmatprep.subr.bf16.mxu0 %v32100_v8  ;;  %28054 = vmatprep.subr.bf16.mxu1 %v32100_v8  ;;  %v22246_v11 = vand.u32 4294901760, %v22245_v29 }
 0x664   :  { %26801 = vmatmul.mubr.f32.vlgmr.msra.gmra.mrb[72].mxu0 %v21757_v41  ;;  %26834 = vmatmul.mubr.f32.vlgmr.msra.gmra.mrb[74].mxu1 %v21756_v15  ;;  %v22247_v25 = vsub.f32 %v22245_v29, %v22246_v11 }
 0x665   :  { %28038 = vmatpush3.bf16.msra.mxu0 %v31581_v34  ;;  %28056 = vmatpush3.bf16.msra.mxu1 %v31583_v63  ;;  %v22661_v63 = vsel %vm282_vm1, %v19240_v13, 0 }
 0x666   :  { %28039 = vmatprep.subr.bf16.mxu0 %v32100_v8  ;;  %28057 = vmatprep.subr.bf16.mxu1 %v32100_v8  ;;  %v22248_v34 = vand.u32 4294901760, %v22247_v25 }
 0x667   :  { %26822 = vmatprep.mubr.msk.f32.mxu0 %vm28717_vm0, %v32072_v55  ;;  %26855 = vmatprep.mubr.msk.f32.mxu1 %vm28717_vm0, %v32072_v55 }
 0x669   :  { %28041 = vmatpush3.bf16.msra.mxu0 %v31600_v52  ;;  %28059 = vmatpush3.bf16.msra.mxu1 %v31602_v57  ;;  %v22732_v52 = vand.u32 4294901760, %v22661_v63 }
 0x66a   :  { %28048 = vmatprep.subr.bf16.mxu0 %v32100_v8  ;;  %28066 = vmatprep.subr.bf16.mxu1 %v32100_v8 }
 0x66b   :  { %v22733_v57 = vsub.f32 %v22661_v63, %v22732_v52 }
 0x66c   :  { %26823 = vmatmul.mubr.f32.vlgmr.msra.gmra.mrb[74].mxu0 %v21756_v15  ;;  %26856 = vmatmul.mubr.f32.vlgmr.msra.gmra.mrb[76].mxu1 %v22244_v30 }
 0x66d   :  { %28050 = vmatpush3.bf16.msra.mxu0 %v31622_v43  ;;  %28068 = vmatpush3.bf16.msra.mxu1 %v31622_v43 }
 0x66e   :  { %28051 = vmatprep.subr.bf16.mxu0 %v32100_v8  ;;  %28069 = vmatprep.subr.bf16.mxu1 %v32100_v8 }
 0x66f   :  { %26844 = vmatprep.mubr.msk.f32.mxu0 %vm28717_vm0, %v32072_v55  ;;  %26877 = vmatprep.mubr.msk.f32.mxu1 %vm28717_vm0, %v32072_v55 }
 0x671   :  { %28053 = vmatpush3.bf16.msra.mxu0 %v31647_v60  ;;  %28071 = vmatpush3.bf16.msra.mxu1 %v31647_v60 }
 0x672   :  { %28060 = vmatprep.subr.bf16.mxu0 %v32100_v8  ;;  %28078 = vmatprep.subr.bf16.mxu1 %v32100_v8 }
 0x674   :  { %26845 = vmatmul.mubr.f32.vlgmr.msra.gmra.mrb[76].mxu0 %v22248_v34  ;;  %26878 = vmatmul.mubr.f32.vlgmr.msra.gmra.mrb[78].mxu1 %v22246_v11 }
 0x675   :  { %28062 = vmatpush3.bf16.msra.mxu0 %v31671_v51  ;;  %28080 = vmatpush3.bf16.msra.mxu1 %v31622_v43  ;;  %v22734_v43 = vand.u32 4294901760, %v22733_v57 }
 0x676   :  { %28063 = vmatprep.subr.bf16.mxu0 %v32100_v8  ;;  %28081 = vmatprep.subr.bf16.mxu1 %v32100_v8 }
 0x677   :  { %26866 = vmatprep.mubr.msk.f32.mxu0 %vm28717_vm0, %v32072_v55  ;;  %26899 = vmatprep.mubr.msk.f32.mxu1 %vm28717_vm0, %v32072_v55 }
 0x679   :  { %28065 = vmatpush3.bf16.msra.mxu0 %v31687_v40  ;;  %28083 = vmatpush3.bf16.msra.mxu1 %v31647_v60  ;;  %v22735_v60 = vsub.f32 %v22733_v57, %v22734_v43 }
 0x67a   :  { %28072 = vmatprep.subr.bf16.mxu0 %v32100_v8  ;;  %28090 = vmatprep.subr.bf16.mxu1 %v32100_v8 }
 0x67b   :  { %v22736_v53 = vand.u32 4294901760, %v22735_v60 }
 0x67c   :  { %26867 = vmatmul.mubr.f32.vlgmr.msra.gmra.mrb[78].mxu0 %v22245_v29  ;;  %26900 = vmatmul.mubr.f32.vlgmr.msra.gmra.mrb[80].mxu1 %v22244_v30 }
 0x67d   :  { %28074 = vmatpush3.bf16.msra.mxu0 %v31710_v38  ;;  %28092 = vmatpush3.bf16.msra.mxu1 %v31712_v31 }
 0x67e   :  { %28075 = vmatprep.subr.bf16.mxu0 %v32100_v8  ;;  %28093 = vmatprep.subr.bf16.mxu1 %v32100_v8 }
 0x67f   :  { %26888 = vmatprep.mubr.msk.f32.mxu0 %vm28717_vm0, %v32072_v55  ;;  %26921 = vmatprep.mubr.msk.f32.mxu1 %vm28717_vm0, %v32072_v55 }
 0x681   :  { %28077 = vmatpush3.bf16.msra.mxu0 %v31725_v7  ;;  %28095 = vmatpush3.bf16.msra.mxu1 %v31727_v42 }
 0x682   :  { %28084 = vmatprep.subr.bf16.mxu0 %v32100_v8  ;;  %28102 = vmatprep.subr.bf16.mxu1 %v32100_v8 }
 0x684   :  { %26889 = vmatmul.mubr.f32.vlgmr.msra.gmra.mrb[80].mxu0 %v22244_v30  ;;  %26922 = vmatmul.mubr.f32.vlgmr.msra.gmra.mrb[82].mxu1 %v22732_v52 }
 0x685   :  { %28086 = vmatpush3.bf16.msra.mxu0 %v31742_v22  ;;  %28104 = vmatpush3.bf16.msra.mxu1 %v31742_v22 }
 0x686   :  { %28087 = vmatprep.subr.bf16.mxu0 %v32100_v8  ;;  %28105 = vmatprep.subr.bf16.mxu1 %v32100_v8 }
 0x687   :  { %26910 = vmatprep.mubr.msk.f32.mxu0 %vm28717_vm0, %v32072_v55  ;;  %26943 = vmatprep.mubr.msk.f32.mxu1 %vm28717_vm0, %v32072_v55 }
 0x689   :  { %28089 = vmatpush3.bf16.msra.mxu0 %v31754_v19  ;;  %28107 = vmatpush3.bf16.msra.mxu1 %v31754_v19 }
 0x68a   :  { %28096 = vmatprep.subr.bf16.mxu0 %v32100_v8  ;;  %28114 = vmatprep.subr.bf16.mxu1 %v32100_v8 }
 0x68c   :  { %26911 = vmatmul.mubr.f32.vlgmr.msra.gmra.mrb[82].mxu0 %v22736_v53  ;;  %26944 = vmatmul.mubr.f32.vlgmr.msra.gmra.mrb[84].mxu1 %v22734_v43 }
 0x68d   :  { %28098 = vmatpush3.bf16.msra.mxu0 %v31766_v45  ;;  %28116 = vmatpush3.bf16.msra.mxu1 %v31742_v22 }
 0x68e   :  { %28099 = vmatprep.subr.bf16.mxu0 %v32100_v8  ;;  %28117 = vmatprep.subr.bf16.mxu1 %v32100_v8 }
 0x68f   :  { %26932 = vmatprep.mubr.msk.f32.mxu0 %vm28717_vm0, %v32072_v55  ;;  %26965 = vmatprep.mubr.msk.f32.mxu1 %vm28717_vm0, %v32072_v55 }
 0x691   :  { %28101 = vmatpush3.bf16.msra.mxu0 %v31774_v54  ;;  %28119 = vmatpush3.bf16.msra.mxu1 %v31754_v19 }
 0x692   :  { %28108 = vmatprep.subr.bf16.mxu0 %v32100_v8 }
 0x694   :  { %26933 = vmatmul.mubr.f32.vlgmr.msra.gmra.mrb[84].mxu0 %v22733_v57  ;;  %26966 = vmatmul.mubr.f32.vlgmr.msra.gmra.mrb[86].mxu1 %v22732_v52 }
 0x695   :  { %28110 = vmatpush3.bf16.msra.mxu0 %v31788_v62  ;;  %26954 = vmatprep.mubr.msk.f32.mxu0 %vm28717_vm0, %v32072_v55 }
 0x696   :  { %28111 = vmatprep.subr.bf16.mxu0 %v32100_v8 }
 0x699   :  { %28113 = vmatpush3.bf16.msra.mxu0 %v31800_v47 }
 0x69c   :  { %26955 = vmatmul.mubr.f32.vlgmr.msra.gmra.mrb[86].mxu0 %v22732_v52 }
 0x6af   :  { %v19413_v49 = vpop.f32.mrb[40].mxu1 }
 0x6b0   :  { %v26461_v51 = vpop.f32.mrb[41].mxu1 }
 0x6b7   :  { %v19570_v59 = vpop.f32.mrb[42].mxu1  ;;  %v19322_v5 = vpop.f32.mrb[40].mxu0 }
 0x6b8   :  { %v19414_v46 = vadd.f32 %v19413_v49, %v19322_v5  ;;  %v26483_v48 = vpop.f32.mrb[43].mxu1  ;;  %v26450_v14 = vpop.f32.mrb[41].mxu0 }
 0x6bf   :  { %v19493_v40 = vpop.f32.mrb[42].mxu0  ;;  %v19728_v16 = vpop.f32.mrb[44].mxu1 }
 0x6c0   :  { %v19494_v28 = vadd.f32 %v19493_v40, %v19414_v46  ;;  %v26472_v1 = vpop.f32.mrb[43].mxu0  ;;  %v26505_v9 = vpop.f32.mrb[45].mxu1 }
 0x6c2   :  { %v19571_v61 = vadd.f32 %v19570_v59, %v19494_v28 }
 0x6c7   :  { %v19653_v38 = vpop.f32.mrb[44].mxu0  ;;  %v19901_v55 = vpop.f32.mrb[46].mxu1 }
 0x6c8   :  { %v19654_v31 = vadd.f32 %v19653_v38, %v19571_v61  ;;  %v26494_v8 = vpop.f32.mrb[45].mxu0  ;;  %v26527_v35 = vpop.f32.mrb[47].mxu1 }
 0x6ca   :  { %v19729_v21 = vadd.f32 %v19728_v16, %v19654_v31  ;;  %v31952_v16 = vld [vmem:[#allocation8 + $0xc] ss:$0 sm:$0xff] }
 0x6cf   :  { %v19810_v58 = vpop.f32.mrb[46].mxu0  ;;  %v20058_v7 = vpop.f32.mrb[48].mxu1 }
 0x6d0   :  { %v19902_v42 = vadd.f32 %v19901_v55, %v19810_v58  ;;  %v26516_v12 = vpop.f32.mrb[47].mxu0  ;;  %v26549_v22 = vpop.f32.mrb[49].mxu1 }
 0x6d7   :  { %v19981_v0 = vpop.f32.mrb[48].mxu0  ;;  %v20216_v19 = vpop.f32.mrb[50].mxu1 }
 0x6d8   :  { %v19982_v2 = vadd.f32 %v19981_v0, %v19902_v42  ;;  %v26538_v45 = vpop.f32.mrb[49].mxu0  ;;  %v26571_v32 = vpop.f32.mrb[51].mxu1 }
 0x6da   :  { %v20059_v54 = vadd.f32 %v20058_v7, %v19982_v2 }
 0x6df   :  { %v20141_v39 = vpop.f32.mrb[50].mxu0  ;;  %v20389_v62 = vpop.f32.mrb[52].mxu1 }
 0x6e0   :  { %v20142_v36 = vadd.f32 %v20141_v39, %v20059_v54  ;;  %v26560_v27 = vpop.f32.mrb[51].mxu0  ;;  %v26593_v33 = vpop.f32.mrb[53].mxu1 }
 0x6e2   :  { %v20217_v18 = vadd.f32 %v20216_v19, %v20142_v36 }
 0x6e4   :  { %v23148_v47 = vadd.f32 %v20217_v18, %v19729_v21 }
 0x6e7   :  { %v20298_v3 = vpop.f32.mrb[52].mxu0  ;;  %v20546_v20 = vpop.f32.mrb[54].mxu1 }
 0x6e8   :  { %v20390_v50 = vadd.f32 %v20389_v62, %v20298_v3  ;;  %v26582_v23 = vpop.f32.mrb[53].mxu0  ;;  %v26615_v37 = vpop.f32.mrb[55].mxu1 }
 0x6ef   :  { %v20469_v56 = vpop.f32.mrb[54].mxu0  ;;  %v20704_v15 = vpop.f32.mrb[56].mxu1 }
 0x6f0   :  { %v20470_v41 = vadd.f32 %v20469_v56, %v20390_v50  ;;  %v26604_v4 = vpop.f32.mrb[55].mxu0  ;;  %v26637_v17 = vpop.f32.mrb[57].mxu1 }
 0x6f2   :  { %v20547_v6 = vadd.f32 %v20546_v20, %v20470_v41 }
 0x6f7   :  { %v20629_v44 = vpop.f32.mrb[56].mxu0  ;;  %v20877_v10 = vpop.f32.mrb[58].mxu1 }
 0x6f8   :  { %v20630_v26 = vadd.f32 %v20629_v44, %v20547_v6  ;;  %v26626_v13 = vpop.f32.mrb[57].mxu0  ;;  %v26659_v30 = vpop.f32.mrb[59].mxu1 }
 0x6fa   :  { %v20705_v24 = vadd.f32 %v20704_v15, %v20630_v26 }
 0x6fc   :  { %v23150_v29 = vadd.f32 %v23148_v47, %v20705_v24 }
 0x6ff   :  { %v20786_v11 = vpop.f32.mrb[58].mxu0  ;;  %v21034_v25 = vpop.f32.mrb[60].mxu1 }
 0x700   :  { %v20878_v34 = vadd.f32 %v20877_v10, %v20786_v11  ;;  %v26648_v63 = vpop.f32.mrb[59].mxu0  ;;  %v26681_v52 = vpop.f32.mrb[61].mxu1 }
 0x707   :  { %v20957_v57 = vpop.f32.mrb[60].mxu0  ;;  %v21192_v43 = vpop.f32.mrb[62].mxu1 }
 0x708   :  { %v20958_v60 = vadd.f32 %v20957_v57, %v20878_v34  ;;  %v26670_v53 = vpop.f32.mrb[61].mxu0  ;;  %v26703_v49 = vpop.f32.mrb[63].mxu1 }
 0x70a   :  { %v21035_v51 = vadd.f32 %v21034_v25, %v20958_v60 }
 0x70f   :  { %v21117_v59 = vpop.f32.mrb[62].mxu0  ;;  %v21365_v5 = vpop.f32.mrb[64].mxu1 }
 0x710   :  { %v21118_v46 = vadd.f32 %v21117_v59, %v21035_v51  ;;  %v26692_v48 = vpop.f32.mrb[63].mxu0  ;;  %v26725_v14 = vpop.f32.mrb[65].mxu1 }
 0x712   :  { %v21193_v40 = vadd.f32 %v21192_v43, %v21118_v46 }
 0x714   :  { %v23152_v28 = vadd.f32 %v23150_v29, %v21193_v40 }
 0x716   :  { %v31955_v1 = vadd.f32 %v31952_v16, %v23152_v28 }
 0x717   :  { %v21274_v9 = vpop.f32.mrb[64].mxu0  ;;  %v21522_v61 = vpop.f32.mrb[66].mxu1 }
 0x718   :  { %v21366_v38 = vadd.f32 %v21365_v5, %v21274_v9  ;;  %v26714_v55 = vpop.f32.mrb[65].mxu0  ;;  %v26747_v31 = vpop.f32.mrb[67].mxu1  ;;  %v23160_v8 = vsel %vm282_vm1, %v31955_v1, 0.0 }
 0x719   :  { %23161 = vadd.xlane.f32.xlu0 %v23160_v8 }
 0x71f   :  { %v21445_v35 = vpop.f32.mrb[66].mxu0  ;;  %v21680_v21 = vpop.f32.mrb[68].mxu1 }
 0x720   :  { %v21446_v58 = vadd.f32 %v21445_v35, %v21366_v38  ;;  %v26736_v7 = vpop.f32.mrb[67].mxu0  ;;  %v26769_v42 = vpop.f32.mrb[69].mxu1 }
 0x722   :  { %v21523_v12 = vadd.f32 %v21522_v61, %v21446_v58 }
 0x727   :  { %v21605_v22 = vpop.f32.mrb[68].mxu0  ;;  %v21853_v0 = vpop.f32.mrb[70].mxu1 }
 0x728   :  { %v21606_v19 = vadd.f32 %v21605_v22, %v21523_v12  ;;  %v26758_v2 = vpop.f32.mrb[69].mxu0  ;;  %v26791_v45 = vpop.f32.mrb[71].mxu1 }
 0x72a   :  { %v21681_v32 = vadd.f32 %v21680_v21, %v21606_v19 }
 0x72f   :  { %v21762_v54 = vpop.f32.mrb[70].mxu0  ;;  %v22010_v39 = vpop.f32.mrb[72].mxu1 }
 0x730   :  { %v21854_v62 = vadd.f32 %v21853_v0, %v21762_v54  ;;  %v26780_v36 = vpop.f32.mrb[71].mxu0  ;;  %v26813_v27 = vpop.f32.mrb[73].mxu1 }
 0x737   :  { %v21933_v33 = vpop.f32.mrb[72].mxu0  ;;  %v22168_v18 = vpop.f32.mrb[74].mxu1 }
 0x738   :  { %v21934_v47 = vadd.f32 %v21933_v33, %v21854_v62  ;;  %v26802_v3 = vpop.f32.mrb[73].mxu0  ;;  %v26835_v20 = vpop.f32.mrb[75].mxu1  ;;  %v23222_v33 = vld [vmem:[#allocation8 + $0xd] ss:$0 sm:$0xff] }
 0x73a   :  { %v22011_v50 = vadd.f32 %v22010_v39, %v21934_v47  ;;  %v23223_v47 = vld [vmem:[#allocation8 + $0xe] ss:$0 sm:$0xff] }
 0x73f   :  { %v22093_v23 = vpop.f32.mrb[74].mxu0  ;;  %v22341_v37 = vpop.f32.mrb[76].mxu1 }
 0x740   :  { %v22094_v56 = vadd.f32 %v22093_v23, %v22011_v50  ;;  %v26824_v15 = vpop.f32.mrb[75].mxu0  ;;  %v26857_v41 = vpop.f32.mrb[77].mxu1 }
 0x742   :  { %v22169_v4 = vadd.f32 %v22168_v18, %v22094_v56 }
 0x744   :  { %v23149_v17 = vadd.f32 %v22169_v4, %v21681_v32 }
 0x747   :  { %v22250_v6 = vpop.f32.mrb[76].mxu0  ;;  %v22498_v44 = vpop.f32.mrb[78].mxu1 }
 0x748   :  { %v22342_v10 = vadd.f32 %v22341_v37, %v22250_v6  ;;  %v26846_v26 = vpop.f32.mrb[77].mxu0  ;;  %v26879_v13 = vpop.f32.mrb[79].mxu1 }
 0x74f   :  { %v22421_v30 = vpop.f32.mrb[78].mxu0  ;;  %v22656_v24 = vpop.f32.mrb[80].mxu1 }
 0x750   :  { %v22422_v29 = vadd.f32 %v22421_v30, %v22342_v10  ;;  %v26868_v11 = vpop.f32.mrb[79].mxu0  ;;  %v26901_v25 = vpop.f32.mrb[81].mxu1 }
 0x752   :  { %v22499_v34 = vadd.f32 %v22498_v44, %v22422_v29 }
 0x757   :  { %v22581_v63 = vpop.f32.mrb[80].mxu0  ;;  %v22829_v52 = vpop.f32.mrb[82].mxu1 }
 0x758   :  { %v22582_v57 = vadd.f32 %v22581_v63, %v22499_v34  ;;  %v26890_v43 = vpop.f32.mrb[81].mxu0  ;;  %v26923_v60 = vpop.f32.mrb[83].mxu1 }
 0x75a   :  { %v22657_v53 = vadd.f32 %v22656_v24, %v22582_v57 }
 0x75c   :  { %v23151_v49 = vadd.f32 %v23149_v17, %v22657_v53 }
 0x75f   :  { %v22738_v51 = vpop.f32.mrb[82].mxu0  ;;  %v22986_v59 = vpop.f32.mrb[84].mxu1 }
 0x760   :  { %v22830_v5 = vadd.f32 %v22829_v52, %v22738_v51  ;;  %v26912_v46 = vpop.f32.mrb[83].mxu0  ;;  %v26945_v48 = vpop.f32.mrb[85].mxu1 }
 0x767   :  { %v22909_v14 = vpop.f32.mrb[84].mxu0  ;;  %v23144_v40 = vpop.f32.mrb[86].mxu1 }
 0x768   :  { %v22910_v28 = vadd.f32 %v22909_v14, %v22830_v5  ;;  %v26934_v9 = vpop.f32.mrb[85].mxu0  ;;  %v26967_v61 = vpop.f32.mrb[87].mxu1 }
 0x76a   :  { %v22987_v38 = vadd.f32 %v22986_v59, %v22910_v28 }
 0x76f   :  { %v23069_v55 = vpop.f32.mrb[86].mxu0 }
 0x770   :  { %v23070_v31 = vadd.f32 %v23069_v55, %v22987_v38  ;;  %v26956_v8 = vpop.f32.mrb[87].mxu0 }
 0x772   :  { %v23145_v35 = vadd.f32 %v23144_v40, %v23070_v31 }
 0x774   :  { %v23153_v21 = vadd.f32 %v23151_v49, %v23145_v35 }
 0x776   :  { %v23159_v58 = vadd.f32 %v31952_v16, %v23153_v21 }
 0x778   :  { %v23163_v7 = vsel %vm282_vm1, %v23159_v58, 0.0 }
 0x779   :  { %23164 = vadd.xlane.f32.xlu1 %v23163_v7 }
 0x7a6   :  { %v23162_v42 = vpop.xlane.xlu0 %23161 }
 0x7a7   :  { %v23167_v12 = vmul.f32 0.03125, %v23162_v42 }
 0x7a9   :  { %v23169_v22 = vsub.f32 %v31955_v1, %v23167_v12 }
 0x7ab   :  { %v23171_v0 = vmul.f32 %v23169_v22, %v23169_v22 }
 0x7ad   :  { %v23173_v19 = vsel %vm282_vm1, %v23171_v0, 0.0 }
 0x7ae   :  { %23174 = vadd.xlane.f32.xlu0 %v23173_v19 }
 0x806   :  { %v23165_v2 = vpop.xlane.xlu1 %23164 }
 0x807   :  { %v23168_v45 = vmul.f32 0.03125, %v23165_v2 }
 0x809   :  { %v23170_v32 = vsub.f32 %v23159_v58, %v23168_v45 }
 0x80b   :  { %v23172_v54 = vmul.f32 %v23170_v32, %v23170_v32 }
 0x80d   :  { %v23176_v39 = vsel %vm282_vm1, %v23172_v54, 0.0 }
 0x80e   :  { %23177 = vadd.xlane.f32.xlu1 %v23176_v39 }
 0x83b   :  { %v23175_v62 = vpop.xlane.xlu0 %23174 }
 0x83c   :  { %v23179_v16 = vmul.f32 0.03125, %v23175_v62 }
 0x83e   :  { %v23181_v36 = vadd.f32 1e-05, %v23179_v16 }
 0x840   :  { %28588 = vrsqrt.f32 %v23181_v36 }
 0x84a   :  { %v28589_v27 = vpop.eup %28588 }
 0x84b   :  { %v23185_v18 = vmul.f32 %v28589_v27, %v23169_v22 }
 0x84d   :  { %v23191_v1 = vmul.f32 %v23222_v33, %v23185_v18 }
 0x84f   :  { %v23197_v3 = vadd.f32 %v23223_v47, %v23191_v1 }
 0x851   :  { %23199 = vst.msk [vmem:[#allocation10] sm:$0xff] %vm282_vm1, %v23197_v3 }
 0x89b   :  { %v23178_v20 = vpop.xlane.xlu1 %23177 }
 0x89c   :  { %v23180_v50 = vmul.f32 0.03125, %v23178_v20 }
 0x89e   :  { %v23182_v23 = vadd.f32 1e-05, %v23180_v50 }
 0x8a0   :  { %28590 = vrsqrt.f32 %v23182_v23 }
 0x8aa   :  { %v28591_v37 = vpop.eup %28590 }
 0x8ab   :  { %v23186_v56 = vmul.f32 %v28591_v37, %v23170_v32 }
 0x8ad   :  { %v23192_v15 = vmul.f32 %v23222_v33, %v23186_v56 }
 0x8af   :  { %v23198_v41 = vadd.f32 %v23223_v47, %v23192_v15 }
 0x8b1   :  { %23200 = vst.msk [vmem:[#allocation10 + $0x8] sm:$0xff] %vm282_vm1, %v23198_v41 }
 0x8b2   :  { %28691 = shalt.err (!%p28688_p8)
}
 0x8b3   :  { %s28692_s15 = scalar_lea.hbm %s31985_s4, 256 }
 0x8b4   :  { %p28693_p9 = scmp.ne.s32.totalorder %s31985_s4, %s28692_s15  ;;  %p28696_p10 = scmp.lt.u32.totalorder %s28692_s15, %s31985_s4 }
 0x8b6   :  { %p28698_p11 = pnand %p28696_p10, %p28693_p9 }
 0x8b8   :  { %28701 = shalt.err (!%p28698_p11)
}
 0x8b9   :  { %23212 = dma.vmem_to_hbm [thread:$0]  %s23207_s12, 256, %s31985_s4, [#allocation4], %s28712_s27, %s28712_s27, %s28713_s28  }
 0x8ba   :  { %28708 = dma.done.wait [#allocation4], 256  }
 0x8bb   :  { %28709 = vsyncadd [#allocation4], 4294967040 }
 0x8bc   :  { %23216 = vsyncpa [#allocation3], 1 }
 0x8bd   :  { %23217 = vsyncpa [#allocation6], 1 }
 0x8be   :  { %23218 = vsyncpa [#allocation9], 1 }
 0x8bf   :  { %23219 = vsyncpa [#allocation4], 1 }

</bundles_post_ra>
